<compile_context>
chip_gen: v7x
topology: tpu7x:2x2x1
jax: 0.10.0
libtpu: 0.0.40
codegen_flags: <defaults>
</compile_context>

<pallas_src>
import functools

import numpy as np

import jax
import jax.numpy as jnp
from jax.experimental import pallas as pl
from jax.experimental.pallas import tpu as pltpu


# ----------------------------------------------------------------------------
# Fused LeNet5 kernel
# ----------------------------------------------------------------------------
def _lenet5_kernel(x_ref, w1_ref, b1_ref, cs1e_ref, cs1o_ref, rs1e_ref, rs1o_ref,
                   w2_ref, b2_ref, cs2e_ref, cs2o_ref, rs2e_ref, rs2o_ref,
                   fc1w_ref, fc1b_ref, fc2w_ref, fc2b_ref, fc3w_ref, fc3b_ref,
                   out_ref, *, nb):
    """Processes one batch tile of `nb` images entirely in VMEM."""

    def dot(a, b):
        return jnp.dot(a, b, preferred_element_type=jnp.float32)

    cs1e, cs1o = cs1e_ref[...], cs1o_ref[...]
    rs1e, rs1o = rs1e_ref[...], rs1o_ref[...]
    cs2e, cs2o = cs2e_ref[...], cs2o_ref[...]
    rs2e, rs2o = rs2e_ref[...], rs2o_ref[...]
    b1 = b1_ref[...]                       # (1, 168)  bias, repeated per lane block
    b2 = b2_ref[...]                       # (1, 160)

    pooled = []                            # per-image (5, 80) pooled conv2 features
    for n in range(nb):
        xn = x_ref[n]                      # (32, 32) padded input image

        # ---- conv1 (1->6, 5x5, pad=2): 5 banded matmuls over the width axis.
        # Output layout: rows = y (28), lanes = co*28 + x  -> (28, 168).
        c1 = dot(xn[0:28, :], w1_ref[0])
        for dy in range(1, 5):
            c1 = c1 + dot(xn[dy:dy + 28, :], w1_ref[dy])
        c1 = jnp.maximum(c1 + b1, 0.0)

        # ---- 2x2 max pool: even/odd lane selection, then even/odd row selection.
        pw = jnp.maximum(dot(c1, cs1e), dot(c1, cs1o))      # (28, 84)
        p1 = jnp.maximum(dot(rs1e, pw), dot(rs1o, pw))      # (14, 84): lanes = ci*14 + x

        # ---- conv2 (6->16, 5x5): same banded-matmul scheme, channels on lanes.
        # Output layout: rows = y (10), lanes = co*10 + x  -> (10, 160).
        c2 = dot(p1[0:10, :], w2_ref[0])
        for dy in range(1, 5):
            c2 = c2 + dot(p1[dy:dy + 10, :], w2_ref[dy])
        c2 = jnp.maximum(c2 + b2, 0.0)

        # ---- 2x2 max pool -> (5, 80): rows = i, lanes = co*5 + j.
        pw2 = jnp.maximum(dot(c2, cs2e), dot(c2, cs2o))     # (10, 80)
        p2 = jnp.maximum(dot(rs2e, pw2), dot(rs2o, pw2))    # (5, 80)
        pooled.append(p2)

    # ---- fc1: accumulate over the 5 pooled rows; weights were pre-permuted so
    # the kernel's (i, co, j) feature order matches PyTorch's (co, i, j) flatten.
    acc = fc1b_ref[...]                                     # (1, 128)
    for i in range(5):
        xi = jnp.concatenate([pooled[n][i:i + 1, :] for n in range(nb)], axis=0)  # (nb, 80)
        acc = acc + dot(xi, fc1w_ref[i])                    # (nb, 128)
    h = jnp.maximum(acc, 0.0)

    # ---- fc2 / fc3 (weights padded to 128x128, padding lanes stay exactly 0).
    h = jnp.maximum(dot(h, fc2w_ref[...]) + fc2b_ref[...], 0.0)
    h = dot(h, fc3w_ref[...]) + fc3b_ref[...]               # (nb, 128), logits in lanes 0..9

    out_ref[0] = h


# ----------------------------------------------------------------------------
# One-time weight re-layout (host side, outside the hot path)
# ----------------------------------------------------------------------------
def prepare_params(p):
    w1 = np.asarray(p["conv1_w"], np.float32)    # (6, 1, 5, 5)
    b1 = np.asarray(p["conv1_b"], np.float32)    # (6,)
    w2 = np.asarray(p["conv2_w"], np.float32)    # (16, 6, 5, 5)
    b2 = np.asarray(p["conv2_b"], np.float32)    # (16,)
    f1w = np.asarray(p["fc1_w"], np.float32)     # (120, 400)
    f1b = np.asarray(p["fc1_b"], np.float32)
    f2w = np.asarray(p["fc2_w"], np.float32)     # (84, 120)
    f2b = np.asarray(p["fc2_b"], np.float32)
    f3w = np.asarray(p["fc3_w"], np.float32)     # (10, 84)
    f3b = np.asarray(p["fc3_b"], np.float32)

    # conv1 banded matrices: c1[y, co*28+x] = sum_dy (x_pad[y+dy, :] @ w1p[dy])[co*28+x]
    w1p = np.zeros((5, 32, 6 * 28), np.float32)
    xs = np.arange(28)
    for co in range(6):
        for dy in range(5):
            for dx in range(5):
                w1p[dy, xs + dx, co * 28 + xs] = w1[co, 0, dy, dx]
    b1row = np.repeat(b1, 28)[None, :]                       # (1, 168)

    # conv2 banded matrices: input lanes = ci*14 + x, output lanes = co*10 + x.
    w2p = np.zeros((5, 6 * 14, 16 * 10), np.float32)
    xs2 = np.arange(10)
    for co in range(16):
        for ci in range(6):
            for dy in range(5):
                for dx in range(5):
                    w2p[dy, ci * 14 + xs2 + dx, co * 10 + xs2] = w2[co, ci, dy, dx]
    b2row = np.repeat(b2, 10)[None, :]                       # (1, 160)

    # 2x2-pool even/odd selection matrices.
    def col_select(n_ch, w_in, parity):
        m = np.zeros((n_ch * w_in, n_ch * (w_in // 2)), np.float32)
        j = np.arange(w_in // 2)
        for c in range(n_ch):
            m[c * w_in + 2 * j + parity, c * (w_in // 2) + j] = 1.0
        return m

    def row_select(h_in, parity):
        m = np.zeros((h_in // 2, h_in), np.float32)
        i = np.arange(h_in // 2)
        m[i, 2 * i + parity] = 1.0
        return m

    cs1e, cs1o = col_select(6, 28, 0), col_select(6, 28, 1)      # (168, 84)
    rs1e, rs1o = row_select(28, 0), row_select(28, 1)            # (14, 28)
    cs2e, cs2o = col_select(16, 10, 0), col_select(16, 10, 1)    # (160, 80)
    rs2e, rs2o = row_select(10, 0), row_select(10, 1)            # (5, 10)

    # fc1: kernel feature order is (i, co*5+j); PyTorch flatten order is co*25+i*5+j.
    t = f1w.T.reshape(16, 5, 5, 120).transpose(1, 0, 2, 3).reshape(5, 80, 120)
    fc1w = np.zeros((5, 80, 128), np.float32)
    fc1w[..., :120] = t
    fc1b = np.zeros((1, 128), np.float32)
    fc1b[0, :120] = f1b

    fc2w = np.zeros((128, 128), np.float32)
    fc2w[:120, :84] = f2w.T
    fc2b = np.zeros((1, 128), np.float32)
    fc2b[0, :84] = f2b

    fc3w = np.zeros((128, 128), np.float32)
    fc3w[:84, :10] = f3w.T
    fc3b = np.zeros((1, 128), np.float32)
    fc3b[0, :10] = f3b

    prep = dict(w1=w1p, b1=b1row, cs1e=cs1e, cs1o=cs1o, rs1e=rs1e, rs1o=rs1o,
                w2=w2p, b2=b2row, cs2e=cs2e, cs2o=cs2o, rs2e=rs2e, rs2o=rs2o,
                fc1w=fc1w, fc1b=fc1b, fc2w=fc2w, fc2b=fc2b, fc3w=fc3w, fc3b=fc3b)
    return {k: jnp.asarray(v) for k, v in prep.items()}


# ----------------------------------------------------------------------------
# Forward wrapper: one fused pallas_call, grid over batch tiles
# ----------------------------------------------------------------------------
@functools.partial(jax.jit, static_argnames=("nb",))
def lenet5_forward(x, prep, *, nb=2):
    n = x.shape[0]
    pad_n = (-n) % nb
    # Only wrapper-side glue: spatial pad (conv1 padding=2) of the tiny input.
    xs = jnp.pad(x[:, 0, :, :], ((0, pad_n), (2, 2), (2, 2)))    # (Np, 32, 32)
    num_tiles = xs.shape[0] // nb

    def spec2(shape):
        return pl.BlockSpec(shape, lambda i: (0, 0))

    def spec3(shape):
        return pl.BlockSpec(shape, lambda i: (0, 0, 0))

    out = pl.pallas_call(
        functools.partial(_lenet5_kernel, nb=nb),
        out_shape=jax.ShapeDtypeStruct((num_tiles, nb, 128), jnp.float32),
        grid=(num_tiles,),
        in_specs=[
            pl.BlockSpec((nb, 32, 32), lambda i: (i, 0, 0)),     # batch tile of images
            spec3((5, 32, 168)), spec2((1, 168)),                # conv1 banded W, bias
            spec2((168, 84)), spec2((168, 84)),                  # pool1 lane selectors
            spec2((14, 28)), spec2((14, 28)),                    # pool1 row selectors
            spec3((5, 84, 160)), spec2((1, 160)),                # conv2 banded W, bias
            spec2((160, 80)), spec2((160, 80)),                  # pool2 lane selectors
            spec2((5, 10)), spec2((5, 10)),                      # pool2 row selectors
            spec3((5, 80, 128)), spec2((1, 128)),                # fc1 W (per-row), bias
            spec2((128, 128)), spec2((1, 128)),                  # fc2 W, bias
            spec2((128, 128)), spec2((1, 128)),                  # fc3 W, bias
        ],
        out_specs=pl.BlockSpec((1, nb, 128), lambda i: (i, 0, 0)),
        compiler_params=pltpu.CompilerParams(
            dimension_semantics=("parallel",)),
    )(xs,
      prep["w1"], prep["b1"], prep["cs1e"], prep["cs1o"], prep["rs1e"], prep["rs1o"],
      prep["w2"], prep["b2"], prep["cs2e"], prep["cs2o"], prep["rs2e"], prep["rs2o"],
      prep["fc1w"], prep["fc1b"], prep["fc2w"], prep["fc2b"], prep["fc3w"], prep["fc3b"])

    return out.reshape(num_tiles * nb, 128)[:n, :10]


# ----------------------------------------------------------------------------
# Deterministic synthetic parameters (PyTorch shapes)
# ----------------------------------------------------------------------------
def init_params(key):
    ks = jax.random.split(key, 10)

    def uniform(k, shape, fan_in):
        bound = 1.0 / jnp.sqrt(fan_in)
        return jax.random.uniform(k, shape, jnp.float32, -bound, bound)

    return {
        "conv1_w": uniform(ks[0], (6, 1, 5, 5), 1 * 5 * 5),
        "conv1_b": uniform(ks[1], (6,), 1 * 5 * 5),
        "conv2_w": uniform(ks[2], (16, 6, 5, 5), 6 * 5 * 5),
        "conv2_b": uniform(ks[3], (16,), 6 * 5 * 5),
        "fc1_w": uniform(ks[4], (120, 400), 400),
        "fc1_b": uniform(ks[5], (120,), 400),
        "fc2_w": uniform(ks[6], (84, 120), 120),
        "fc2_b": uniform(ks[7], (84,), 120),
        "fc3_w": uniform(ks[8], (10, 84), 84),
        "fc3_b": uniform(ks[9], (10,), 84),
    }


if __name__ == "__main__":
    key = jax.random.PRNGKey(0)
    k_param, k_x = jax.random.split(key)
    params = init_params(k_param)
    prep = prepare_params(params)

    # LeNet5's fc1 (16*5*5 inputs) implies 28x28 input; batch=4, 1 channel.
    x = jax.random.normal(k_x, (4, 1, 28, 28), dtype=jnp.float32)

    out = lenet5_forward(x, prep)
    out = jax.block_until_ready(out)
    assert out.shape == (4, 10), out.shape
    print("KERNEL_OK")
</pallas_src>

<mosaic_0001>
module attributes {stable_mosaic.version = 11 : i64} {
  func.func @_lenet5_kernel(%arg0: i32, %arg1: memref<2x32x32xf32, #tpu.memory_space<vmem>>, %arg2: memref<5x32x168xf32, #tpu.memory_space<vmem>>, %arg3: memref<1x168xf32, #tpu.memory_space<vmem>>, %arg4: memref<168x84xf32, #tpu.memory_space<vmem>>, %arg5: memref<168x84xf32, #tpu.memory_space<vmem>>, %arg6: memref<14x28xf32, #tpu.memory_space<vmem>>, %arg7: memref<14x28xf32, #tpu.memory_space<vmem>>, %arg8: memref<5x84x160xf32, #tpu.memory_space<vmem>>, %arg9: memref<1x160xf32, #tpu.memory_space<vmem>>, %arg10: memref<160x80xf32, #tpu.memory_space<vmem>>, %arg11: memref<160x80xf32, #tpu.memory_space<vmem>>, %arg12: memref<5x10xf32, #tpu.memory_space<vmem>>, %arg13: memref<5x10xf32, #tpu.memory_space<vmem>>, %arg14: memref<5x80x128xf32, #tpu.memory_space<vmem>>, %arg15: memref<1x128xf32, #tpu.memory_space<vmem>>, %arg16: memref<128x128xf32, #tpu.memory_space<vmem>>, %arg17: memref<1x128xf32, #tpu.memory_space<vmem>>, %arg18: memref<128x128xf32, #tpu.memory_space<vmem>>, %arg19: memref<1x128xf32, #tpu.memory_space<vmem>>, %arg20: memref<1x2x128xf32, #tpu.memory_space<vmem>>) attributes {dimension_semantics = [#tpu.dimension_semantics<parallel>], iteration_bounds = array<i64: 2>, scalar_prefetch = 0 : i64, scratch_operands = 0 : i64, tpu.core_type = #tpu.core_type<tc>, window_params = [{transform_indices = @transform_0, window_bounds = array<i64: 2, 32, 32>}, {pipeline_mode = #tpu.pipeline_mode<synchronous>, transform_indices = @transform_1, window_bounds = array<i64: 5, 32, 168>}, {pipeline_mode = #tpu.pipeline_mode<synchronous>, transform_indices = @transform_2, window_bounds = array<i64: 1, 168>}, {pipeline_mode = #tpu.pipeline_mode<synchronous>, transform_indices = @transform_3, window_bounds = array<i64: 168, 84>}, {pipeline_mode = #tpu.pipeline_mode<synchronous>, transform_indices = @transform_4, window_bounds = array<i64: 168, 84>}, {pipeline_mode = #tpu.pipeline_mode<synchronous>, transform_indices = @transform_5, window_bounds = array<i64: 14, 28>}, {pipeline_mode = #tpu.pipeline_mode<synchronous>, transform_indices = @transform_6, window_bounds = array<i64: 14, 28>}, {pipeline_mode = #tpu.pipeline_mode<synchronous>, transform_indices = @transform_7, window_bounds = array<i64: 5, 84, 160>}, {pipeline_mode = #tpu.pipeline_mode<synchronous>, transform_indices = @transform_8, window_bounds = array<i64: 1, 160>}, {pipeline_mode = #tpu.pipeline_mode<synchronous>, transform_indices = @transform_9, window_bounds = array<i64: 160, 80>}, {pipeline_mode = #tpu.pipeline_mode<synchronous>, transform_indices = @transform_10, window_bounds = array<i64: 160, 80>}, {pipeline_mode = #tpu.pipeline_mode<synchronous>, transform_indices = @transform_11, window_bounds = array<i64: 5, 10>}, {pipeline_mode = #tpu.pipeline_mode<synchronous>, transform_indices = @transform_12, window_bounds = array<i64: 5, 10>}, {pipeline_mode = #tpu.pipeline_mode<synchronous>, transform_indices = @transform_13, window_bounds = array<i64: 5, 80, 128>}, {pipeline_mode = #tpu.pipeline_mode<synchronous>, transform_indices = @transform_14, window_bounds = array<i64: 1, 128>}, {pipeline_mode = #tpu.pipeline_mode<synchronous>, transform_indices = @transform_15, window_bounds = array<i64: 128, 128>}, {pipeline_mode = #tpu.pipeline_mode<synchronous>, transform_indices = @transform_16, window_bounds = array<i64: 1, 128>}, {pipeline_mode = #tpu.pipeline_mode<synchronous>, transform_indices = @transform_17, window_bounds = array<i64: 128, 128>}, {pipeline_mode = #tpu.pipeline_mode<synchronous>, transform_indices = @transform_18, window_bounds = array<i64: 1, 128>}, {transform_indices = @transform_19, window_bounds = array<i64: 1, 2, 128>}]} {
    %c0 = arith.constant 0 : index
    %c0_0 = arith.constant 0 : index
    %0 = vector.load %arg4[%c0, %c0_0] : memref<168x84xf32, #tpu.memory_space<vmem>>, vector<168x84xf32>
    %c0_1 = arith.constant 0 : index
    %c0_2 = arith.constant 0 : index
    %1 = vector.load %arg5[%c0_1, %c0_2] : memref<168x84xf32, #tpu.memory_space<vmem>>, vector<168x84xf32>
    %c0_3 = arith.constant 0 : index
    %c0_4 = arith.constant 0 : index
    %2 = vector.load %arg6[%c0_3, %c0_4] : memref<14x28xf32, #tpu.memory_space<vmem>>, vector<14x28xf32>
    %c0_5 = arith.constant 0 : index
    %c0_6 = arith.constant 0 : index
    %3 = vector.load %arg7[%c0_5, %c0_6] : memref<14x28xf32, #tpu.memory_space<vmem>>, vector<14x28xf32>
    %c0_7 = arith.constant 0 : index
    %c0_8 = arith.constant 0 : index
    %4 = vector.load %arg10[%c0_7, %c0_8] : memref<160x80xf32, #tpu.memory_space<vmem>>, vector<160x80xf32>
    %c0_9 = arith.constant 0 : index
    %c0_10 = arith.constant 0 : index
    %5 = vector.load %arg11[%c0_9, %c0_10] : memref<160x80xf32, #tpu.memory_space<vmem>>, vector<160x80xf32>
    %c0_11 = arith.constant 0 : index
    %c0_12 = arith.constant 0 : index
    %6 = vector.load %arg12[%c0_11, %c0_12] : memref<5x10xf32, #tpu.memory_space<vmem>>, vector<5x10xf32>
    %c0_13 = arith.constant 0 : index
    %c0_14 = arith.constant 0 : index
    %7 = vector.load %arg13[%c0_13, %c0_14] : memref<5x10xf32, #tpu.memory_space<vmem>>, vector<5x10xf32>
    %c0_15 = arith.constant 0 : index
    %c0_16 = arith.constant 0 : index
    %8 = vector.load %arg3[%c0_15, %c0_16] : memref<1x168xf32, #tpu.memory_space<vmem>>, vector<1x168xf32>
    %c0_17 = arith.constant 0 : index
    %c0_18 = arith.constant 0 : index
    %9 = vector.load %arg9[%c0_17, %c0_18] : memref<1x160xf32, #tpu.memory_space<vmem>>, vector<1x160xf32>
    %c0_19 = arith.constant 0 : index
    %c0_20 = arith.constant 0 : index
    %c0_21 = arith.constant 0 : index
    %10 = vector.load %arg1[%c0_19, %c0_20, %c0_21] : memref<2x32x32xf32, #tpu.memory_space<vmem>>, vector<1x32x32xf32>
    %11 = vector.shape_cast %10 : vector<1x32x32xf32> to vector<32x32xf32>
    %12 = vector.extract_strided_slice %11 {offsets = [0, 0], sizes = [28, 32], strides = [1, 1]} : vector<32x32xf32> to vector<28x32xf32>
    %c0_22 = arith.constant 0 : index
    %c0_23 = arith.constant 0 : index
    %c0_24 = arith.constant 0 : index
    %13 = vector.load %arg2[%c0_22, %c0_23, %c0_24] : memref<5x32x168xf32, #tpu.memory_space<vmem>>, vector<1x32x168xf32>
    %14 = vector.shape_cast %13 : vector<1x32x168xf32> to vector<32x168xf32>
    %cst = arith.constant dense<0.000000e+00> : vector<28x168xf32>
    %15 = tpu.matmul %12, %14, %cst {dimension_numbers = #tpu.dot_dimension_numbers<[1], [0], [0], [1], [0, 0, 1, 1], [], []>} : vector<28x32xf32>, vector<32x168xf32>, vector<28x168xf32> -> vector<28x168xf32>
    %16 = vector.extract_strided_slice %11 {offsets = [1, 0], sizes = [28, 32], strides = [1, 1]} : vector<32x32xf32> to vector<28x32xf32>
    %c1 = arith.constant 1 : index
    %c0_25 = arith.constant 0 : index
    %c0_26 = arith.constant 0 : index
    %17 = vector.load %arg2[%c1, %c0_25, %c0_26] : memref<5x32x168xf32, #tpu.memory_space<vmem>>, vector<1x32x168xf32>
    %18 = vector.shape_cast %17 : vector<1x32x168xf32> to vector<32x168xf32>
    %cst_27 = arith.constant dense<0.000000e+00> : vector<28x168xf32>
    %19 = tpu.matmul %16, %18, %cst_27 {dimension_numbers = #tpu.dot_dimension_numbers<[1], [0], [0], [1], [0, 0, 1, 1], [], []>} : vector<28x32xf32>, vector<32x168xf32>, vector<28x168xf32> -> vector<28x168xf32>
    %20 = arith.addf %15, %19 : vector<28x168xf32>
    %21 = vector.extract_strided_slice %11 {offsets = [2, 0], sizes = [28, 32], strides = [1, 1]} : vector<32x32xf32> to vector<28x32xf32>
    %c2 = arith.constant 2 : index
    %c0_28 = arith.constant 0 : index
    %c0_29 = arith.constant 0 : index
    %22 = vector.load %arg2[%c2, %c0_28, %c0_29] : memref<5x32x168xf32, #tpu.memory_space<vmem>>, vector<1x32x168xf32>
    %23 = vector.shape_cast %22 : vector<1x32x168xf32> to vector<32x168xf32>
    %cst_30 = arith.constant dense<0.000000e+00> : vector<28x168xf32>
    %24 = tpu.matmul %21, %23, %cst_30 {dimension_numbers = #tpu.dot_dimension_numbers<[1], [0], [0], [1], [0, 0, 1, 1], [], []>} : vector<28x32xf32>, vector<32x168xf32>, vector<28x168xf32> -> vector<28x168xf32>
    %25 = arith.addf %20, %24 : vector<28x168xf32>
    %26 = vector.extract_strided_slice %11 {offsets = [3, 0], sizes = [28, 32], strides = [1, 1]} : vector<32x32xf32> to vector<28x32xf32>
    %c3 = arith.constant 3 : index
    %c0_31 = arith.constant 0 : index
    %c0_32 = arith.constant 0 : index
    %27 = vector.load %arg2[%c3, %c0_31, %c0_32] : memref<5x32x168xf32, #tpu.memory_space<vmem>>, vector<1x32x168xf32>
    %28 = vector.shape_cast %27 : vector<1x32x168xf32> to vector<32x168xf32>
    %cst_33 = arith.constant dense<0.000000e+00> : vector<28x168xf32>
    %29 = tpu.matmul %26, %28, %cst_33 {dimension_numbers = #tpu.dot_dimension_numbers<[1], [0], [0], [1], [0, 0, 1, 1], [], []>} : vector<28x32xf32>, vector<32x168xf32>, vector<28x168xf32> -> vector<28x168xf32>
    %30 = arith.addf %25, %29 : vector<28x168xf32>
    %31 = vector.extract_strided_slice %11 {offsets = [4, 0], sizes = [28, 32], strides = [1, 1]} : vector<32x32xf32> to vector<28x32xf32>
    %c4 = arith.constant 4 : index
    %c0_34 = arith.constant 0 : index
    %c0_35 = arith.constant 0 : index
    %32 = vector.load %arg2[%c4, %c0_34, %c0_35] : memref<5x32x168xf32, #tpu.memory_space<vmem>>, vector<1x32x168xf32>
    %33 = vector.shape_cast %32 : vector<1x32x168xf32> to vector<32x168xf32>
    %cst_36 = arith.constant dense<0.000000e+00> : vector<28x168xf32>
    %34 = tpu.matmul %31, %33, %cst_36 {dimension_numbers = #tpu.dot_dimension_numbers<[1], [0], [0], [1], [0, 0, 1, 1], [], []>} : vector<28x32xf32>, vector<32x168xf32>, vector<28x168xf32> -> vector<28x168xf32>
    %35 = arith.addf %30, %34 : vector<28x168xf32>
    %36 = vector.broadcast %8 : vector<1x168xf32> to vector<28x168xf32>
    %37 = arith.addf %35, %36 : vector<28x168xf32>
    %cst_37 = arith.constant 0.000000e+00 : f32
    %38 = vector.broadcast %cst_37 : f32 to vector<28x168xf32>
    %39 = arith.maximumf %37, %38 : vector<28x168xf32>
    %cst_38 = arith.constant dense<0.000000e+00> : vector<28x84xf32>
    %40 = tpu.matmul %39, %0, %cst_38 {dimension_numbers = #tpu.dot_dimension_numbers<[1], [0], [0], [1], [0, 0, 1, 1], [], []>} : vector<28x168xf32>, vector<168x84xf32>, vector<28x84xf32> -> vector<28x84xf32>
    %cst_39 = arith.constant dense<0.000000e+00> : vector<28x84xf32>
    %41 = tpu.matmul %39, %1, %cst_39 {dimension_numbers = #tpu.dot_dimension_numbers<[1], [0], [0], [1], [0, 0, 1, 1], [], []>} : vector<28x168xf32>, vector<168x84xf32>, vector<28x84xf32> -> vector<28x84xf32>
    %42 = arith.maximumf %40, %41 : vector<28x84xf32>
    %cst_40 = arith.constant dense<0.000000e+00> : vector<14x84xf32>
    %43 = tpu.matmul %2, %42, %cst_40 {dimension_numbers = #tpu.dot_dimension_numbers<[1], [0], [0], [1], [0, 0, 1, 1], [], []>} : vector<14x28xf32>, vector<28x84xf32>, vector<14x84xf32> -> vector<14x84xf32>
    %cst_41 = arith.constant dense<0.000000e+00> : vector<14x84xf32>
    %44 = tpu.matmul %3, %42, %cst_41 {dimension_numbers = #tpu.dot_dimension_numbers<[1], [0], [0], [1], [0, 0, 1, 1], [], []>} : vector<14x28xf32>, vector<28x84xf32>, vector<14x84xf32> -> vector<14x84xf32>
    %45 = arith.maximumf %43, %44 : vector<14x84xf32>
    %46 = vector.extract_strided_slice %45 {offsets = [0, 0], sizes = [10, 84], strides = [1, 1]} : vector<14x84xf32> to vector<10x84xf32>
    %c0_42 = arith.constant 0 : index
    %c0_43 = arith.constant 0 : index
    %c0_44 = arith.constant 0 : index
    %47 = vector.load %arg8[%c0_42, %c0_43, %c0_44] : memref<5x84x160xf32, #tpu.memory_space<vmem>>, vector<1x84x160xf32>
    %48 = vector.shape_cast %47 : vector<1x84x160xf32> to vector<84x160xf32>
    %cst_45 = arith.constant dense<0.000000e+00> : vector<10x160xf32>
    %49 = tpu.matmul %46, %48, %cst_45 {dimension_numbers = #tpu.dot_dimension_numbers<[1], [0], [0], [1], [0, 0, 1, 1], [], []>} : vector<10x84xf32>, vector<84x160xf32>, vector<10x160xf32> -> vector<10x160xf32>
    %50 = vector.extract_strided_slice %45 {offsets = [1, 0], sizes = [10, 84], strides = [1, 1]} : vector<14x84xf32> to vector<10x84xf32>
    %c1_46 = arith.constant 1 : index
    %c0_47 = arith.constant 0 : index
    %c0_48 = arith.constant 0 : index
    %51 = vector.load %arg8[%c1_46, %c0_47, %c0_48] : memref<5x84x160xf32, #tpu.memory_space<vmem>>, vector<1x84x160xf32>
    %52 = vector.shape_cast %51 : vector<1x84x160xf32> to vector<84x160xf32>
    %cst_49 = arith.constant dense<0.000000e+00> : vector<10x160xf32>
    %53 = tpu.matmul %50, %52, %cst_49 {dimension_numbers = #tpu.dot_dimension_numbers<[1], [0], [0], [1], [0, 0, 1, 1], [], []>} : vector<10x84xf32>, vector<84x160xf32>, vector<10x160xf32> -> vector<10x160xf32>
    %54 = arith.addf %49, %53 : vector<10x160xf32>
    %55 = vector.extract_strided_slice %45 {offsets = [2, 0], sizes = [10, 84], strides = [1, 1]} : vector<14x84xf32> to vector<10x84xf32>
    %c2_50 = arith.constant 2 : index
    %c0_51 = arith.constant 0 : index
    %c0_52 = arith.constant 0 : index
    %56 = vector.load %arg8[%c2_50, %c0_51, %c0_52] : memref<5x84x160xf32, #tpu.memory_space<vmem>>, vector<1x84x160xf32>
    %57 = vector.shape_cast %56 : vector<1x84x160xf32> to vector<84x160xf32>
    %cst_53 = arith.constant dense<0.000000e+00> : vector<10x160xf32>
    %58 = tpu.matmul %55, %57, %cst_53 {dimension_numbers = #tpu.dot_dimension_numbers<[1], [0], [0], [1], [0, 0, 1, 1], [], []>} : vector<10x84xf32>, vector<84x160xf32>, vector<10x160xf32> -> vector<10x160xf32>
    %59 = arith.addf %54, %58 : vector<10x160xf32>
    %60 = vector.extract_strided_slice %45 {offsets = [3, 0], sizes = [10, 84], strides = [1, 1]} : vector<14x84xf32> to vector<10x84xf32>
    %c3_54 = arith.constant 3 : index
    %c0_55 = arith.constant 0 : index
    %c0_56 = arith.constant 0 : index
    %61 = vector.load %arg8[%c3_54, %c0_55, %c0_56] : memref<5x84x160xf32, #tpu.memory_space<vmem>>, vector<1x84x160xf32>
    %62 = vector.shape_cast %61 : vector<1x84x160xf32> to vector<84x160xf32>
    %cst_57 = arith.constant dense<0.000000e+00> : vector<10x160xf32>
    %63 = tpu.matmul %60, %62, %cst_57 {dimension_numbers = #tpu.dot_dimension_numbers<[1], [0], [0], [1], [0, 0, 1, 1], [], []>} : vector<10x84xf32>, vector<84x160xf32>, vector<10x160xf32> -> vector<10x160xf32>
    %64 = arith.addf %59, %63 : vector<10x160xf32>
    %65 = vector.extract_strided_slice %45 {offsets = [4, 0], sizes = [10, 84], strides = [1, 1]} : vector<14x84xf32> to vector<10x84xf32>
    %c4_58 = arith.constant 4 : index
    %c0_59 = arith.constant 0 : index
    %c0_60 = arith.constant 0 : index
    %66 = vector.load %arg8[%c4_58, %c0_59, %c0_60] : memref<5x84x160xf32, #tpu.memory_space<vmem>>, vector<1x84x160xf32>
    %67 = vector.shape_cast %66 : vector<1x84x160xf32> to vector<84x160xf32>
    %cst_61 = arith.constant dense<0.000000e+00> : vector<10x160xf32>
    %68 = tpu.matmul %65, %67, %cst_61 {dimension_numbers = #tpu.dot_dimension_numbers<[1], [0], [0], [1], [0, 0, 1, 1], [], []>} : vector<10x84xf32>, vector<84x160xf32>, vector<10x160xf32> -> vector<10x160xf32>
    %69 = arith.addf %64, %68 : vector<10x160xf32>
    %70 = vector.broadcast %9 : vector<1x160xf32> to vector<10x160xf32>
    %71 = arith.addf %69, %70 : vector<10x160xf32>
    %cst_62 = arith.constant 0.000000e+00 : f32
    %72 = vector.broadcast %cst_62 : f32 to vector<10x160xf32>
    %73 = arith.maximumf %71, %72 : vector<10x160xf32>
    %cst_63 = arith.constant dense<0.000000e+00> : vector<10x80xf32>
    %74 = tpu.matmul %73, %4, %cst_63 {dimension_numbers = #tpu.dot_dimension_numbers<[1], [0], [0], [1], [0, 0, 1, 1], [], []>} : vector<10x160xf32>, vector<160x80xf32>, vector<10x80xf32> -> vector<10x80xf32>
    %cst_64 = arith.constant dense<0.000000e+00> : vector<10x80xf32>
    %75 = tpu.matmul %73, %5, %cst_64 {dimension_numbers = #tpu.dot_dimension_numbers<[1], [0], [0], [1], [0, 0, 1, 1], [], []>} : vector<10x160xf32>, vector<160x80xf32>, vector<10x80xf32> -> vector<10x80xf32>
    %76 = arith.maximumf %74, %75 : vector<10x80xf32>
    %cst_65 = arith.constant dense<0.000000e+00> : vector<5x80xf32>
    %77 = tpu.matmul %6, %76, %cst_65 {dimension_numbers = #tpu.dot_dimension_numbers<[1], [0], [0], [1], [0, 0, 1, 1], [], []>} : vector<5x10xf32>, vector<10x80xf32>, vector<5x80xf32> -> vector<5x80xf32>
    %cst_66 = arith.constant dense<0.000000e+00> : vector<5x80xf32>
    %78 = tpu.matmul %7, %76, %cst_66 {dimension_numbers = #tpu.dot_dimension_numbers<[1], [0], [0], [1], [0, 0, 1, 1], [], []>} : vector<5x10xf32>, vector<10x80xf32>, vector<5x80xf32> -> vector<5x80xf32>
    %79 = arith.maximumf %77, %78 : vector<5x80xf32>
    %c1_67 = arith.constant 1 : index
    %c0_68 = arith.constant 0 : index
    %c0_69 = arith.constant 0 : index
    %80 = vector.load %arg1[%c1_67, %c0_68, %c0_69] : memref<2x32x32xf32, #tpu.memory_space<vmem>>, vector<1x32x32xf32>
    %81 = vector.shape_cast %80 : vector<1x32x32xf32> to vector<32x32xf32>
    %82 = vector.extract_strided_slice %81 {offsets = [0, 0], sizes = [28, 32], strides = [1, 1]} : vector<32x32xf32> to vector<28x32xf32>
    %c0_70 = arith.constant 0 : index
    %c0_71 = arith.constant 0 : index
    %c0_72 = arith.constant 0 : index
    %83 = vector.load %arg2[%c0_70, %c0_71, %c0_72] : memref<5x32x168xf32, #tpu.memory_space<vmem>>, vector<1x32x168xf32>
    %84 = vector.shape_cast %83 : vector<1x32x168xf32> to vector<32x168xf32>
    %cst_73 = arith.constant dense<0.000000e+00> : vector<28x168xf32>
    %85 = tpu.matmul %82, %84, %cst_73 {dimension_numbers = #tpu.dot_dimension_numbers<[1], [0], [0], [1], [0, 0, 1, 1], [], []>} : vector<28x32xf32>, vector<32x168xf32>, vector<28x168xf32> -> vector<28x168xf32>
    %86 = vector.extract_strided_slice %81 {offsets = [1, 0], sizes = [28, 32], strides = [1, 1]} : vector<32x32xf32> to vector<28x32xf32>
    %c1_74 = arith.constant 1 : index
    %c0_75 = arith.constant 0 : index
    %c0_76 = arith.constant 0 : index
    %87 = vector.load %arg2[%c1_74, %c0_75, %c0_76] : memref<5x32x168xf32, #tpu.memory_space<vmem>>, vector<1x32x168xf32>
    %88 = vector.shape_cast %87 : vector<1x32x168xf32> to vector<32x168xf32>
    %cst_77 = arith.constant dense<0.000000e+00> : vector<28x168xf32>
    %89 = tpu.matmul %86, %88, %cst_77 {dimension_numbers = #tpu.dot_dimension_numbers<[1], [0], [0], [1], [0, 0, 1, 1], [], []>} : vector<28x32xf32>, vector<32x168xf32>, vector<28x168xf32> -> vector<28x168xf32>
    %90 = arith.addf %85, %89 : vector<28x168xf32>
    %91 = vector.extract_strided_slice %81 {offsets = [2, 0], sizes = [28, 32], strides = [1, 1]} : vector<32x32xf32> to vector<28x32xf32>
    %c2_78 = arith.constant 2 : index
    %c0_79 = arith.constant 0 : index
    %c0_80 = arith.constant 0 : index
    %92 = vector.load %arg2[%c2_78, %c0_79, %c0_80] : memref<5x32x168xf32, #tpu.memory_space<vmem>>, vector<1x32x168xf32>
    %93 = vector.shape_cast %92 : vector<1x32x168xf32> to vector<32x168xf32>
    %cst_81 = arith.constant dense<0.000000e+00> : vector<28x168xf32>
    %94 = tpu.matmul %91, %93, %cst_81 {dimension_numbers = #tpu.dot_dimension_numbers<[1], [0], [0], [1], [0, 0, 1, 1], [], []>} : vector<28x32xf32>, vector<32x168xf32>, vector<28x168xf32> -> vector<28x168xf32>
    %95 = arith.addf %90, %94 : vector<28x168xf32>
    %96 = vector.extract_strided_slice %81 {offsets = [3, 0], sizes = [28, 32], strides = [1, 1]} : vector<32x32xf32> to vector<28x32xf32>
    %c3_82 = arith.constant 3 : index
    %c0_83 = arith.constant 0 : index
    %c0_84 = arith.constant 0 : index
    %97 = vector.load %arg2[%c3_82, %c0_83, %c0_84] : memref<5x32x168xf32, #tpu.memory_space<vmem>>, vector<1x32x168xf32>
    %98 = vector.shape_cast %97 : vector<1x32x168xf32> to vector<32x168xf32>
    %cst_85 = arith.constant dense<0.000000e+00> : vector<28x168xf32>
    %99 = tpu.matmul %96, %98, %cst_85 {dimension_numbers = #tpu.dot_dimension_numbers<[1], [0], [0], [1], [0, 0, 1, 1], [], []>} : vector<28x32xf32>, vector<32x168xf32>, vector<28x168xf32> -> vector<28x168xf32>
    %100 = arith.addf %95, %99 : vector<28x168xf32>
    %101 = vector.extract_strided_slice %81 {offsets = [4, 0], sizes = [28, 32], strides = [1, 1]} : vector<32x32xf32> to vector<28x32xf32>
    %c4_86 = arith.constant 4 : index
    %c0_87 = arith.constant 0 : index
    %c0_88 = arith.constant 0 : index
    %102 = vector.load %arg2[%c4_86, %c0_87, %c0_88] : memref<5x32x168xf32, #tpu.memory_space<vmem>>, vector<1x32x168xf32>
    %103 = vector.shape_cast %102 : vector<1x32x168xf32> to vector<32x168xf32>
    %cst_89 = arith.constant dense<0.000000e+00> : vector<28x168xf32>
    %104 = tpu.matmul %101, %103, %cst_89 {dimension_numbers = #tpu.dot_dimension_numbers<[1], [0], [0], [1], [0, 0, 1, 1], [], []>} : vector<28x32xf32>, vector<32x168xf32>, vector<28x168xf32> -> vector<28x168xf32>
    %105 = arith.addf %100, %104 : vector<28x168xf32>
    %106 = vector.broadcast %8 : vector<1x168xf32> to vector<28x168xf32>
    %107 = arith.addf %105, %106 : vector<28x168xf32>
    %cst_90 = arith.constant 0.000000e+00 : f32
    %108 = vector.broadcast %cst_90 : f32 to vector<28x168xf32>
    %109 = arith.maximumf %107, %108 : vector<28x168xf32>
    %cst_91 = arith.constant dense<0.000000e+00> : vector<28x84xf32>
    %110 = tpu.matmul %109, %0, %cst_91 {dimension_numbers = #tpu.dot_dimension_numbers<[1], [0], [0], [1], [0, 0, 1, 1], [], []>} : vector<28x168xf32>, vector<168x84xf32>, vector<28x84xf32> -> vector<28x84xf32>
    %cst_92 = arith.constant dense<0.000000e+00> : vector<28x84xf32>
    %111 = tpu.matmul %109, %1, %cst_92 {dimension_numbers = #tpu.dot_dimension_numbers<[1], [0], [0], [1], [0, 0, 1, 1], [], []>} : vector<28x168xf32>, vector<168x84xf32>, vector<28x84xf32> -> vector<28x84xf32>
    %112 = arith.maximumf %110, %111 : vector<28x84xf32>
    %cst_93 = arith.constant dense<0.000000e+00> : vector<14x84xf32>
    %113 = tpu.matmul %2, %112, %cst_93 {dimension_numbers = #tpu.dot_dimension_numbers<[1], [0], [0], [1], [0, 0, 1, 1], [], []>} : vector<14x28xf32>, vector<28x84xf32>, vector<14x84xf32> -> vector<14x84xf32>
    %cst_94 = arith.constant dense<0.000000e+00> : vector<14x84xf32>
    %114 = tpu.matmul %3, %112, %cst_94 {dimension_numbers = #tpu.dot_dimension_numbers<[1], [0], [0], [1], [0, 0, 1, 1], [], []>} : vector<14x28xf32>, vector<28x84xf32>, vector<14x84xf32> -> vector<14x84xf32>
    %115 = arith.maximumf %113, %114 : vector<14x84xf32>
    %116 = vector.extract_strided_slice %115 {offsets = [0, 0], sizes = [10, 84], strides = [1, 1]} : vector<14x84xf32> to vector<10x84xf32>
    %c0_95 = arith.constant 0 : index
    %c0_96 = arith.constant 0 : index
    %c0_97 = arith.constant 0 : index
    %117 = vector.load %arg8[%c0_95, %c0_96, %c0_97] : memref<5x84x160xf32, #tpu.memory_space<vmem>>, vector<1x84x160xf32>
    %118 = vector.shape_cast %117 : vector<1x84x160xf32> to vector<84x160xf32>
    %cst_98 = arith.constant dense<0.000000e+00> : vector<10x160xf32>
    %119 = tpu.matmul %116, %118, %cst_98 {dimension_numbers = #tpu.dot_dimension_numbers<[1], [0], [0], [1], [0, 0, 1, 1], [], []>} : vector<10x84xf32>, vector<84x160xf32>, vector<10x160xf32> -> vector<10x160xf32>
    %120 = vector.extract_strided_slice %115 {offsets = [1, 0], sizes = [10, 84], strides = [1, 1]} : vector<14x84xf32> to vector<10x84xf32>
    %c1_99 = arith.constant 1 : index
    %c0_100 = arith.constant 0 : index
    %c0_101 = arith.constant 0 : index
    %121 = vector.load %arg8[%c1_99, %c0_100, %c0_101] : memref<5x84x160xf32, #tpu.memory_space<vmem>>, vector<1x84x160xf32>
    %122 = vector.shape_cast %121 : vector<1x84x160xf32> to vector<84x160xf32>
    %cst_102 = arith.constant dense<0.000000e+00> : vector<10x160xf32>
    %123 = tpu.matmul %120, %122, %cst_102 {dimension_numbers = #tpu.dot_dimension_numbers<[1], [0], [0], [1], [0, 0, 1, 1], [], []>} : vector<10x84xf32>, vector<84x160xf32>, vector<10x160xf32> -> vector<10x160xf32>
    %124 = arith.addf %119, %123 : vector<10x160xf32>
    %125 = vector.extract_strided_slice %115 {offsets = [2, 0], sizes = [10, 84], strides = [1, 1]} : vector<14x84xf32> to vector<10x84xf32>
    %c2_103 = arith.constant 2 : index
    %c0_104 = arith.constant 0 : index
    %c0_105 = arith.constant 0 : index
    %126 = vector.load %arg8[%c2_103, %c0_104, %c0_105] : memref<5x84x160xf32, #tpu.memory_space<vmem>>, vector<1x84x160xf32>
    %127 = vector.shape_cast %126 : vector<1x84x160xf32> to vector<84x160xf32>
    %cst_106 = arith.constant dense<0.000000e+00> : vector<10x160xf32>
    %128 = tpu.matmul %125, %127, %cst_106 {dimension_numbers = #tpu.dot_dimension_numbers<[1], [0], [0], [1], [0, 0, 1, 1], [], []>} : vector<10x84xf32>, vector<84x160xf32>, vector<10x160xf32> -> vector<10x160xf32>
    %129 = arith.addf %124, %128 : vector<10x160xf32>
    %130 = vector.extract_strided_slice %115 {offsets = [3, 0], sizes = [10, 84], strides = [1, 1]} : vector<14x84xf32> to vector<10x84xf32>
    %c3_107 = arith.constant 3 : index
    %c0_108 = arith.constant 0 : index
    %c0_109 = arith.constant 0 : index
    %131 = vector.load %arg8[%c3_107, %c0_108, %c0_109] : memref<5x84x160xf32, #tpu.memory_space<vmem>>, vector<1x84x160xf32>
    %132 = vector.shape_cast %131 : vector<1x84x160xf32> to vector<84x160xf32>
    %cst_110 = arith.constant dense<0.000000e+00> : vector<10x160xf32>
    %133 = tpu.matmul %130, %132, %cst_110 {dimension_numbers = #tpu.dot_dimension_numbers<[1], [0], [0], [1], [0, 0, 1, 1], [], []>} : vector<10x84xf32>, vector<84x160xf32>, vector<10x160xf32> -> vector<10x160xf32>
    %134 = arith.addf %129, %133 : vector<10x160xf32>
    %135 = vector.extract_strided_slice %115 {offsets = [4, 0], sizes = [10, 84], strides = [1, 1]} : vector<14x84xf32> to vector<10x84xf32>
    %c4_111 = arith.constant 4 : index
    %c0_112 = arith.constant 0 : index
    %c0_113 = arith.constant 0 : index
    %136 = vector.load %arg8[%c4_111, %c0_112, %c0_113] : memref<5x84x160xf32, #tpu.memory_space<vmem>>, vector<1x84x160xf32>
    %137 = vector.shape_cast %136 : vector<1x84x160xf32> to vector<84x160xf32>
    %cst_114 = arith.constant dense<0.000000e+00> : vector<10x160xf32>
    %138 = tpu.matmul %135, %137, %cst_114 {dimension_numbers = #tpu.dot_dimension_numbers<[1], [0], [0], [1], [0, 0, 1, 1], [], []>} : vector<10x84xf32>, vector<84x160xf32>, vector<10x160xf32> -> vector<10x160xf32>
    %139 = arith.addf %134, %138 : vector<10x160xf32>
    %140 = vector.broadcast %9 : vector<1x160xf32> to vector<10x160xf32>
    %141 = arith.addf %139, %140 : vector<10x160xf32>
    %cst_115 = arith.constant 0.000000e+00 : f32
    %142 = vector.broadcast %cst_115 : f32 to vector<10x160xf32>
    %143 = arith.maximumf %141, %142 : vector<10x160xf32>
    %cst_116 = arith.constant dense<0.000000e+00> : vector<10x80xf32>
    %144 = tpu.matmul %143, %4, %cst_116 {dimension_numbers = #tpu.dot_dimension_numbers<[1], [0], [0], [1], [0, 0, 1, 1], [], []>} : vector<10x160xf32>, vector<160x80xf32>, vector<10x80xf32> -> vector<10x80xf32>
    %cst_117 = arith.constant dense<0.000000e+00> : vector<10x80xf32>
    %145 = tpu.matmul %143, %5, %cst_117 {dimension_numbers = #tpu.dot_dimension_numbers<[1], [0], [0], [1], [0, 0, 1, 1], [], []>} : vector<10x160xf32>, vector<160x80xf32>, vector<10x80xf32> -> vector<10x80xf32>
    %146 = arith.maximumf %144, %145 : vector<10x80xf32>
    %cst_118 = arith.constant dense<0.000000e+00> : vector<5x80xf32>
    %147 = tpu.matmul %6, %146, %cst_118 {dimension_numbers = #tpu.dot_dimension_numbers<[1], [0], [0], [1], [0, 0, 1, 1], [], []>} : vector<5x10xf32>, vector<10x80xf32>, vector<5x80xf32> -> vector<5x80xf32>
    %cst_119 = arith.constant dense<0.000000e+00> : vector<5x80xf32>
    %148 = tpu.matmul %7, %146, %cst_119 {dimension_numbers = #tpu.dot_dimension_numbers<[1], [0], [0], [1], [0, 0, 1, 1], [], []>} : vector<5x10xf32>, vector<10x80xf32>, vector<5x80xf32> -> vector<5x80xf32>
    %149 = arith.maximumf %147, %148 : vector<5x80xf32>
    %c0_120 = arith.constant 0 : index
    %c0_121 = arith.constant 0 : index
    %150 = vector.load %arg15[%c0_120, %c0_121] : memref<1x128xf32, #tpu.memory_space<vmem>>, vector<1x128xf32>
    %151 = vector.extract_strided_slice %79 {offsets = [0, 0], sizes = [1, 80], strides = [1, 1]} : vector<5x80xf32> to vector<1x80xf32>
    %152 = vector.extract_strided_slice %149 {offsets = [0, 0], sizes = [1, 80], strides = [1, 1]} : vector<5x80xf32> to vector<1x80xf32>
    %153 = tpu.concatenate %151, %152 in 0 : vector<1x80xf32>, vector<1x80xf32> -> vector<2x80xf32>
    %c0_122 = arith.constant 0 : index
    %c0_123 = arith.constant 0 : index
    %c0_124 = arith.constant 0 : index
    %154 = vector.load %arg14[%c0_122, %c0_123, %c0_124] : memref<5x80x128xf32, #tpu.memory_space<vmem>>, vector<1x80x128xf32>
    %155 = vector.shape_cast %154 : vector<1x80x128xf32> to vector<80x128xf32>
    %cst_125 = arith.constant dense<0.000000e+00> : vector<2x128xf32>
    %156 = tpu.matmul %153, %155, %cst_125 {dimension_numbers = #tpu.dot_dimension_numbers<[1], [0], [0], [1], [0, 0, 1, 1], [], []>} : vector<2x80xf32>, vector<80x128xf32>, vector<2x128xf32> -> vector<2x128xf32>
    %157 = vector.broadcast %150 : vector<1x128xf32> to vector<2x128xf32>
    %158 = arith.addf %157, %156 : vector<2x128xf32>
    %159 = vector.extract_strided_slice %79 {offsets = [1, 0], sizes = [1, 80], strides = [1, 1]} : vector<5x80xf32> to vector<1x80xf32>
    %160 = vector.extract_strided_slice %149 {offsets = [1, 0], sizes = [1, 80], strides = [1, 1]} : vector<5x80xf32> to vector<1x80xf32>
    %161 = tpu.concatenate %159, %160 in 0 : vector<1x80xf32>, vector<1x80xf32> -> vector<2x80xf32>
    %c1_126 = arith.constant 1 : index
    %c0_127 = arith.constant 0 : index
    %c0_128 = arith.constant 0 : index
    %162 = vector.load %arg14[%c1_126, %c0_127, %c0_128] : memref<5x80x128xf32, #tpu.memory_space<vmem>>, vector<1x80x128xf32>
    %163 = vector.shape_cast %162 : vector<1x80x128xf32> to vector<80x128xf32>
    %cst_129 = arith.constant dense<0.000000e+00> : vector<2x128xf32>
    %164 = tpu.matmul %161, %163, %cst_129 {dimension_numbers = #tpu.dot_dimension_numbers<[1], [0], [0], [1], [0, 0, 1, 1], [], []>} : vector<2x80xf32>, vector<80x128xf32>, vector<2x128xf32> -> vector<2x128xf32>
    %165 = arith.addf %158, %164 : vector<2x128xf32>
    %166 = vector.extract_strided_slice %79 {offsets = [2, 0], sizes = [1, 80], strides = [1, 1]} : vector<5x80xf32> to vector<1x80xf32>
    %167 = vector.extract_strided_slice %149 {offsets = [2, 0], sizes = [1, 80], strides = [1, 1]} : vector<5x80xf32> to vector<1x80xf32>
    %168 = tpu.concatenate %166, %167 in 0 : vector<1x80xf32>, vector<1x80xf32> -> vector<2x80xf32>
    %c2_130 = arith.constant 2 : index
    %c0_131 = arith.constant 0 : index
    %c0_132 = arith.constant 0 : index
    %169 = vector.load %arg14[%c2_130, %c0_131, %c0_132] : memref<5x80x128xf32, #tpu.memory_space<vmem>>, vector<1x80x128xf32>
    %170 = vector.shape_cast %169 : vector<1x80x128xf32> to vector<80x128xf32>
    %cst_133 = arith.constant dense<0.000000e+00> : vector<2x128xf32>
    %171 = tpu.matmul %168, %170, %cst_133 {dimension_numbers = #tpu.dot_dimension_numbers<[1], [0], [0], [1], [0, 0, 1, 1], [], []>} : vector<2x80xf32>, vector<80x128xf32>, vector<2x128xf32> -> vector<2x128xf32>
    %172 = arith.addf %165, %171 : vector<2x128xf32>
    %173 = vector.extract_strided_slice %79 {offsets = [3, 0], sizes = [1, 80], strides = [1, 1]} : vector<5x80xf32> to vector<1x80xf32>
    %174 = vector.extract_strided_slice %149 {offsets = [3, 0], sizes = [1, 80], strides = [1, 1]} : vector<5x80xf32> to vector<1x80xf32>
    %175 = tpu.concatenate %173, %174 in 0 : vector<1x80xf32>, vector<1x80xf32> -> vector<2x80xf32>
    %c3_134 = arith.constant 3 : index
    %c0_135 = arith.constant 0 : index
    %c0_136 = arith.constant 0 : index
    %176 = vector.load %arg14[%c3_134, %c0_135, %c0_136] : memref<5x80x128xf32, #tpu.memory_space<vmem>>, vector<1x80x128xf32>
    %177 = vector.shape_cast %176 : vector<1x80x128xf32> to vector<80x128xf32>
    %cst_137 = arith.constant dense<0.000000e+00> : vector<2x128xf32>
    %178 = tpu.matmul %175, %177, %cst_137 {dimension_numbers = #tpu.dot_dimension_numbers<[1], [0], [0], [1], [0, 0, 1, 1], [], []>} : vector<2x80xf32>, vector<80x128xf32>, vector<2x128xf32> -> vector<2x128xf32>
    %179 = arith.addf %172, %178 : vector<2x128xf32>
    %180 = vector.extract_strided_slice %79 {offsets = [4, 0], sizes = [1, 80], strides = [1, 1]} : vector<5x80xf32> to vector<1x80xf32>
    %181 = vector.extract_strided_slice %149 {offsets = [4, 0], sizes = [1, 80], strides = [1, 1]} : vector<5x80xf32> to vector<1x80xf32>
    %182 = tpu.concatenate %180, %181 in 0 : vector<1x80xf32>, vector<1x80xf32> -> vector<2x80xf32>
    %c4_138 = arith.constant 4 : index
    %c0_139 = arith.constant 0 : index
    %c0_140 = arith.constant 0 : index
    %183 = vector.load %arg14[%c4_138, %c0_139, %c0_140] : memref<5x80x128xf32, #tpu.memory_space<vmem>>, vector<1x80x128xf32>
    %184 = vector.shape_cast %183 : vector<1x80x128xf32> to vector<80x128xf32>
    %cst_141 = arith.constant dense<0.000000e+00> : vector<2x128xf32>
    %185 = tpu.matmul %182, %184, %cst_141 {dimension_numbers = #tpu.dot_dimension_numbers<[1], [0], [0], [1], [0, 0, 1, 1], [], []>} : vector<2x80xf32>, vector<80x128xf32>, vector<2x128xf32> -> vector<2x128xf32>
    %186 = arith.addf %179, %185 : vector<2x128xf32>
    %cst_142 = arith.constant 0.000000e+00 : f32
    %187 = vector.broadcast %cst_142 : f32 to vector<2x128xf32>
    %188 = arith.maximumf %186, %187 : vector<2x128xf32>
    %c0_143 = arith.constant 0 : index
    %c0_144 = arith.constant 0 : index
    %189 = vector.load %arg16[%c0_143, %c0_144] : memref<128x128xf32, #tpu.memory_space<vmem>>, vector<128x128xf32>
    %cst_145 = arith.constant dense<0.000000e+00> : vector<2x128xf32>
    %190 = tpu.matmul %188, %189, %cst_145 {dimension_numbers = #tpu.dot_dimension_numbers<[1], [0], [0], [1], [0, 0, 1, 1], [], []>} : vector<2x128xf32>, vector<128x128xf32>, vector<2x128xf32> -> vector<2x128xf32>
    %c0_146 = arith.constant 0 : index
    %c0_147 = arith.constant 0 : index
    %191 = vector.load %arg17[%c0_146, %c0_147] : memref<1x128xf32, #tpu.memory_space<vmem>>, vector<1x128xf32>
    %192 = vector.broadcast %191 : vector<1x128xf32> to vector<2x128xf32>
    %193 = arith.addf %190, %192 : vector<2x128xf32>
    %cst_148 = arith.constant 0.000000e+00 : f32
    %194 = vector.broadcast %cst_148 : f32 to vector<2x128xf32>
    %195 = arith.maximumf %193, %194 : vector<2x128xf32>
    %c0_149 = arith.constant 0 : index
    %c0_150 = arith.constant 0 : index
    %196 = vector.load %arg18[%c0_149, %c0_150] : memref<128x128xf32, #tpu.memory_space<vmem>>, vector<128x128xf32>
    %cst_151 = arith.constant dense<0.000000e+00> : vector<2x128xf32>
    %197 = tpu.matmul %195, %196, %cst_151 {dimension_numbers = #tpu.dot_dimension_numbers<[1], [0], [0], [1], [0, 0, 1, 1], [], []>} : vector<2x128xf32>, vector<128x128xf32>, vector<2x128xf32> -> vector<2x128xf32>
    %c0_152 = arith.constant 0 : index
    %c0_153 = arith.constant 0 : index
    %198 = vector.load %arg19[%c0_152, %c0_153] : memref<1x128xf32, #tpu.memory_space<vmem>>, vector<1x128xf32>
    %199 = vector.broadcast %198 : vector<1x128xf32> to vector<2x128xf32>
    %200 = arith.addf %197, %199 : vector<2x128xf32>
    %c0_154 = arith.constant 0 : index
    %c0_155 = arith.constant 0 : index
    %c0_156 = arith.constant 0 : index
    %201 = vector.load %arg20[%c0_154, %c0_155, %c0_156] : memref<1x2x128xf32, #tpu.memory_space<vmem>>, vector<1x2x128xf32>
    %202 = vector.shape_cast %201 : vector<1x2x128xf32> to vector<2x128xf32>
    %203 = vector.shape_cast %200 : vector<2x128xf32> to vector<1x2x128xf32>
    tpu.vector_store %arg20[%c0_154, %c0_155, %c0_156], %203 {strides = array<i32>} : memref<1x2x128xf32, #tpu.memory_space<vmem>>, vector<1x2x128xf32>,
    return
  }
  func.func @transform_0(%arg0: i32) -> (i32, i32, i32) {
    %c0_i32 = arith.constant 0 : i32
    %c0_i32_0 = arith.constant 0 : i32
    %c0_i32_1 = arith.constant 0 : i32
    return %arg0, %c0_i32, %c0_i32_0 : i32, i32, i32
  }
  func.func @transform_1(%arg0: i32) -> (i32, i32, i32) {
    %c0_i32 = arith.constant 0 : i32
    %c0_i32_0 = arith.constant 0 : i32
    %c0_i32_1 = arith.constant 0 : i32
    %c0_i32_2 = arith.constant 0 : i32
    return %c0_i32, %c0_i32_0, %c0_i32_1 : i32, i32, i32
  }
  func.func @transform_2(%arg0: i32) -> (i32, i32) {
    %c0_i32 = arith.constant 0 : i32
    %c0_i32_0 = arith.constant 0 : i32
    %c0_i32_1 = arith.constant 0 : i32
    return %c0_i32, %c0_i32_0 : i32, i32
  }
  func.func @transform_3(%arg0: i32) -> (i32, i32) {
    %c0_i32 = arith.constant 0 : i32
    %c0_i32_0 = arith.constant 0 : i32
    %c0_i32_1 = arith.constant 0 : i32
    return %c0_i32, %c0_i32_0 : i32, i32
  }
  func.func @transform_4(%arg0: i32) -> (i32, i32) {
    %c0_i32 = arith.constant 0 : i32
    %c0_i32_0 = arith.constant 0 : i32
    %c0_i32_1 = arith.constant 0 : i32
    return %c0_i32, %c0_i32_0 : i32, i32
  }
  func.func @transform_5(%arg0: i32) -> (i32, i32) {
    %c0_i32 = arith.constant 0 : i32
    %c0_i32_0 = arith.constant 0 : i32
    %c0_i32_1 = arith.constant 0 : i32
    return %c0_i32, %c0_i32_0 : i32, i32
  }
  func.func @transform_6(%arg0: i32) -> (i32, i32) {
    %c0_i32 = arith.constant 0 : i32
    %c0_i32_0 = arith.constant 0 : i32
    %c0_i32_1 = arith.constant 0 : i32
    return %c0_i32, %c0_i32_0 : i32, i32
  }
  func.func @transform_7(%arg0: i32) -> (i32, i32, i32) {
    %c0_i32 = arith.constant 0 : i32
    %c0_i32_0 = arith.constant 0 : i32
    %c0_i32_1 = arith.constant 0 : i32
    %c0_i32_2 = arith.constant 0 : i32
    return %c0_i32, %c0_i32_0, %c0_i32_1 : i32, i32, i32
  }
  func.func @transform_8(%arg0: i32) -> (i32, i32) {
    %c0_i32 = arith.constant 0 : i32
    %c0_i32_0 = arith.constant 0 : i32
    %c0_i32_1 = arith.constant 0 : i32
    return %c0_i32, %c0_i32_0 : i32, i32
  }
  func.func @transform_9(%arg0: i32) -> (i32, i32) {
    %c0_i32 = arith.constant 0 : i32
    %c0_i32_0 = arith.constant 0 : i32
    %c0_i32_1 = arith.constant 0 : i32
    return %c0_i32, %c0_i32_0 : i32, i32
  }
  func.func @transform_10(%arg0: i32) -> (i32, i32) {
    %c0_i32 = arith.constant 0 : i32
    %c0_i32_0 = arith.constant 0 : i32
    %c0_i32_1 = arith.constant 0 : i32
    return %c0_i32, %c0_i32_0 : i32, i32
  }
  func.func @transform_11(%arg0: i32) -> (i32, i32) {
    %c0_i32 = arith.constant 0 : i32
    %c0_i32_0 = arith.constant 0 : i32
    %c0_i32_1 = arith.constant 0 : i32
    return %c0_i32, %c0_i32_0 : i32, i32
  }
  func.func @transform_12(%arg0: i32) -> (i32, i32) {
    %c0_i32 = arith.constant 0 : i32
    %c0_i32_0 = arith.constant 0 : i32
    %c0_i32_1 = arith.constant 0 : i32
    return %c0_i32, %c0_i32_0 : i32, i32
  }
  func.func @transform_13(%arg0: i32) -> (i32, i32, i32) {
    %c0_i32 = arith.constant 0 : i32
    %c0_i32_0 = arith.constant 0 : i32
    %c0_i32_1 = arith.constant 0 : i32
    %c0_i32_2 = arith.constant 0 : i32
    return %c0_i32, %c0_i32_0, %c0_i32_1 : i32, i32, i32
  }
  func.func @transform_14(%arg0: i32) -> (i32, i32) {
    %c0_i32 = arith.constant 0 : i32
    %c0_i32_0 = arith.constant 0 : i32
    %c0_i32_1 = arith.constant 0 : i32
    return %c0_i32, %c0_i32_0 : i32, i32
  }
  func.func @transform_15(%arg0: i32) -> (i32, i32) {
    %c0_i32 = arith.constant 0 : i32
    %c0_i32_0 = arith.constant 0 : i32
    %c0_i32_1 = arith.constant 0 : i32
    return %c0_i32, %c0_i32_0 : i32, i32
  }
  func.func @transform_16(%arg0: i32) -> (i32, i32) {
    %c0_i32 = arith.constant 0 : i32
    %c0_i32_0 = arith.constant 0 : i32
    %c0_i32_1 = arith.constant 0 : i32
    return %c0_i32, %c0_i32_0 : i32, i32
  }
  func.func @transform_17(%arg0: i32) -> (i32, i32) {
    %c0_i32 = arith.constant 0 : i32
    %c0_i32_0 = arith.constant 0 : i32
    %c0_i32_1 = arith.constant 0 : i32
    return %c0_i32, %c0_i32_0 : i32, i32
  }
  func.func @transform_18(%arg0: i32) -> (i32, i32) {
    %c0_i32 = arith.constant 0 : i32
    %c0_i32_0 = arith.constant 0 : i32
    %c0_i32_1 = arith.constant 0 : i32
    return %c0_i32, %c0_i32_0 : i32, i32
  }
  func.func @transform_19(%arg0: i32) -> (i32, i32, i32) {
    %c0_i32 = arith.constant 0 : i32
    %c0_i32_0 = arith.constant 0 : i32
    %c0_i32_1 = arith.constant 0 : i32
    return %arg0, %c0_i32, %c0_i32_0 : i32, i32, i32
  }
}

</mosaic_0001>

<bundles_post_ra>
// kernel: lenet5_forward.1
= control target key start
LH: loop header
LB: loop body
LE: loop exit
PB: predicated region body
PF: predicated region fallthrough
CT: control target
= control target key end

     0   :  { %s8859_s0 = inlined_call_operand.vmem [shape: f32[4,32,32], index: 0, kind: input, shape index: {}]   ;;  %s8860_s1 = inlined_call_operand.vmem [shape: f32[5,32,168], index: 1, kind: input, shape index: {}]   ;;  %s8861_s2 = inlined_call_operand.vmem [shape: f32[1,168], index: 2, kind: input, shape index: {}]   ;;  %s8862_s3 = inlined_call_operand.vmem [shape: f32[168,84], index: 3, kind: input, shape index: {}]   ;;  %s8863_s4 = inlined_call_operand.vmem [shape: f32[168,84], index: 4, kind: input, shape index: {}]   ;;  %s8864_s5 = inlined_call_operand.vmem [shape: f32[14,28], index: 5, kind: input, shape index: {}]   ;;  %s8865_s6 = inlined_call_operand.vmem [shape: f32[14,28], index: 6, kind: input, shape index: {}]   ;;  %s8866_s7 = inlined_call_operand.vmem [shape: f32[5,84,160], index: 7, kind: input, shape index: {}]   ;;  %s8867_s8 = inlined_call_operand.vmem [shape: f32[1,160], index: 8, kind: input, shape index: {}]   ;;  %s8868_s9 = inlined_call_operand.vmem [shape: f32[160,80], index: 9, kind: input, shape index: {}]   ;;  %s8869_s10 = inlined_call_operand.vmem [shape: f32[160,80], index: 10, kind: input, shape index: {}]   ;;  %s8870_s11 = inlined_call_operand.vmem [shape: f32[5,10], index: 11, kind: input, shape index: {}]   ;;  %s8871_s12 = inlined_call_operand.vmem [shape: f32[5,10], index: 12, kind: input, shape index: {}]   ;;  %s8872_s13 = inlined_call_operand.vmem [shape: f32[5,80,128], index: 13, kind: input, shape index: {}]   ;;  %s8873_s14 = inlined_call_operand.vmem [shape: f32[1,128], index: 14, kind: input, shape index: {}]   ;;  %s8874_s15 = inlined_call_operand.vmem [shape: f32[128,128], index: 15, kind: input, shape index: {}]   ;;  %s8875_s16 = inlined_call_operand.vmem [shape: f32[1,128], index: 16, kind: input, shape index: {}]   ;;  %s8876_s17 = inlined_call_operand.vmem [shape: f32[128,128], index: 17, kind: input, shape index: {}]   ;;  %s8877_s18 = inlined_call_operand.vmem [shape: f32[1,128], index: 18, kind: input, shape index: {}]   ;;  %s8878_s19 = inlined_call_operand.hbm [shape: f32[2,2,128], index: 19, kind: output, shape index: {}]  }
   0x1   :  { %8965 = sst [smem:[#allocation79_spill]] %s8859_s0 }
   0x2   :  { %8966 = sst [smem:[#allocation80_spill]] %s8860_s1 }
   0x3   :  { %8967 = sst [smem:[#allocation81_spill]] %s8861_s2 }
   0x4   :  { %8968 = sst [smem:[#allocation82_spill]] %s8862_s3 }
   0x5   :  { %8969 = sst [smem:[#allocation83_spill]] %s8863_s4 }
   0x6   :  { %8970 = sst [smem:[#allocation84_spill]] %s8877_s18 }
   0x7   :  { %8971 = sst [smem:[#allocation85_spill]] %s8878_s19 }
   0x8   :  { %24 = vsyncpa [#allocation3], 0 }
   0x9   :  { %26 = vsyncpa [#allocation3 + $0x1], 0  ;;  %s6655_s0 = smov 0   ;;  %s6657_s30 = smov 0  }
   0xa   :  { %s6659_s20 = smov 0   ;;  %s6661_s21 = smov 0  }
   0xb LB: > { %8972 = sst [smem:[#allocation5_spill]] %s6536_s0  ;;  %s6676_s1 = sadd.s32 4294967295, %s6548_s21   ;;  %s6548_s21 = sphi %s6661_s21, %s9140_s21   ;;  %s6544_s20 = sphi %s6659_s20, %s9142_s20   ;;  %s6540_s30 = sphi %s6657_s30, %s9144_s30   ;;  %s6536_s0 = sphi %s6655_s0, %s9143_s0  }
   0xc   : > { %8973 = sst [smem:[#allocation6_spill]] %s6544_s20  ;;  %s4939_s22 = sadd.s32 4294967294, %s6548_s21  }
   0xd   : > { %8974 = sst [smem:[#allocation7_spill]] %s6548_s21  ;;  %s6680_s2 = sadd.s32 1, %s6548_s21  }
   0xe   : > { %8975 = sst [smem:[#allocation8_spill]] %s6680_s2  ;;  %s443_s23 = sadd.s32 1, %s6544_s20 }
   0xf   : > { %s440_s24 = ssub.s32 %s6548_s21, %s6680_s2  ;;  %p453_p0 = scmp.ne.s32.totalorder %s6544_s20, %s6540_s30 }
  0x10   : > { %p441_p1 = scmp.eq.s32.totalorder %s440_s24, 0  ;;  %p454_p2 = scmp.eq.s32.totalorder %s6676_s1, 1 }
  0x11   : > { %p459_p3 = scmp.ne.s32.totalorder %s6540_s30, %s6536_s0  ;;  %p460_p4 = scmp.eq.s32.totalorder %s4939_s22, 1 }
  0x12   : > { %s6691_s25 = scalar_select %p441_p1, %s6544_s20, %s443_s23  }
  0x13   : > { %p6693_p5 = por %p454_p2, %p453_p0  ;;  %p6697_p6 = por %p460_p4, %p459_p3 }
  0x14   : > { %8976 = sst [smem:[#allocation9_spill]] %s6691_s25  ;;  %p4942_p7 = scmp.ge.s32.totalorder %s6548_s21, 1 }
  0x15   : > { %s8978_s26 = scalar_select %p6697_p6, 1, 0 }
  0x16   : > { %p542_p8 = scmp.lt.s32.totalorder %s6548_s21, 3 }
  0x17   : > { %8979 = sst [smem:[#allocation10_spill]] %s8978_s26 }
  0x18   : > { %p543_p9 = pnand %p4942_p7, %p542_p8 }
  0x1a   : > { %546 = sbr.rel (%p543_p9) target bundleno = 3711 (0xe7f), region = 96 }
  0x21   : > { %s8980_s29 = sld [smem:[#allocation80_spill]]  ;;  %s4944_s20 = sshll.u32 %s6676_s1, 1  ;;  %v8890_v7 = vmov 0.0   ;;  %vm729_vm0 = vcmask 261120   ;;  %vm721_vm1 = vcmask 1046528   ;;  %v8892_v52 = vmov 0.0|0.0  }
  0x22   : > { %899 = vmatprep.mubr.f32.mxu0 %v8890_v7  ;;  %p600_p10 = scmp.lt.s32.totalorder %s4944_s20, 3  ;;  %802 = vmatprep.mubr.f32.mxu1 %v8890_v7  ;;  %s8981_s22 = sld [smem:[#allocation79_spill]]  ;;  %vm933_vm2 = vcmask 1045504   ;;  %vm1055_vm3 = vcmask 1044480   ;;  %vm1177_vm4 = vcmask 1043456   ;;  %vm1317_vm5 = vcmask 326656  }
  0x23   : > { %s8982_s28 = sld [smem:[#allocation82_spill]]  ;;  %s8983_s21 = sld [smem:[#allocation81_spill]]  ;;  %vm1504_vm6 = vcmask 228352   ;;  %vm6552_vm7 = vmmov 1   ;;  %vm1722_vm9 = vcmask 687104   ;;  %vm6553_vm10 = vmmov 0  }
  0x24   : > { %s9146_s20 = smov (!%p600_p10, %s4944_s20), 3  ;;  %s8984_s4 = sld [smem:[#allocation83_spill]]  ;;  %vm7285_vm8 = vmpackc.low %vm1177_vm4, %vm6552_vm7  ;;  %vm2429_vm11 = vcmask 1041408   ;;  %vm2425_vm13 = vcmask 80896   ;;  %vm4237_vm14 = vcmask 654336   ;;  %vm4225_vm15 = vcmask 1040384  }
  0x25   : > { %s5247_s27 = sshll.u32 %s9146_s20, 5  ;;  %vm8115_vm12 = vmpackc.low %vm2429_vm11, %vm6552_vm7  ;;  %s596_s0 = sand.u32 1, %s6540_s30  }
  0x26   : > { %s5244_s24 = sshll.u32 %s6676_s1, 5  ;;  %s9136_s18 = sld [smem:[#allocation85_spill]] }
  0x27   : > { %v701_v0 = vld [vmem:[%s8980_s29 + $0x8] sm:$0xff]  ;;  %v703_v1 = vld [vmem:[%s8980_s29 + $0x18] sm:$0xff]  ;;  %v700_v2 = vld [vmem:[%s8980_s29] sm:$0xff]  ;;  %s6554_s1 = smov [#allocation2]  }
  0x28   : > { %v6713_v3 = vpack.c.bf16 %v703_v1, %v701_v0  ;;  %v702_v4 = vld [vmem:[%s8980_s29 + $0x10] sm:$0xff]  ;;  %v705_v5 = vld [vmem:[%s8980_s29 + $0x28] sm:$0xff]  ;;  %v707_v6 = vld [vmem:[%s8980_s29 + $0x38] sm:$0xff]  ;;  %s6758_s23 = scalar_lea.vmem %s8981_s22, %s5247_s27  ;;  %s9135_s22 = sld [smem:[#allocation84_spill]] }
  0x29   : > { %v6726_v8 = vpack.c.bf16 %v702_v4, %v700_v2  ;;  %v6728_v9 = vpack.c.bf16 %v707_v6, %v705_v5  ;;  %v704_v10 = vld [vmem:[%s8980_s29 + $0x20] sm:$0xff]  ;;  %v706_v11 = vld [vmem:[%s8980_s29 + $0x30] sm:$0xff]  ;;  %v4964_v12 = vld [vmem:[%s8980_s29 + $0x88] sm:$0xff] }
  0x2a   : > { %5639 = vmatprep.subr.bf16.mxu0 %v6713_v3  ;;  %v4966_v13 = vld [vmem:[%s8980_s29 + $0x98] sm:$0xff]  ;;  %v6744_v14 = vpack.c.bf16 %v706_v11, %v704_v10  ;;  %v4963_v16 = vld [vmem:[%s8980_s29 + $0x80] sm:$0xff]  ;;  %v4965_v17 = vld [vmem:[%s8980_s29 + $0x90] sm:$0xff] }
  0x2b   : > { %5641 = vmatpush1.bf16.msra.mxu0 %v6726_v8  ;;  %v6747_v15 = vpack.c.bf16 %v4966_v13, %v4964_v12  ;;  %v4968_v18 = vld [vmem:[%s8980_s29 + $0xa8] sm:$0xff]  ;;  %v4970_v19 = vld [vmem:[%s8980_s29 + $0xb8] sm:$0xff]  ;;  %v6768_v20 = vld [vmem:[%s6758_s23] sm:$0xff]  ;;  %v6770_v21 = vpack.c.bf16 %v4965_v17, %v4963_v16 }
  0x2c   : > { %5643 = vmatprep.subr.bf16.mxu0 %v6728_v9  ;;  %v6773_v22 = vpack.c.bf16 %v4970_v19, %v4968_v18  ;;  %v4967_v23 = vld [vmem:[%s8980_s29 + $0xa0] sm:$0xff]  ;;  %v4969_v24 = vld [vmem:[%s8980_s29 + $0xb0] sm:$0xff]  ;;  %v4976_v25 = vld [vmem:[%s8980_s29 + $0xc8] sm:$0xff]  ;;  %v722_v42 = vrot.slane %v6768_v20, 1  ;;  %v934_v49 = vrot.slane %v6768_v20, 2  ;;  %s8817_s25 = scalar_lea.hbm %s9136_s18, %s5244_s24 }
  0x2d   : > { %v4978_v26 = vld [vmem:[%s8980_s29 + $0xd8] sm:$0xff]  ;;  %v6790_v27 = vld [vmem:[%s6758_s23 + $0x8] sm:$0xff]  ;;  %v6800_v30 = vpack.c.bf16 %v4969_v24, %v4967_v23  ;;  %v4947_v32 = vld [vmem:[%s8980_s29 + $0x40] sm:$0xff] }
  0x2e   : > { %v4948_v28 = vld [vmem:[%s8980_s29 + $0x48] sm:$0xff]  ;;  %v4950_v29 = vld [vmem:[%s8980_s29 + $0x58] sm:$0xff]  ;;  %v4949_v33 = vld [vmem:[%s8980_s29 + $0x50] sm:$0xff]  ;;  %v6814_v35 = vpack.c.bf16 %v4978_v26, %v4976_v25  ;;  %v723_v43 = vrot.slane %v6790_v27, 1  ;;  %v935_v50 = vrot.slane %v6790_v27, 2 }
  0x2f   : > { %5645 = vmatpush1.bf16.msra.mxu0 %v6744_v14  ;;  %v6802_v31 = vpack.c.bf16 %v4950_v29, %v4948_v28  ;;  %v4952_v34 = vld [vmem:[%s8980_s29 + $0x68] sm:$0xff]  ;;  %v6816_v36 = vpack.c.bf16 %v4949_v33, %v4947_v32  ;;  %v4954_v37 = vld [vmem:[%s8980_s29 + $0x78] sm:$0xff]  ;;  %v4951_v38 = vld [vmem:[%s8980_s29 + $0x60] sm:$0xff]  ;;  %v1056_v33 = vrot.slane %v6768_v20, 3 }
  0x30   : > { %5647 = vmatprep.subr.bf16.mxu0 %v6747_v15  ;;  %v4953_v39 = vld [vmem:[%s8980_s29 + $0x70] sm:$0xff]  ;;  %v6828_v40 = vpack.c.bf16 %v4954_v37, %v4952_v34  ;;  %v606_v45 = vld [vmem:[%s8982_s28] sm:$0xff]  ;;  %v607_v46 = vld [vmem:[%s8982_s28 + $0x8] sm:$0xff]  ;;  %v724_v47 = vsel %vm721_vm1, %v722_v42, %v723_v43  ;;  %v936_v62 = vsel %vm933_vm2, %v934_v49, %v935_v50  ;;  %v1057_v34 = vrot.slane %v6790_v27, 3 }
  0x31   : > { %5631 = vmatprep.subr.bf16.mxu1 %v6802_v31  ;;  %v6833_v41 = vpack.c.bf16 %v4953_v39, %v4951_v38  ;;  %v6839_v44 = vld [vmem:[%s6758_s23 + $0x10] sm:$0xff]  ;;  %v6859_v51 = vld [vmem:[%s6758_s23 + $0x18] sm:$0xff]  ;;  %v6862_v53 = vpack.c.bf16 %v607_v46, %v606_v45  ;;  %v4975_v54 = vld [vmem:[%s8980_s29 + $0xc0] sm:$0xff] }
  0x32   : > { %4959 = vmatmul.mubr.msk.f32.vlgmr.msra.gmra.mrb[0].mxu0 %vm729_vm0, %v6768_v20  ;;  %5633 = vmatpush1.bf16.msra.mxu1 %v6816_v36  ;;  %v725_v48 = vrot.slane %v6839_v44, 1  ;;  %v4977_v55 = vld [vmem:[%s8980_s29 + $0xd0] sm:$0xff]  ;;  %v4980_v56 = vld [vmem:[%s8980_s29 + $0xe8] sm:$0xff]  ;;  %v4982_v57 = vld [vmem:[%s8980_s29 + $0xf8] sm:$0xff]  ;;  %v727_v61 = vrot.slane %v6859_v51, 1  ;;  %v937_v63 = vrot.slane %v6839_v44, 2 }
  0x33   : > { %905 = vmatprep.mubr.f32.mxu0 %v8890_v7  ;;  %5649 = vmatpush1.bf16.msra.mxu0 %v6770_v21  ;;  %v608_v58 = vld [vmem:[%s8982_s28 + $0x10] sm:$0xff]  ;;  %v609_v59 = vld [vmem:[%s8982_s28 + $0x18] sm:$0xff]  ;;  %v6891_v0 = vpack.c.bf16 %v4977_v55, %v4975_v54  ;;  %v6894_v1 = vpack.c.bf16 %v4982_v57, %v4980_v56  ;;  %v4979_v2 = vld [vmem:[%s8980_s29 + $0xe0] sm:$0xff]  ;;  %v939_v17 = vrot.slane %v6859_v51, 2 }
  0x34   : > { %5651 = vmatprep.subr.bf16.mxu0 %v6773_v22  ;;  %5635 = vmatprep.subr.bf16.mxu1 %v6828_v40  ;;  %v726_v60 = vsel %vm721_vm1, %v723_v43, %v725_v48  ;;  %v4981_v4 = vld [vmem:[%s8980_s29 + $0xf0] sm:$0xff]  ;;  %v4988_v5 = vld [vmem:[%s8980_s29 + $0x108] sm:$0xff]  ;;  %v6906_v6 = vpack.c.bf16 %v609_v59, %v608_v58  ;;  %v4990_v10 = vld [vmem:[%s8980_s29 + $0x118] sm:$0xff]  ;;  %v728_v13 = vsel %vm721_vm1, %v725_v48, %v727_v61  ;;  %v1059_v48 = vrot.slane %v6839_v44, 3 }
  0x35   : > { %v610_v11 = vld [vmem:[%s8982_s28 + $0x20] sm:$0xff]  ;;  %v611_v12 = vld [vmem:[%s8982_s28 + $0x28] sm:$0xff]  ;;  %v938_v16 = vsel %vm933_vm2, %v935_v50, %v937_v63  ;;  %v6925_v18 = vpack.c.bf16 %v4981_v4, %v4979_v2  ;;  %v6928_v19 = vpack.c.bf16 %v4990_v10, %v4988_v5  ;;  %v612_v24 = vld [vmem:[%s8982_s28 + $0x30] sm:$0xff]  ;;  %v940_v26 = vsel %vm933_vm2, %v937_v63, %v939_v17 }
  0x36   : > { %4960 = vmatmul.mubr.msk.f32.gmra.mrb[2].mxu0 %vm729_vm0, %v6790_v27  ;;  %5637 = vmatpush1.bf16.msra.mxu1 %v6833_v41  ;;  %v6931_v23 = vpack.c.bf16 %v611_v12, %v610_v11  ;;  %v613_v25 = vld [vmem:[%s8982_s28 + $0x38] sm:$0xff]  ;;  %v614_v29 = vld [vmem:[%s8982_s28 + $0x40] sm:$0xff]  ;;  %v615_v32 = vld [vmem:[%s8982_s28 + $0x48] sm:$0xff]  ;;  %v1060_v59 = vsel %vm1055_vm3, %v1057_v34, %v1059_v48  ;;  %v1178_v10 = vrot.slane %v6768_v20, 4  ;;  %v1179_v11 = vrot.slane %v6790_v27, 4 }
  0x37   : > { %911 = vmatprep.mubr.f32.mxu0 %v8890_v7  ;;  %5653 = vmatpush1.bf16.msra.mxu0 %v6800_v30  ;;  %v6948_v28 = vpack.c.bf16 %v613_v25, %v612_v24  ;;  %v4987_v37 = vld [vmem:[%s8980_s29 + $0x100] sm:$0xff]  ;;  %v4989_v38 = vld [vmem:[%s8980_s29 + $0x110] sm:$0xff]  ;;  %v4992_v39 = vld [vmem:[%s8980_s29 + $0x128] sm:$0xff]  ;;  %v6972_v42 = vpack.c.bf16 %v615_v32, %v614_v29  ;;  %v1183_v27 = vrot.slane %v6859_v51, 4 }
  0x38   : > { %5655 = vmatprep.subr.bf16.mxu0 %v6814_v35  ;;  %5670 = vmatprep.subr.bf16.mxu1 %v8892_v52  ;;  %v4994_v43 = vld [vmem:[%s8980_s29 + $0x138] sm:$0xff]  ;;  %v616_v45 = vld [vmem:[%s8982_s28 + $0x50] sm:$0xff]  ;;  %v6988_v49 = vpack.c.bf16 %v4989_v38, %v4987_v37  ;;  %v4991_v54 = vld [vmem:[%s8980_s29 + $0x120] sm:$0xff]  ;;  %v1180_v12 = vsel %vm1177_vm4, %v1178_v10, %v1179_v11 }
  0x39   : > { %4955 = vmatmul.mubr.msk.f32.vlgmr.msra.gmra.mrb[0].mxu1 %vm729_vm0, %v724_v47  ;;  %v617_v46 = vld [vmem:[%s8982_s28 + $0x58] sm:$0xff]  ;;  %v1058_v47 = vsel %vm1055_vm3, %v1056_v33, %v1057_v34  ;;  %v6990_v50 = vpack.c.bf16 %v4994_v43, %v4992_v39  ;;  %v4993_v55 = vld [vmem:[%s8980_s29 + $0x130] sm:$0xff]  ;;  %v618_v57 = vld [vmem:[%s8982_s28 + $0x60] sm:$0xff] }
  0x3a   : > { %4961 = vmatmul.mubr.msk.f32.gmra.mrb[4].mxu0 %vm729_vm0, %v6839_v44  ;;  %808 = vmatprep.mubr.f32.mxu1 %v8890_v7  ;;  %v6999_v56 = vpack.c.bf16 %v617_v46, %v616_v45  ;;  %v619_v58 = vld [vmem:[%s8982_s28 + $0x68] sm:$0xff]  ;;  %v620_v63 = vld [vmem:[%s8982_s28 + $0x70] sm:$0xff]  ;;  %v621_v2 = vld [vmem:[%s8982_s28 + $0x78] sm:$0xff]  ;;  %v1291_v46 = vlaneseq }
  0x3b   : > { %917 = vmatprep.mubr.f32.mxu0 %v8890_v7  ;;  %5672 = vmatpush1.bf16.msra.mxu1 %v6862_v53  ;;  %v7031_v5 = vpack.c.bf16 %v621_v2, %v620_v63  ;;  %v624_v24 = vld [vmem:[%s8982_s28 + $0x90] sm:$0xff]  ;;  %v625_v25 = vld [vmem:[%s8982_s28 + $0x98] sm:$0xff]  ;;  %v7077_v29 = vld [vmem:[%s8982_s28 + $0xa0] sm:$0xff] }
  0x3c   : > { %5673 = vmatprep.subr.bf16.mxu1 %v8892_v52  ;;  %v627_v10 = vld [vmem:[%s8984_s4] sm:$0xff] }
  0x3d   : > { %4956 = vmatmul.mubr.msk.f32.gmra.mrb[2].mxu1 %vm729_vm0, %v726_v60  ;;  %v1061_v60 = vrot.slane %v6859_v51, 3 }
  0x3e   : > { %4962 = vmatmul.mubr.msk.f32.gmra.mrb[6].mxu0 %vm729_vm0, %v6859_v51  ;;  %814 = vmatprep.mubr.f32.mxu1 %v8890_v7  ;;  %v623_v51 = vld [vmem:[%s8982_s28 + $0x88] sm:$0xff] }
  0x3f   : > { %1013 = vmatprep.mubr.f32.mxu0 %v8890_v7  ;;  %5675 = vmatpush1.bf16.msra.mxu1 %v6906_v6  ;;  %v1062_v4 = vsel %vm1055_vm3, %v1059_v48, %v1061_v60 }
  0x40   : > { %5676 = vmatprep.subr.bf16.mxu1 %v8892_v52 }
  0x41   : > { %4957 = vmatmul.mubr.msk.f32.gmra.mrb[4].mxu1 %vm729_vm0, %v728_v13  ;;  %v1181_v13 = vrot.slane %v6839_v44, 4  ;;  %v622_v44 = vld [vmem:[%s8982_s28 + $0x80] sm:$0xff] }
  0x42   : > { %4971 = vmatmul.mubr.msk.f32.vlgmr.msra.gmra.mrb[0].mxu0 %vm729_vm0, %v936_v62  ;;  %820 = vmatprep.mubr.f32.mxu1 %v8890_v7  ;;  %v7017_v62 = vpack.c.bf16 %v619_v58, %v618_v57 }
  0x43   : > { %1019 = vmatprep.mubr.f32.mxu0 %v8890_v7  ;;  %5657 = vmatpush1.bf16.msra.mxu0 %v6891_v0  ;;  %v1182_v20 = vsel %vm1177_vm4, %v1179_v11, %v1181_v13  ;;  %v628_v11 = vld [vmem:[%s8984_s4 + $0x8] sm:$0xff] }
  0x44   : > { %5659 = vmatprep.subr.bf16.mxu0 %v6894_v1  ;;  %5678 = vmatpush1.bf16.msra.mxu1 %v6931_v23 }
  0x45   : > { %4958 = vmatmul.mubr.msk.f32.gmra.mrb[6].mxu1 %vm729_vm0, %v727_v61  ;;  %5679 = vmatprep.subr.bf16.mxu1 %v8892_v52  ;;  %v7013_v61 = vpack.c.bf16 %v4993_v55, %v4991_v54  ;;  %v694_v54 = vld [vmem:[%s8983_s21] sm:$0x3]  ;;  %s4943_s21 = sshll.u32 %s596_s0, 1 }
  0x46   : > { %4972 = vmatmul.mubr.msk.f32.gmra.mrb[2].mxu0 %vm729_vm0, %v938_v16  ;;  %v1184_v16 = vsel %vm1177_vm4, %v1181_v13, %v1183_v27  ;;  %s598_s20 = scalar_lea.vmem [#allocation2], %s4943_s21  ;;  %s6490_s21 = sshll.u32 %s6554_s1, 4  ;;  %s6491_s21 = int_to_ptr.vmem [resolvable:$false] %s6490_s21 }
  0x47   : > { %1025 = vmatprep.mubr.f32.mxu0 %v8890_v7  ;;  %5661 = vmatpush1.bf16.msra.mxu0 %v6925_v18  ;;  %s4880_s27 = sshll.u32 %s598_s20, 4  ;;  %s6492_s26 = scalar_lea.vmem %s6491_s21, 64  ;;  %s8819_s27 = int_to_ptr.vmem [resolvable:$true] %s4880_s27 }
  0x48   : > { %5663 = vmatprep.subr.bf16.mxu0 %v6928_v19  ;;  %5681 = vmatpush1.bf16.msra.mxu1 %v6948_v28  ;;  %p6493_p0 = scmp.lt.s32.totalorder %s8819_s27, %s6491_s21 }
  0x49   : > { %5682 = vmatprep.subr.bf16.mxu1 %v8892_v52 }
  0x4a   : > { %4973 = vmatmul.mubr.msk.f32.gmra.mrb[4].mxu0 %vm729_vm0, %v940_v26  ;;  %v7070_v26 = vpack.c.bf16 %v625_v25, %v624_v24 }
  0x4b   : > { %1031 = vmatprep.mubr.f32.mxu0 %v8890_v7 }
  0x4c   : > { %5684 = vmatpush1.bf16.msra.mxu1 %v6972_v42 }
  0x4d   : > { %5685 = vmatprep.subr.bf16.mxu1 %v8892_v52 }
  0x4e   : > { %4974 = vmatmul.mubr.msk.f32.gmra.mrb[6].mxu0 %vm729_vm0, %v939_v17  ;;  %v7060_v17 = vpack.c.bf16 %v623_v51, %v622_v44  ;;  %v7106_v51 = vpack.c.bf16 %v628_v11, %v627_v10  ;;  %v632_v11 = vld [vmem:[%s8984_s4 + $0x28] sm:$0xff] }
  0x4f   : > { %1135 = vmatprep.mubr.f32.mxu0 %v8890_v7 }
  0x50   : > { %5687 = vmatpush1.bf16.msra.mxu1 %v6999_v56 }
  0x51   : > { %5688 = vmatprep.subr.bf16.mxu1 %v8892_v52 }
  0x52   : > { %4983 = vmatmul.mubr.msk.f32.vlgmr.msra.gmra.mrb[0].mxu0 %vm729_vm0, %v1058_v47  ;;  %v7081_v47 = vshrl.u32 %v1291_v46, 7 }
  0x53   : > { %1141 = vmatprep.mubr.f32.mxu0 %v8890_v7  ;;  %5665 = vmatpush1.bf16.msra.mxu0 %v6988_v49 }
  0x54   : > { %5667 = vmatprep.subr.bf16.mxu0 %v6990_v50  ;;  %5690 = vmatpush1.bf16.msra.mxu1 %v7017_v62  ;;  %v8889_v48 = vsub.s32 0, %v7081_v47  ;;  %v8888_v55 = vsub.s32 1, %v7081_v47 }
  0x55   : > { %5691 = vmatprep.subr.bf16.mxu1 %v8892_v52 }
  0x56   : > { %4984 = vmatmul.mubr.msk.f32.gmra.mrb[2].mxu0 %vm729_vm0, %v1060_v59  ;;  %v7090_v57 = vrot.slane %v694_v54, %v8889_v48  ;;  %v7094_v59 = vrot.slane %v694_v54, %v8888_v55 }
  0x57   : > { %1147 = vmatprep.mubr.f32.mxu0 %v8890_v7  ;;  %5669 = vmatpush1.bf16.msra.mxu0 %v7013_v61 }
  0x58   : > { %5693 = vmatpush1.bf16.msra.mxu1 %v7031_v5 }
  0x59   : > { %5694 = vmatprep.subr.bf16.mxu1 %v8892_v52 }
  0x5a   : > { %4985 = vmatmul.mubr.msk.f32.gmra.mrb[4].mxu0 %vm729_vm0, %v1062_v4 }
  0x5b   : > { %1153 = vmatprep.mubr.f32.mxu0 %v8890_v7 }
  0x5c   : > { %5696 = vmatpush1.bf16.msra.mxu1 %v7060_v17 }
  0x5d   : > { %5697 = vmatprep.subr.bf16.mxu1 %v8892_v52 }
  0x5e   : > { %4986 = vmatmul.mubr.msk.f32.gmra.mrb[6].mxu0 %vm729_vm0, %v1061_v60 }
  0x5f   : > { %1257 = vmatprep.mubr.f32.mxu0 %v8890_v7 }
  0x60   : > { %5699 = vmatpush1.bf16.msra.mxu1 %v7070_v26 }
  0x61   : > { %1370 = vmatprep.subr.mxu1 %v8890_v7 }
  0x62   : > { %4995 = vmatmul.mubr.msk.f32.vlgmr.msra.gmra.mrb[0].mxu0 %vm729_vm0, %v1180_v12 }
  0x63   : > { %1263 = vmatprep.mubr.f32.mxu0 %v8890_v7 }
  0x64   : > { %1371 = vmatpush1.msra.mxu1 %v7077_v29 }
  0x65   : > { %5700 = vmatprep.subr.bf16.mxu1 %v8892_v52 }
  0x66   : > { %4996 = vmatmul.mubr.msk.f32.gmra.mrb[2].mxu0 %vm729_vm0, %v1182_v20 }
  0x67   : > { %1269 = vmatprep.mubr.f32.mxu0 %v8890_v7 }
  0x6a   : > { %4997 = vmatmul.mubr.msk.f32.gmra.mrb[4].mxu0 %vm729_vm0, %v1184_v16 }
  0x6b   : > { %1275 = vmatprep.mubr.f32.mxu0 %v8890_v7 }
  0x6e   : > { %4998 = vmatmul.mubr.msk.f32.gmra.mrb[6].mxu0 %vm729_vm0, %v1183_v27 }
 0x10c   : > { %v804_v32 = vpop.f32.mrb[0].mxu1 }
 0x10d   : > { %v806_v33 = vpop.f32.mrb[1].mxu1 }
 0x110   : > { %v810_v34 = vpop.f32.mrb[2].mxu1 }
 0x111   : > { %v812_v37 = vpop.f32.mrb[3].mxu1 }
 0x114   : > { %v816_v38 = vpop.f32.mrb[4].mxu1 }
 0x115   : > { %v818_v39 = vpop.f32.mrb[5].mxu1 }
 0x118   : > { %v822_v43 = vpop.f32.mrb[6].mxu1 }
 0x119   : > { %v824_v45 = vpop.f32.mrb[7].mxu1 }
 0x135   : > { %v1259_v58 = vpop.f32.mrb[0].mxu0 }
 0x136   : > { %v6329_v60 = vadd.f32 %v1259_v58, %v804_v32  ;;  %v1261_v63 = vpop.f32.mrb[1].mxu0  ;;  %v629_v32 = vld [vmem:[%s8984_s4 + $0x10] sm:$0xff] }
 0x137   : > { %v6330_v2 = vadd.f32 %v1261_v63, %v806_v33  ;;  %v630_v33 = vld [vmem:[%s8984_s4 + $0x18] sm:$0xff] }
 0x138   : > { %v7097_v4 = vadd.f32 %v6329_v60, %v7090_v57  ;;  %v7126_v63 = vpack.c.bf16 %v630_v33, %v629_v32 }
 0x139   : > { %v1302_v12 = vadd.f32 %v6330_v2, %v7094_v59  ;;  %v1265_v13 = vpop.f32.mrb[2].mxu0 }
 0x13a   : > { %v6331_v20 = vadd.f32 %v1265_v13, %v810_v34  ;;  %v1267_v27 = vpop.f32.mrb[3].mxu0  ;;  %v1309_v24 = vmax.f32 %v7097_v4, 0.0  ;;  %v648_v4 = vld [vmem:[%s8864_s5] sm:$0xff] }
 0x13b   : > { %v1310_v16 = vmax.f32 %v1302_v12, 0.0  ;;  %v6332_v44 = vadd.f32 %v1267_v27, %v812_v37  ;;  %5381 = vmatprep.mubr.msk.f32.mxu0 %vm1504_vm6, %v648_v4 }
 0x13c   : > { %v7110_v25 = vadd.f32 %v6331_v20, %v7090_v57 }
 0x13d   : > { %v7119_v34 = vadd.f32 %v6332_v44, %v7094_v59  ;;  %v1271_v46 = vpop.f32.mrb[4].mxu0  ;;  %4999 = vmatprep.mubr.msk.f32.mxu1 %vm1317_vm5, %v1310_v16 }
 0x13e   : > { %v6333_v37 = vadd.f32 %v1271_v46, %v816_v38  ;;  %v1273_v54 = vpop.f32.mrb[5].mxu0  ;;  %1395 = vmatmul.mubr.f32.vlgmr.msra.gmra.mrb[8].mxu1 %v1309_v24  ;;  %v1311_v2 = vmax.f32 %v7110_v25, 0.0  ;;  %v631_v38 = vld [vmem:[%s8984_s4 + $0x20] sm:$0xff]  ;;  %v5016_v25 = vld [vmem:[%s8866_s7 + $0xc8] sm:$0xff] }
 0x13f   : > { %v1312_v58 = vmax.f32 %v7119_v34, 0.0  ;;  %v6334_v60 = vadd.f32 %v1273_v54, %v818_v39  ;;  %5702 = vmatpush1.bf16.msra.mxu1 %v7106_v51  ;;  %v7149_v32 = vpack.c.bf16 %v632_v11, %v631_v38  ;;  %v635_v38 = vld [vmem:[%s8984_s4 + $0x40] sm:$0xff]  ;;  %v636_v11 = vld [vmem:[%s8984_s4 + $0x48] sm:$0xff]  ;;  %v5013_v34 = vld [vmem:[%s8866_s7 + $0xb0] sm:$0xff] }
 0x140   : > { %v7130_v10 = vadd.f32 %v6333_v37, %v7090_v57  ;;  %5703 = vmatprep.subr.bf16.mxu1 %v8892_v52  ;;  %v634_v37 = vld [vmem:[%s8984_s4 + $0x38] sm:$0xff] }
 0x141   : > { %v7140_v39 = vadd.f32 %v6334_v60, %v7094_v59  ;;  %v1277_v12 = vpop.f32.mrb[6].mxu0  ;;  %5000 = vmatprep.mubr.msk.f32.mxu1 %vm1317_vm5, %v1312_v58 }
 0x142   : > { %v6335_v13 = vadd.f32 %v1277_v12, %v822_v43  ;;  %v1279_v20 = vpop.f32.mrb[7].mxu0  ;;  %1400 = vmatmul.mubr.f32.gmra.mrb[10].mxu1 %v1311_v2  ;;  %v1313_v33 = vmax.f32 %v7130_v10, 0.0  ;;  %v633_v43 = vld [vmem:[%s8984_s4 + $0x30] sm:$0xff] }
 0x143   : > { %v1314_v27 = vmax.f32 %v7140_v39, 0.0  ;;  %v6336_v44 = vadd.f32 %v1279_v20, %v824_v45  ;;  %5705 = vmatpush1.bf16.msra.mxu1 %v7126_v63  ;;  %v7163_v60 = vpack.c.bf16 %v634_v37, %v633_v43  ;;  %v7175_v39 = vpack.c.bf16 %v636_v11, %v635_v38  ;;  %v637_v12 = vld [vmem:[%s8984_s4 + $0x50] sm:$0xff]  ;;  %v642_v37 = vld [vmem:[%s8984_s4 + $0x78] sm:$0xff]  ;;  %v643_v38 = vld [vmem:[%s8984_s4 + $0x80] sm:$0xff] }
 0x144   : > { %v1307_v46 = vadd.f32 %v6335_v13, %v7090_v57  ;;  %5706 = vmatprep.subr.bf16.mxu1 %v8892_v52  ;;  %v638_v13 = vld [vmem:[%s8984_s4 + $0x58] sm:$0xff]  ;;  %v641_v43 = vld [vmem:[%s8984_s4 + $0x70] sm:$0xff]  ;;  %v644_v11 = vld [vmem:[%s8984_s4 + $0x88] sm:$0xff] }
 0x145   : > { %v1308_v45 = vadd.f32 %v6336_v44, %v7094_v59  ;;  %5001 = vmatprep.mubr.msk.f32.mxu1 %vm1317_vm5, %v1314_v27  ;;  %v7185_v20 = vpack.c.bf16 %v638_v13, %v637_v12  ;;  %v640_v44 = vld [vmem:[%s8984_s4 + $0x68] sm:$0xff]  ;;  %v7215_v12 = vpack.c.bf16 %v644_v11, %v643_v38  ;;  %v645_v13 = vld [vmem:[%s8984_s4 + $0x90] sm:$0xff]  ;;  %v5019_v38 = vld [vmem:[%s8866_s7 + $0xe0] sm:$0xff] }
 0x146   : > { %1405 = vmatmul.mubr.f32.gmra.mrb[12].mxu1 %v1313_v33  ;;  %v1315_v10 = vmax.f32 %v1307_v46, 0.0 }
 0x147   : > { %v1316_v54 = vmax.f32 %v1308_v45, 0.0  ;;  %5708 = vmatpush1.bf16.msra.mxu1 %v7149_v32  ;;  %v7205_v45 = vpack.c.bf16 %v642_v37, %v641_v43  ;;  %v647_v43 = vld [vmem:[%s8984_s4 + $0xa0] sm:$0xff]  ;;  %v5017_v37 = vld [vmem:[%s8866_s7 + $0xd0] sm:$0xff] }
 0x148   : > { %5709 = vmatprep.subr.bf16.mxu1 %v8892_v52  ;;  %v7279_v11 = vpack.c.bf16 %v5019_v38, %v5017_v37 }
 0x149   : > { %5002 = vmatprep.mubr.msk.f32.mxu1 %vm1317_vm5, %v1316_v54 }
 0x14a   : > { %1410 = vmatmul.mubr.f32.gmra.mrb[14].mxu1 %v1315_v10  ;;  %8989 = vst [vmem:[#allocation15_spill] sm:$0xff] %v7279_v11 }
 0x14b   : > { %5711 = vmatpush1.bf16.msra.mxu1 %v7163_v60  ;;  %5003 = vmatprep.mubr.msk.f32.mxu1 %vm1317_vm5, %v1310_v16  ;;  %v639_v16 = vld [vmem:[%s8984_s4 + $0x60] sm:$0xff] }
 0x14c   : > { %5712 = vmatprep.subr.bf16.mxu1 %v8892_v52  ;;  %v7195_v46 = vpack.c.bf16 %v640_v44, %v639_v16  ;;  %v646_v16 = vld [vmem:[%s8984_s4 + $0x98] sm:$0xff] }
 0x14d   : > { %v7225_v44 = vpack.c.bf16 %v646_v16, %v645_v13 }
 0x14f   : > { %5714 = vmatpush1.bf16.msra.mxu1 %v7175_v39  ;;  %8985 = vst [vmem:[#allocation11_spill] sm:$0xff] %v7225_v44 }
 0x150   : > { %5715 = vmatprep.subr.bf16.mxu1 %v8892_v52 }
 0x153   : > { %5717 = vmatpush1.bf16.msra.mxu1 %v7185_v20 }
 0x154   : > { %5718 = vmatprep.subr.bf16.mxu1 %v8892_v52 }
 0x157   : > { %5720 = vmatpush1.bf16.msra.mxu1 %v7195_v46 }
 0x158   : > { %5721 = vmatprep.subr.bf16.mxu1 %v8892_v52 }
 0x15b   : > { %5723 = vmatpush1.bf16.msra.mxu1 %v7205_v45 }
 0x15c   : > { %5724 = vmatprep.subr.bf16.mxu1 %v8892_v52 }
 0x15f   : > { %5726 = vmatpush1.bf16.msra.mxu1 %v7215_v12 }
 0x160   : > { %5727 = vmatprep.subr.bf16.mxu1 %v8892_v52 }
 0x163   : > { %5729 = vmatpush1.bf16.msra.mxu1 %v7225_v44 }
 0x164   : > { %1455 = vmatprep.subr.mxu1 %v8890_v7 }
 0x167   : > { %1456 = vmatpush1.msra.mxu1 %v647_v43 }
 0x168   : > { %1480 = vmatmul.mubr.f32.vlgmr.msra.gmra.mrb[16].mxu1 %v1309_v24  ;;  %v5014_v24 = vld [vmem:[%s8866_s7 + $0xb8] sm:$0xff] }
 0x169   : > { %5004 = vmatprep.mubr.msk.f32.mxu1 %vm1317_vm5, %v1312_v58  ;;  %v7256_v58 = vpack.c.bf16 %v5016_v25, %v5014_v24 }
 0x16b   : > { %8986 = vst [vmem:[#allocation12_spill] sm:$0xff] %v7256_v58  ;;  %5751 = vmatprep.subr.bf16.mxu1 %v7256_v58 }
 0x16c   : > { %1485 = vmatmul.mubr.f32.gmra.mrb[18].mxu1 %v1311_v2  ;;  %v5015_v2 = vld [vmem:[%s8866_s7 + $0xc0] sm:$0xff] }
 0x16d   : > { %5005 = vmatprep.mubr.msk.f32.mxu1 %vm1317_vm5, %v1314_v27  ;;  %v5018_v27 = vld [vmem:[%s8866_s7 + $0xd8] sm:$0xff] }
 0x170   : > { %1490 = vmatmul.mubr.f32.gmra.mrb[20].mxu1 %v1313_v33  ;;  %v5020_v33 = vld [vmem:[%s8866_s7 + $0xe8] sm:$0xff] }
 0x171   : > { %5006 = vmatprep.mubr.msk.f32.mxu1 %vm1317_vm5, %v1316_v54  ;;  %v7267_v54 = vpack.c.bf16 %v5015_v2, %v5013_v34 }
 0x173   : > { %8987 = vst [vmem:[#allocation13_spill] sm:$0xff] %v7267_v54  ;;  %5753 = vmatpush1.bf16.msra.mxu1 %v7267_v54 }
 0x174   : > { %1495 = vmatmul.mubr.f32.gmra.mrb[22].mxu1 %v1315_v10  ;;  %v7269_v10 = vpack.c.bf16 %v5020_v33, %v5018_v27 }
 0x175   : > { %1797 = vmatprep.mubr.f32.mxu1 %v8890_v7 }
 0x176   : > { %8988 = vst [vmem:[#allocation14_spill] sm:$0xff] %v7269_v10  ;;  %5755 = vmatprep.subr.bf16.mxu1 %v7269_v10 }
 0x177   : > { %5757 = vmatpush1.bf16.msra.mxu1 %v7279_v11 }
 0x211   : > { %v1396_v13 = vpop.f32.mrb[8].mxu1 }
 0x212   : > { %v1398_v16 = vpop.f32.mrb[9].mxu1 }
 0x215   : > { %v1401_v43 = vpop.f32.mrb[10].mxu1 }
 0x216   : > { %v1403_v4 = vpop.f32.mrb[11].mxu1 }
 0x217   : > { %v8990_v4 = vmov 0 }
 0x218   : > { %v8991_v4 = vsel %vm7285_vm8, 4294967295, %v8990_v4 }
 0x219   : > { %v1406_v24 = vpop.f32.mrb[12].mxu1  ;;  %8992 = vst [vmem:[#allocation16_spill] sm:$0xff] %v8991_v4 }
 0x21a   : > { %v1408_v25 = vpop.f32.mrb[13].mxu1 }
 0x21b   : > { %v5026_v25 = vld [vmem:[%s8866_s7 + $0x118] sm:$0xff] }
 0x21d   : > { %v1411_v34 = vpop.f32.mrb[14].mxu1 }
 0x21e   : > { %v1413_v2 = vpop.f32.mrb[15].mxu1 }
 0x21f   : > { %v5025_v2 = vld [vmem:[%s8866_s7 + $0x110] sm:$0xff] }
 0x23b   : > { %v1481_v27 = vpop.f32.mrb[16].mxu1 }
 0x23c   : > { %v1500_v33 = vmax.f32 %v1396_v13, %v1481_v27  ;;  %v1483_v55 = vpop.f32.mrb[17].mxu1  ;;  %v5021_v13 = vld [vmem:[%s8866_s7 + $0xf0] sm:$0xff] }
 0x23f   : > { %v1486_v48 = vpop.f32.mrb[18].mxu1 }
 0x240   : > { %v1501_v7 = vmax.f32 %v1401_v43, %v1486_v48  ;;  %v1488_v52 = vpop.f32.mrb[19].mxu1  ;;  %v651_v48 = vld [vmem:[%s8865_s6 + $0x8] sm:$0x3f]  ;;  %v5023_v43 = vld [vmem:[%s8866_s7 + $0x100] sm:$0xff] }
 0x241   : > { %v650_v52 = vld [vmem:[%s8865_s6] sm:$0xff] }
 0x242   : > { %v5730_v37 = vpack.c.bf16 %v1501_v7, %v1500_v33  ;;  %v649_v7 = vld [vmem:[%s8864_s5 + $0x8] sm:$0x3f]  ;;  %v5027_v33 = vld [vmem:[%s8866_s7 + $0x120] sm:$0xff] }
 0x243   : > { %v1491_v38 = vpop.f32.mrb[20].mxu1 }
 0x244   : > { %v1502_v54 = vmax.f32 %v1406_v24, %v1491_v38  ;;  %v1493_v10 = vpop.f32.mrb[21].mxu1  ;;  %5731 = vmatprep.subr.bf16.mxu0 %v5730_v37  ;;  %v7324_v24 = vpack.c.bf16 %v5023_v43, %v5021_v13  ;;  %v5030_v38 = vld [vmem:[%s8866_s7 + $0x138] sm:$0xff]  ;;  %v1673_v13 = vld [vmem:[%s8866_s7 + $0x8] sm:$0xff] }
 0x245   : > { %5733 = vmatpush3.bf16.msra.mxu0 %v5730_v37  ;;  %v5024_v10 = vld [vmem:[%s8866_s7 + $0x108] sm:$0xff]  ;;  %v1675_v43 = vld [vmem:[%s8866_s7 + $0x18] sm:$0xff] }
 0x246   : > { %8995 = vst [vmem:[#allocation18_spill] sm:$0xff] %v7324_v24 }
 0x247   : > { %v1496_v11 = vpop.f32.mrb[22].mxu1 }
 0x248   : > { %v1503_v16 = vmax.f32 %v1411_v34, %v1496_v11  ;;  %v1498_v58 = vpop.f32.mrb[23].mxu1  ;;  %v5028_v34 = vld [vmem:[%s8866_s7 + $0x128] sm:$0xff] }
 0x249   : > { %v8993_v58 = vmov 0.0|0.0   ;;  %v7337_v27 = vpack.c.bf16 %v5028_v34, %v5026_v25  ;;  %v7377_v25 = vpack.c.bf16 %v1675_v43, %v1673_v13  ;;  %v652_v34 = vld [vmem:[%s8868_s9] sm:$0xff]  ;;  %v658_v13 = vld [vmem:[%s8868_s9 + $0x30] sm:$0xff]  ;;  %v659_v43 = vld [vmem:[%s8868_s9 + $0x38] sm:$0xff] }
 0x24a   : > { %v5734_v55 = vpack.c.bf16 %v1503_v16, %v1502_v54  ;;  %v5022_v54 = vld [vmem:[%s8866_s7 + $0xf8] sm:$0xff]  ;;  %v5032_v16 = vld [vmem:[%s8866_s7 + $0x148] sm:$0xff] }
 0x24b   : > { %v7316_v11 = vpack.c.bf16 %v5024_v10, %v5022_v54  ;;  %8996 = vst [vmem:[#allocation19_spill] sm:$0xff] %v7337_v27  ;;  %v5034_v54 = vld [vmem:[%s8866_s7 + $0x158] sm:$0xf]  ;;  %v5033_v10 = vld [vmem:[%s8866_s7 + $0x150] sm:$0xf]  ;;  %9000 = vst [vmem:[#allocation23_spill] sm:$0xff] %v7377_v25 }
 0x24c   : > { %5736 = vmatprep.subr.msk.bf16.mxu0 %vm7285_vm8, %v5734_v55 }
 0x24d   : > { %5739 = vmatpush3.bf16.msk.msra.mxu0 %vm7285_vm8, %v5734_v55  ;;  %8994 = vst [vmem:[#allocation17_spill] sm:$0xff] %v7316_v11  ;;  %5759 = vmatprep.subr.bf16.mxu1 %v7316_v11 }
 0x24e   : > { %5741 = vmatprep.subr.bf16.mxu0 %v5730_v37  ;;  %5761 = vmatpush1.bf16.msra.mxu1 %v7324_v24 }
 0x24f   : > { %5763 = vmatprep.subr.bf16.mxu1 %v7337_v27  ;;  %v1683_v27 = vld [vmem:[%s8866_s7 + $0x58] sm:$0xff] }
 0x250   : > { %5382 = vmatmul.mubr.msk.f32.vlgmr.msra.gmra.mrb[8].mxu0 %vm1504_vm6, %v649_v7  ;;  %v5029_v7 = vld [vmem:[%s8866_s7 + $0x130] sm:$0xff] }
 0x251   : > { %5743 = vmatpush3.bf16.msra.mxu0 %v5730_v37  ;;  %5392 = vmatprep.mubr.msk.f32.mxu0 %vm1504_vm6, %v650_v52  ;;  %v7342_v37 = vpack.c.bf16 %v5027_v33, %v5025_v2  ;;  %v5031_v52 = vld [vmem:[%s8866_s7 + $0x140] sm:$0xff]  ;;  %v653_v2 = vld [vmem:[%s8868_s9 + $0x8] sm:$0xff]  ;;  %v654_v33 = vld [vmem:[%s8868_s9 + $0x10] sm:$0xff] }
 0x252   : > { %5746 = vmatprep.subr.msk.bf16.mxu0 %vm7285_vm8, %v5734_v55 }
 0x253   : > { %8997 = vst [vmem:[#allocation20_spill] sm:$0xff] %v7342_v37  ;;  %5765 = vmatpush1.bf16.msra.mxu1 %v7342_v37 }
 0x255   : > { %5749 = vmatpush3.bf16.msk.msra.mxu0 %vm7285_vm8, %v5734_v55  ;;  %v7352_v55 = vpack.c.bf16 %v5032_v16, %v5030_v38  ;;  %v7390_v38 = vpack.c.bf16 %v653_v2, %v652_v34  ;;  %v655_v16 = vld [vmem:[%s8868_s9 + $0x18] sm:$0xff]  ;;  %v7416_v34 = vpack.c.bf16 %v659_v43, %v658_v13  ;;  %v660_v2 = vld [vmem:[%s8868_s9 + $0x40] sm:$0xff] }
 0x256   : > { %5850 = vmatprep.subr.bf16.mxu0 %v8993_v58  ;;  %v664_v43 = vld [vmem:[%s8868_s9 + $0x60] sm:$0xff] }
 0x257   : > { %8998 = vst [vmem:[#allocation21_spill] sm:$0xff] %v7352_v55  ;;  %5767 = vmatprep.subr.bf16.mxu1 %v7352_v55  ;;  %9001 = vst [vmem:[#allocation24_spill] sm:$0xff] %v7390_v38 }
 0x258   : > { %5393 = vmatmul.mubr.msk.f32.vlgmr.msra.gmra.mrb[10].mxu0 %vm1504_vm6, %v651_v48  ;;  %v7360_v48 = vpack.c.bf16 %v5031_v52, %v5029_v7  ;;  %v7396_v7 = vpack.c.bf16 %v655_v16, %v654_v33  ;;  %v656_v52 = vld [vmem:[%s8868_s9 + $0x20] sm:$0xff]  ;;  %9004 = vst [vmem:[#allocation27_spill] sm:$0xff] %v7416_v34  ;;  %v661_v33 = vld [vmem:[%s8868_s9 + $0x48] sm:$0xff] }
 0x259   : > { %5852 = vmatpush1.bf16.msra.mxu0 %v7390_v38  ;;  %v7426_v16 = vpack.c.bf16 %v661_v33, %v660_v2  ;;  %v665_v2 = vld [vmem:[%s8868_s9 + $0x68] sm:$0xff] }
 0x25a   : > { %8999 = vst [vmem:[#allocation22_spill] sm:$0xff] %v7360_v48  ;;  %5769 = vmatpush1.bf16.msra.mxu1 %v7360_v48  ;;  %9002 = vst [vmem:[#allocation25_spill] sm:$0xff] %v7396_v7  ;;  %5853 = vmatprep.subr.bf16.mxu0 %v8993_v58  ;;  %v1679_v48 = vld [vmem:[%s8866_s7 + $0x38] sm:$0xff] }
 0x25b   : > { %5035 = vmatprep.subr.msk.mxu1 %vm1177_vm4, %v5034_v54  ;;  %v657_v54 = vld [vmem:[%s8868_s9 + $0x28] sm:$0xff]  ;;  %9005 = vst [vmem:[#allocation28_spill] sm:$0xff] %v7426_v16 }
 0x25d   : > { %5855 = vmatpush1.bf16.msra.mxu0 %v7396_v7 }
 0x25e   : > { %5036 = vmatpush1.msk.msra.mxu1 %vm1177_vm4, %v5033_v10  ;;  %v7406_v10 = vpack.c.bf16 %v657_v54, %v656_v52  ;;  %5856 = vmatprep.subr.bf16.mxu0 %v8993_v58  ;;  %v662_v52 = vld [vmem:[%s8868_s9 + $0x50] sm:$0xff]  ;;  %v663_v54 = vld [vmem:[%s8868_s9 + $0x58] sm:$0xff] }
 0x25f   : > { %5771 = vmatprep.subr.bf16.mxu1 %v7377_v25  ;;  %v7436_v13 = vpack.c.bf16 %v663_v54, %v662_v52  ;;  %v666_v52 = vld [vmem:[%s8868_s9 + $0x70] sm:$0xff]  ;;  %v667_v54 = vld [vmem:[%s8868_s9 + $0x78] sm:$0xff]  ;;  %v1677_v25 = vld [vmem:[%s8866_s7 + $0x28] sm:$0xff] }
 0x260   : > { %9003 = vst [vmem:[#allocation26_spill] sm:$0xff] %v7406_v10  ;;  %v7459_v7 = vpack.c.bf16 %v667_v54, %v666_v52 }
 0x261   : > { %5858 = vmatpush1.bf16.msra.mxu0 %v7406_v10  ;;  %9006 = vst [vmem:[#allocation29_spill] sm:$0xff] %v7436_v13  ;;  %v7446_v10 = vpack.c.bf16 %v665_v2, %v664_v43  ;;  %v1674_v43 = vld [vmem:[%s8866_s7 + $0x10] sm:$0xff]  ;;  %v668_v2 = vld [vmem:[%s8868_s9 + $0x80] sm:$0xff] }
 0x262   : > { %5859 = vmatprep.subr.bf16.mxu0 %v8993_v58  ;;  %9008 = vst [vmem:[#allocation31_spill] sm:$0xff] %v7459_v7 }
 0x263   : > { %9007 = vst [vmem:[#allocation30_spill] sm:$0xff] %v7446_v10 }
 0x265   : > { %5861 = vmatpush1.bf16.msra.mxu0 %v7416_v34 }
 0x266   : > { %5862 = vmatprep.subr.bf16.mxu0 %v8993_v58 }
 0x269   : > { %5864 = vmatpush1.bf16.msra.mxu0 %v7426_v16  ;;  %v1672_v16 = vld [vmem:[%s8866_s7] sm:$0xff] }
 0x26a   : > { %5865 = vmatprep.subr.bf16.mxu0 %v8993_v58  ;;  %v7475_v54 = vpack.c.bf16 %v1674_v43, %v1672_v16  ;;  %v1678_v16 = vld [vmem:[%s8866_s7 + $0x30] sm:$0xff] }
 0x26c   : > { %9009 = vst [vmem:[#allocation32_spill] sm:$0xff] %v7475_v54 }
 0x26d   : > { %5867 = vmatpush1.bf16.msra.mxu0 %v7436_v13  ;;  %v669_v13 = vld [vmem:[%s8868_s9 + $0x88] sm:$0xff] }
 0x26e   : > { %5868 = vmatprep.subr.bf16.mxu0 %v8993_v58  ;;  %v7484_v55 = vpack.c.bf16 %v669_v13, %v668_v2  ;;  %v7495_v13 = vpack.c.bf16 %v1679_v48, %v1677_v25  ;;  %v1676_v2 = vld [vmem:[%s8866_s7 + $0x20] sm:$0xff] }
 0x270   : > { %9010 = vst [vmem:[#allocation33_spill] sm:$0xff] %v7495_v13 }
 0x271   : > { %5870 = vmatpush1.bf16.msra.mxu0 %v7446_v10 }
 0x272   : > { %5871 = vmatprep.subr.bf16.mxu0 %v8993_v58 }
 0x275   : > { %5873 = vmatpush1.bf16.msra.mxu0 %v7459_v7 }
 0x276   : > { %5874 = vmatprep.subr.bf16.mxu0 %v8993_v58 }
 0x279   : > { %5876 = vmatpush1.bf16.msra.mxu0 %v7484_v55 }
 0x27a   : > { %5877 = vmatprep.subr.bf16.mxu0 %v8993_v58 }
 0x323   : > { %v5383_v33 = vpop.f32.mrb[8].mxu0 }
 0x324   : > { %v1580_v34 = vpop.f32.mrb[9].mxu0 }
 0x32b   : > { %v5394_v38 = vpop.f32.mrb[10].mxu0 }
 0x32c   : > { %v7471_v4 = vmax.f32 %v5383_v33, %v5394_v38  ;;  %v1661_v10 = vpop.f32.mrb[11].mxu0 }
 0x32d   : > { %v7473_v52 = vmax.f32 %v1580_v34, %v1661_v10  ;;  %v1681_v10 = vld [vmem:[%s8866_s7 + $0x48] sm:$0xff] }
 0x32e   : > { %v1720_v38 = vrot.slane %v7471_v4, 1  ;;  %v9011_v48 = vrot.slane %v7471_v4, 2  ;;  %v9012_v24 = vrot.slane %v7471_v4, 3 }
 0x32f   : > { %v1719_v33 = vrot.slane %v7473_v52, 1  ;;  %v1920_v43 = vrot.slane %v7473_v52, 2  ;;  %v2037_v37 = vrot.slane %v7473_v52, 3  ;;  %v2154_v7 = vrot.slane %v7473_v52, 4 }
 0x331   : > { %v1721_v34 = vsel %vm721_vm1, %v1719_v33, %v1720_v38  ;;  %v7513_v25 = vsel %vm933_vm2, %v1920_v43, %v9011_v48  ;;  %v7518_v11 = vsel %vm1055_vm3, %v2037_v37, %v9012_v24  ;;  %v9013_v33 = vrot.slane %v7471_v4, 4  ;;  %v1680_v37 = vld [vmem:[%s8866_s7 + $0x40] sm:$0xff] }
 0x332   : > { %5037 = vmatmul.mubr.msk.f32.vlgmr.msra.gmra.mrb[24].mxu1 %vm1722_vm9, %v1721_v34  ;;  %v9014_v43 = vmov 0.0   ;;  %v7530_v48 = vpack.c.bf16 %v1678_v16, %v1676_v2  ;;  %v7533_v24 = vpack.c.bf16 %v1683_v27, %v1681_v10  ;;  %v1685_v34 = vld [vmem:[%s8866_s7 + $0x68] sm:$0xff]  ;;  %v1687_v16 = vld [vmem:[%s8866_s7 + $0x78] sm:$0xff]  ;;  %v1684_v2 = vld [vmem:[%s8866_s7 + $0x60] sm:$0xff] }
 0x333   : > { %v7523_v44 = vsel %vm1177_vm4, %v2154_v7, %v9013_v33  ;;  %5773 = vmatpush1.bf16.msra.mxu1 %v7475_v54  ;;  %1803 = vmatprep.mubr.f32.mxu1 %v9014_v43  ;;  %v1682_v7 = vld [vmem:[%s8866_s7 + $0x50] sm:$0xff]  ;;  %v7553_v10 = vpack.c.bf16 %v1687_v16, %v1685_v34  ;;  %v1688_v16 = vld [vmem:[%s8866_s7 + $0x80] sm:$0xff] }
 0x334   : > { %9015 = vst [vmem:[#allocation34_spill] sm:$0xff] %v7530_v48  ;;  %5775 = vmatprep.subr.bf16.mxu1 %v7495_v13  ;;  %9016 = vst [vmem:[#allocation35_spill] sm:$0xff] %v7533_v24  ;;  %v7549_v27 = vpack.c.bf16 %v1682_v7, %v1680_v37  ;;  %v1686_v33 = vld [vmem:[%s8866_s7 + $0x70] sm:$0xff]  ;;  %v1691_v37 = vld [vmem:[%s8866_s7 + $0x98] sm:$0xff] }
 0x335   : > { %9018 = vst [vmem:[#allocation37_spill] sm:$0xff] %v7553_v10  ;;  %v7568_v7 = vpack.c.bf16 %v1686_v33, %v1684_v2  ;;  %v1693_v2 = vld [vmem:[%s8866_s7 + $0xa8] sm:$0xf]  ;;  %v5049_v54 = vld [vmem:[%s8866_s7 + $0x190] sm:$0xff] }
 0x336   : > { %5038 = vmatmul.mubr.msk.f32.gmra.mrb[26].mxu1 %vm1722_vm9, %v1720_v38  ;;  %9017 = vst [vmem:[#allocation36_spill] sm:$0xff] %v7549_v27  ;;  %v1689_v38 = vld [vmem:[%s8866_s7 + $0x88] sm:$0xff] }
 0x337   : > { %5777 = vmatpush1.bf16.msra.mxu1 %v7530_v48  ;;  %1884 = vmatprep.mubr.f32.mxu1 %v9014_v43  ;;  %9019 = vst [vmem:[#allocation38_spill] sm:$0xff] %v7568_v7  ;;  %v7571_v34 = vpack.c.bf16 %v1691_v37, %v1689_v38  ;;  %v5044_v33 = vld [vmem:[%s8866_s7 + $0x168] sm:$0xff]  ;;  %v5046_v38 = vld [vmem:[%s8866_s7 + $0x178] sm:$0xff]  ;;  %v5043_v37 = vld [vmem:[%s8866_s7 + $0x160] sm:$0xff] }
 0x338   : > { %5779 = vmatprep.subr.bf16.mxu1 %v7533_v24  ;;  %v1690_v24 = vld [vmem:[%s8866_s7 + $0x90] sm:$0xff] }
 0x339   : > { %9020 = vst [vmem:[#allocation39_spill] sm:$0xff] %v7571_v34  ;;  %v7580_v48 = vpack.c.bf16 %v1690_v24, %v1688_v16  ;;  %v5045_v24 = vld [vmem:[%s8866_s7 + $0x170] sm:$0xff]  ;;  %v5048_v16 = vld [vmem:[%s8866_s7 + $0x188] sm:$0xff] }
 0x33b   : > { %5781 = vmatpush1.bf16.msra.mxu1 %v7549_v27  ;;  %9021 = vst [vmem:[#allocation40_spill] sm:$0xff] %v7580_v48  ;;  %v7611_v27 = vpack.c.bf16 %v5045_v24, %v5043_v37  ;;  %v5056_v37 = vld [vmem:[%s8866_s7 + $0x1c8] sm:$0xff] }
 0x33c   : > { %5783 = vmatprep.subr.bf16.mxu1 %v7553_v10  ;;  %v7609_v10 = vpack.c.bf16 %v5046_v38, %v5044_v33  ;;  %v5054_v33 = vld [vmem:[%s8866_s7 + $0x1b8] sm:$0xff]  ;;  %v5051_v38 = vld [vmem:[%s8866_s7 + $0x1a0] sm:$0xff] }
 0x33d   : > { %9022 = vst [vmem:[#allocation41_spill] sm:$0xff] %v7611_v27 }
 0x33f   : > { %5785 = vmatpush1.bf16.msra.mxu1 %v7568_v7  ;;  %v1692_v7 = vld [vmem:[%s8866_s7 + $0xa0] sm:$0xf] }
 0x340   : > { %5787 = vmatprep.subr.bf16.mxu1 %v7571_v34  ;;  %v5050_v34 = vld [vmem:[%s8866_s7 + $0x198] sm:$0xff] }
 0x341   : > { %v7613_v13 = vpack.c.bf16 %v5050_v34, %v5048_v16  ;;  %v5055_v16 = vld [vmem:[%s8866_s7 + $0x1c0] sm:$0xff] }
 0x343   : > { %5789 = vmatpush1.bf16.msra.mxu1 %v7580_v48  ;;  %9023 = vst [vmem:[#allocation42_spill] sm:$0xff] %v7613_v13  ;;  %v5047_v48 = vld [vmem:[%s8866_s7 + $0x180] sm:$0xff] }
 0x344   : > { %5039 = vmatprep.subr.msk.mxu1 %vm1177_vm4, %v1693_v2  ;;  %v5052_v2 = vld [vmem:[%s8866_s7 + $0x1a8] sm:$0xff]  ;;  %v7633_v34 = vpack.c.bf16 %v5049_v54, %v5047_v48  ;;  %v5058_v54 = vld [vmem:[%s8866_s7 + $0x1d8] sm:$0xff] }
 0x345   : > { %v7657_v24 = vpack.c.bf16 %v5058_v54, %v5056_v37  ;;  %v5059_v54 = vld [vmem:[%s8866_s7 + $0x1e0] sm:$0xff] }
 0x346   : > { %9024 = vst [vmem:[#allocation43_spill] sm:$0xff] %v7633_v34 }
 0x347   : > { %5040 = vmatpush1.msk.msra.mxu1 %vm1177_vm4, %v1692_v7  ;;  %v7636_v7 = vpack.c.bf16 %v5054_v33, %v5052_v2  ;;  %9027 = vst [vmem:[#allocation46_spill] sm:$0xff] %v7657_v24  ;;  %v5057_v2 = vld [vmem:[%s8866_s7 + $0x1d0] sm:$0xff]  ;;  %v5060_v33 = vld [vmem:[%s8866_s7 + $0x1e8] sm:$0xff] }
 0x348   : > { %5041 = vmatmul.mubr.msk.f32.vlgmr.msra.gmra.mrb[24].mxu1 %vm1722_vm9, %v7473_v52  ;;  %5791 = vmatprep.subr.bf16.mxu1 %v7609_v10  ;;  %v5053_v52 = vld [vmem:[%s8866_s7 + $0x1b0] sm:$0xff] }
 0x349   : > { %5793 = vmatpush1.bf16.msra.mxu1 %v7611_v27  ;;  %1890 = vmatprep.mubr.f32.mxu1 %v9014_v43  ;;  %9025 = vst [vmem:[#allocation44_spill] sm:$0xff] %v7636_v7  ;;  %v7653_v48 = vpack.c.bf16 %v5053_v52, %v5051_v38  ;;  %v5062_v38 = vld [vmem:[%s8866_s7 + $0x1f8] sm:$0xff]  ;;  %v7672_v52 = vpack.c.bf16 %v5057_v2, %v5055_v16  ;;  %v7690_v16 = vld [vmem:[%s8866_s7 + $0x208] sm:$0xf]  ;;  %v5075_v27 = vld [vmem:[%s8866_s7 + $0x240] sm:$0xff] }
 0x34a   : > { %5795 = vmatprep.subr.bf16.mxu1 %v7613_v13  ;;  %v7675_v37 = vpack.c.bf16 %v5062_v38, %v5060_v33  ;;  %v5070_v2 = vld [vmem:[%s8866_s7 + $0x218] sm:$0xff]  ;;  %v5072_v33 = vld [vmem:[%s8866_s7 + $0x228] sm:$0xff]  ;;  %v5071_v38 = vld [vmem:[%s8866_s7 + $0x220] sm:$0xff] }
 0x34b   : > { %9026 = vst [vmem:[#allocation45_spill] sm:$0xff] %v7653_v48  ;;  %9028 = vst [vmem:[#allocation47_spill] sm:$0xff] %v7672_v52  ;;  %v5073_v13 = vld [vmem:[%s8866_s7 + $0x230] sm:$0xff] }
 0x34c   : > { %5042 = vmatmul.mubr.msk.f32.gmra.mrb[26].mxu1 %vm1722_vm9, %v7471_v4  ;;  %9029 = vst [vmem:[#allocation48_spill] sm:$0xff] %v7675_v37 }
 0x34d   : > { %5797 = vmatpush1.bf16.msra.mxu1 %v7633_v34  ;;  %1997 = vmatprep.mubr.f32.mxu1 %v9014_v43 }
 0x34e   : > { %5799 = vmatprep.subr.bf16.mxu1 %v7636_v7  ;;  %v5061_v7 = vld [vmem:[%s8866_s7 + $0x1f0] sm:$0xff] }
 0x34f   : > { %v7684_v34 = vpack.c.bf16 %v5061_v7, %v5059_v54  ;;  %v5069_v7 = vld [vmem:[%s8866_s7 + $0x210] sm:$0xff]  ;;  %v5074_v54 = vld [vmem:[%s8866_s7 + $0x238] sm:$0xff] }
 0x351   : > { %5801 = vmatpush1.bf16.msra.mxu1 %v7653_v48  ;;  %9030 = vst [vmem:[#allocation49_spill] sm:$0xff] %v7684_v34  ;;  %v7720_v48 = vpack.c.bf16 %v5071_v38, %v5069_v7  ;;  %v5077_v38 = vld [vmem:[%s8866_s7 + $0x250] sm:$0xff] }
 0x352   : > { %5803 = vmatprep.subr.bf16.mxu1 %v7657_v24  ;;  %v7718_v24 = vpack.c.bf16 %v5072_v33, %v5070_v2  ;;  %v5078_v2 = vld [vmem:[%s8866_s7 + $0x258] sm:$0xff]  ;;  %v7743_v33 = vpack.c.bf16 %v5075_v27, %v5073_v13  ;;  %v5084_v13 = vld [vmem:[%s8866_s7 + $0x288] sm:$0xff]  ;;  %v9037_v27 = vrot.slane %v7471_v4, 2 }
 0x353   : > { %9033 = vst [vmem:[#allocation52_spill] sm:$0xff] %v7720_v48 }
 0x354   : > { %9032 = vst [vmem:[#allocation51_spill] sm:$0xff] %v7718_v24  ;;  %9035 = vst [vmem:[#allocation54_spill] sm:$0xff] %v7743_v33 }
 0x355   : > { %5805 = vmatpush1.bf16.msra.mxu1 %v7672_v52  ;;  %v7716_v52 = vld [vmem:[%s8866_s7 + $0x200] sm:$0xf] }
 0x356   : > { %5807 = vmatprep.subr.bf16.mxu1 %v7675_v37  ;;  %v5076_v37 = vld [vmem:[%s8866_s7 + $0x248] sm:$0xff]  ;;  %9031 = vst [vmem:[#allocation50_spill] sm:$0xff] %v7716_v52 }
 0x359   : > { %5809 = vmatpush1.bf16.msra.mxu1 %v7684_v34  ;;  %v7722_v34 = vpack.c.bf16 %v5076_v37, %v5074_v54  ;;  %v5080_v37 = vld [vmem:[%s8866_s7 + $0x268] sm:$0xff]  ;;  %v5082_v54 = vld [vmem:[%s8866_s7 + $0x278] sm:$0xff] }
 0x35a   : > { %5065 = vmatprep.subr.msk.mxu1 %vm1177_vm4, %v7690_v16  ;;  %v7746_v7 = vpack.c.bf16 %v5080_v37, %v5078_v2  ;;  %v7768_v37 = vpack.c.bf16 %v5084_v13, %v5082_v54  ;;  %v5085_v13 = vld [vmem:[%s8866_s7 + $0x290] sm:$0xff] }
 0x35b   : > { %9034 = vst [vmem:[#allocation53_spill] sm:$0xff] %v7722_v34 }
 0x35c   : > { %9036 = vst [vmem:[#allocation55_spill] sm:$0xff] %v7746_v7  ;;  %9039 = vst [vmem:[#allocation57_spill] sm:$0xff] %v7768_v37 }
 0x35d   : > { %5066 = vmatpush1.msk.msra.mxu1 %vm1177_vm4, %v7716_v52  ;;  %v5101_v52 = vld [vmem:[%s8866_s7 + $0x2f0] sm:$0xff] }
 0x35e   : > { %5067 = vmatmul.mubr.msk.f32.vlgmr.msra.gmra.mrb[24].mxu1 %vm1722_vm9, %v7513_v25  ;;  %5811 = vmatprep.subr.bf16.mxu1 %v7718_v24  ;;  %v5079_v25 = vld [vmem:[%s8866_s7 + $0x260] sm:$0xff] }
 0x35f   : > { %5813 = vmatpush1.bf16.msra.mxu1 %v7720_v48  ;;  %2003 = vmatprep.mubr.f32.mxu1 %v9014_v43  ;;  %v7764_v2 = vpack.c.bf16 %v5079_v25, %v5077_v38  ;;  %v5083_v48 = vld [vmem:[%s8866_s7 + $0x280] sm:$0xff]  ;;  %v5088_v38 = vld [vmem:[%s8866_s7 + $0x2a8] sm:$0xff] }
 0x360   : > { %5815 = vmatprep.subr.bf16.mxu1 %v7722_v34  ;;  %v5081_v34 = vld [vmem:[%s8866_s7 + $0x270] sm:$0xff]  ;;  %v5099_v24 = vld [vmem:[%s8866_s7 + $0x2e0] sm:$0xff] }
 0x361   : > { %9038 = vst [vmem:[#allocation56_spill] sm:$0xff] %v7764_v2  ;;  %v7783_v25 = vpack.c.bf16 %v5083_v48, %v5081_v34  ;;  %v7801_v34 = vld [vmem:[%s8866_s7 + $0x2b8] sm:$0xf]  ;;  %v5096_v48 = vld [vmem:[%s8866_s7 + $0x2c8] sm:$0xff] }
 0x362   : > { %5068 = vmatmul.mubr.msk.f32.gmra.mrb[26].mxu1 %vm1722_vm9, %v9037_v27  ;;  %v5086_v27 = vld [vmem:[%s8866_s7 + $0x298] sm:$0xff] }
 0x363   : > { %5817 = vmatpush1.bf16.msra.mxu1 %v7743_v33  ;;  %2114 = vmatprep.mubr.f32.mxu1 %v9014_v43  ;;  %9040 = vst [vmem:[#allocation58_spill] sm:$0xff] %v7783_v25  ;;  %v7786_v54 = vpack.c.bf16 %v5088_v38, %v5086_v27  ;;  %v5098_v27 = vld [vmem:[%s8866_s7 + $0x2d8] sm:$0xff]  ;;  %v5097_v38 = vld [vmem:[%s8866_s7 + $0x2d0] sm:$0xff] }
 0x364   : > { %5819 = vmatprep.subr.bf16.mxu1 %v7746_v7  ;;  %v5087_v7 = vld [vmem:[%s8866_s7 + $0x2a0] sm:$0xff] }
 0x365   : > { %9041 = vst [vmem:[#allocation59_spill] sm:$0xff] %v7786_v54  ;;  %v7795_v33 = vpack.c.bf16 %v5087_v7, %v5085_v13  ;;  %v5095_v7 = vld [vmem:[%s8866_s7 + $0x2c0] sm:$0xff]  ;;  %v5100_v13 = vld [vmem:[%s8866_s7 + $0x2e8] sm:$0xff] }
 0x367   : > { %5821 = vmatpush1.bf16.msra.mxu1 %v7764_v2  ;;  %9042 = vst [vmem:[#allocation60_spill] sm:$0xff] %v7795_v33  ;;  %v7831_v2 = vpack.c.bf16 %v5097_v38, %v5095_v7  ;;  %v5103_v38 = vld [vmem:[%s8866_s7 + $0x300] sm:$0xff] }
 0x368   : > { %5823 = vmatprep.subr.bf16.mxu1 %v7768_v37  ;;  %v7829_v37 = vpack.c.bf16 %v5098_v27, %v5096_v48  ;;  %v5104_v48 = vld [vmem:[%s8866_s7 + $0x308] sm:$0xff]  ;;  %v7854_v27 = vpack.c.bf16 %v5101_v52, %v5099_v24  ;;  %v5110_v24 = vld [vmem:[%s8866_s7 + $0x338] sm:$0xff]  ;;  %v9047_v52 = vrot.slane %v7471_v4, 3 }
 0x369   : > { %9043 = vst [vmem:[#allocation61_spill] sm:$0xff] %v7831_v2 }
 0x36a   : > { %9045 = vst [vmem:[#allocation63_spill] sm:$0xff] %v7854_v27 }
 0x36b   : > { %5825 = vmatpush1.bf16.msra.mxu1 %v7783_v25  ;;  %v7827_v25 = vld [vmem:[%s8866_s7 + $0x2b0] sm:$0xf] }
 0x36c   : > { %5827 = vmatprep.subr.bf16.mxu1 %v7786_v54  ;;  %v5102_v54 = vld [vmem:[%s8866_s7 + $0x2f8] sm:$0xff] }
 0x36f   : > { %5829 = vmatpush1.bf16.msra.mxu1 %v7795_v33  ;;  %v7833_v33 = vpack.c.bf16 %v5102_v54, %v5100_v13  ;;  %v5106_v54 = vld [vmem:[%s8866_s7 + $0x318] sm:$0xff]  ;;  %v5108_v13 = vld [vmem:[%s8866_s7 + $0x328] sm:$0xff] }
 0x370   : > { %5091 = vmatprep.subr.msk.mxu1 %vm1177_vm4, %v7801_v34  ;;  %v7857_v7 = vpack.c.bf16 %v5106_v54, %v5104_v48  ;;  %v7879_v54 = vpack.c.bf16 %v5110_v24, %v5108_v13  ;;  %v5111_v24 = vld [vmem:[%s8866_s7 + $0x340] sm:$0xff] }
 0x371   : > { %9044 = vst [vmem:[#allocation62_spill] sm:$0xff] %v7833_v33 }
 0x372   : > { %9046 = vst [vmem:[#allocation64_spill] sm:$0xff] %v7857_v7 }
 0x373   : > { %5092 = vmatpush1.msk.msra.mxu1 %vm1177_vm4, %v7827_v25 }
 0x374   : > { %5093 = vmatmul.mubr.msk.f32.vlgmr.msra.gmra.mrb[24].mxu1 %vm1722_vm9, %v7518_v11  ;;  %5831 = vmatprep.subr.bf16.mxu1 %v7829_v37  ;;  %v5105_v11 = vld [vmem:[%s8866_s7 + $0x310] sm:$0xff] }
 0x375   : > { %5833 = vmatpush1.bf16.msra.mxu1 %v7831_v2  ;;  %2120 = vmatprep.mubr.f32.mxu1 %v9014_v43  ;;  %v7875_v48 = vpack.c.bf16 %v5105_v11, %v5103_v38  ;;  %v5109_v2 = vld [vmem:[%s8866_s7 + $0x330] sm:$0xff]  ;;  %v5114_v38 = vld [vmem:[%s8866_s7 + $0x358] sm:$0xff] }
 0x376   : > { %5835 = vmatprep.subr.bf16.mxu1 %v7833_v33  ;;  %v5107_v33 = vld [vmem:[%s8866_s7 + $0x320] sm:$0xff] }
 0x377   : > { %v7894_v11 = vpack.c.bf16 %v5109_v2, %v5107_v33  ;;  %v7912_v33 = vld [vmem:[%s8866_s7 + $0x368] sm:$0xf]  ;;  %v7920_v2 = vld [vmem:[%s8866_s7 + $0x360] sm:$0xf] }
 0x378   : > { %5094 = vmatmul.mubr.msk.f32.gmra.mrb[26].mxu1 %vm1722_vm9, %v9047_v52  ;;  %v5112_v52 = vld [vmem:[%s8866_s7 + $0x348] sm:$0xff]  ;;  %9048 = vst [vmem:[#allocation65_spill] sm:$0xff] %v7912_v33  ;;  %9049 = vst [vmem:[#allocation66_spill] sm:$0xff] %v7920_v2 }
 0x379   : > { %5837 = vmatpush1.bf16.msra.mxu1 %v7854_v27  ;;  %2231 = vmatprep.mubr.f32.mxu1 %v9014_v43  ;;  %v7897_v13 = vpack.c.bf16 %v5114_v38, %v5112_v52 }
 0x37a   : > { %5839 = vmatprep.subr.bf16.mxu1 %v7857_v7  ;;  %v5113_v7 = vld [vmem:[%s8866_s7 + $0x350] sm:$0xff] }
 0x37b   : > { %v7906_v27 = vpack.c.bf16 %v5113_v7, %v5111_v24  ;;  %v9050_v7 = vrot.slane %v7471_v4, 4  ;;  %v673_v4 = vld [vmem:[%s8869_s10 + $0x8] sm:$0xff] }
 0x37d   : > { %5841 = vmatpush1.bf16.msra.mxu1 %v7875_v48 }
 0x37e   : > { %5843 = vmatprep.subr.bf16.mxu1 %v7879_v54 }
 0x381   : > { %5845 = vmatpush1.bf16.msra.mxu1 %v7894_v11 }
 0x382   : > { %5847 = vmatprep.subr.bf16.mxu1 %v7897_v13 }
 0x385   : > { %5849 = vmatpush1.bf16.msra.mxu1 %v7906_v27 }
 0x386   : > { %5117 = vmatprep.subr.msk.mxu1 %vm1177_vm4, %v7912_v33 }
 0x389   : > { %5118 = vmatpush1.msk.msra.mxu1 %vm1177_vm4, %v7920_v2 }
 0x38a   : > { %5119 = vmatmul.mubr.msk.f32.vlgmr.msra.gmra.mrb[24].mxu1 %vm1722_vm9, %v7523_v44  ;;  %5958 = vmatprep.subr.bf16.mxu1 %v8993_v58  ;;  %v672_v44 = vld [vmem:[%s8869_s10] sm:$0xff] }
 0x38b   : > { %2237 = vmatprep.mubr.f32.mxu1 %v9014_v43  ;;  %5960 = vmatpush1.bf16.msra.mxu1 %v6862_v53  ;;  %v670_v53 = vld [vmem:[%s8868_s9 + $0x90] sm:$0xff] }
 0x38c   : > { %5961 = vmatprep.subr.bf16.mxu1 %v8993_v58 }
 0x38e   : > { %5120 = vmatmul.mubr.msk.f32.gmra.mrb[26].mxu1 %vm1722_vm9, %v9050_v7 }
 0x38f   : > { %5963 = vmatpush1.bf16.msra.mxu1 %v6906_v6  ;;  %v671_v6 = vld [vmem:[%s8868_s9 + $0x98] sm:$0xff] }
 0x390   : > { %5964 = vmatprep.subr.bf16.mxu1 %v8993_v58 }
 0x393   : > { %5966 = vmatpush1.bf16.msra.mxu1 %v6931_v23  ;;  %v7959_v23 = vpack.c.bf16 %v671_v6, %v670_v53 }
 0x394   : > { %5967 = vmatprep.subr.bf16.mxu1 %v8993_v58 }
 0x395   : > { %5879 = vmatpush1.bf16.msra.mxu0 %v7959_v23 }
 0x396   : > { %5880 = vmatprep.subr.bf16.mxu0 %v8993_v58 }
 0x397   : > { %5969 = vmatpush1.bf16.msra.mxu1 %v6948_v28  ;;  %v695_v28 = vld [vmem:[%s8867_s8] sm:$0x3] }
 0x398   : > { %5970 = vmatprep.subr.bf16.mxu1 %v8993_v58 }
 0x39b   : > { %5972 = vmatpush1.bf16.msra.mxu1 %v6972_v42  ;;  %v9051_v42 = vsub.s32 0, %v7081_v47 }
 0x39c   : > { %5973 = vmatprep.subr.bf16.mxu1 %v8993_v58 }
 0x39f   : > { %5975 = vmatpush1.bf16.msra.mxu1 %v6999_v56  ;;  %v7968_v56 = vrot.slane %v695_v28, %v9051_v42  ;;  %v675_v42 = vld [vmem:[%s8869_s10 + $0x18] sm:$0xff] }
 0x3a0   : > { %5976 = vmatprep.subr.bf16.mxu1 %v8993_v58 }
 0x3a1   : > { %9052 = vst [vmem:[#allocation67_spill] sm:$0xff] %v7968_v56 }
 0x3a3   : > { %5978 = vmatpush1.bf16.msra.mxu1 %v7017_v62  ;;  %v9053_v62 = vsub.s32 1, %v7081_v47  ;;  %v7984_v47 = vpack.c.bf16 %v673_v4, %v672_v44  ;;  %v676_v44 = vld [vmem:[%s8869_s10 + $0x20] sm:$0xff]  ;;  %v677_v4 = vld [vmem:[%s8869_s10 + $0x28] sm:$0xff] }
 0x3a4   : > { %5979 = vmatprep.subr.bf16.mxu1 %v8993_v58 }
 0x3a5   : > { %9055 = vst [vmem:[#allocation69_spill] sm:$0xff] %v7984_v47 }
 0x3a7   : > { %5981 = vmatpush1.bf16.msra.mxu1 %v7031_v5  ;;  %v7972_v5 = vrot.slane %v695_v28, %v9053_v62  ;;  %v674_v28 = vld [vmem:[%s8869_s10 + $0x10] sm:$0xff] }
 0x3a8   : > { %5982 = vmatprep.subr.bf16.mxu1 %v8993_v58 }
 0x3a9   : > { %9054 = vst [vmem:[#allocation68_spill] sm:$0xff] %v7972_v5 }
 0x3ab   : > { %5984 = vmatpush1.bf16.msra.mxu1 %v7060_v17 }
 0x3ac   : > { %5985 = vmatprep.subr.bf16.mxu1 %v8993_v58 }
 0x3af   : > { %5987 = vmatpush1.bf16.msra.mxu1 %v7070_v26 }
 0x3b0   : > { %3191 = vmatprep.subr.mxu1 %v9014_v43 }
 0x3b3   : > { %3192 = vmatpush1.msra.mxu1 %v7077_v29 }
 0x3b4   : > { %5988 = vmatprep.subr.bf16.mxu1 %v8993_v58 }
 0x45d   : > { %v2233_v17 = vpop.f32.mrb[24].mxu1 }
 0x45e   : > { %v7975_v26 = vadd.f32 %v7968_v56, %v2233_v17  ;;  %v2235_v29 = vpop.f32.mrb[25].mxu1 }
 0x45f   : > { %v2260_v52 = vadd.f32 %v7972_v5, %v2235_v29 }
 0x460   : > { %v2263_v7 = vmax.f32 %v7975_v26, 0.0  ;;  %v7997_v26 = vpack.c.bf16 %v675_v42, %v674_v28  ;;  %v681_v28 = vld [vmem:[%s8869_s10 + $0x48] sm:$0xff] }
 0x461   : > { %v2264_v38 = vmax.f32 %v2260_v52, 0.0  ;;  %v2239_v24 = vpop.f32.mrb[26].mxu1  ;;  %v8009_v52 = vpack.c.bf16 %v677_v4, %v676_v44  ;;  %v683_v44 = vld [vmem:[%s8869_s10 + $0x58] sm:$0xff] }
 0x462   : > { %v2261_v53 = vadd.f32 %v7968_v56, %v2239_v24  ;;  %v2241_v6 = vpop.f32.mrb[27].mxu1  ;;  %9056 = vst [vmem:[#allocation70_spill] sm:$0xff] %v7997_v26  ;;  %v678_v24 = vld [vmem:[%s8869_s10 + $0x30] sm:$0xff] }
 0x463   : > { %v2262_v62 = vadd.f32 %v7972_v5, %v2241_v6  ;;  %5121 = vmatprep.mubr.msk.f32.mxu0 %vm729_vm0, %v2264_v38  ;;  %9057 = vst [vmem:[#allocation71_spill] sm:$0xff] %v8009_v52 }
 0x464   : > { %2338 = vmatmul.mubr.f32.vlgmr.msra.gmra.mrb[12].mxu0 %v2263_v7  ;;  %v2265_v29 = vmax.f32 %v2261_v53, 0.0  ;;  %v679_v53 = vld [vmem:[%s8869_s10 + $0x38] sm:$0xff] }
 0x465   : > { %v2266_v17 = vmax.f32 %v2262_v62, 0.0  ;;  %5882 = vmatpush1.bf16.msra.mxu0 %v7984_v47  ;;  %v8019_v6 = vpack.c.bf16 %v679_v53, %v678_v24  ;;  %v682_v62 = vld [vmem:[%s8869_s10 + $0x50] sm:$0xff]  ;;  %v684_v24 = vld [vmem:[%s8869_s10 + $0x60] sm:$0xff]  ;;  %v685_v53 = vld [vmem:[%s8869_s10 + $0x68] sm:$0xff] }
 0x466   : > { %5883 = vmatprep.subr.bf16.mxu0 %v8993_v58  ;;  %v8039_v4 = vpack.c.bf16 %v683_v44, %v682_v62  ;;  %v687_v62 = vld [vmem:[%s8869_s10 + $0x78] sm:$0xff] }
 0x467   : > { %5122 = vmatprep.mubr.msk.f32.mxu0 %vm729_vm0, %v2266_v17  ;;  %9058 = vst [vmem:[#allocation72_spill] sm:$0xff] %v8019_v6 }
 0x468   : > { %2343 = vmatmul.mubr.f32.gmra.mrb[14].mxu0 %v2265_v29  ;;  %9060 = vst [vmem:[#allocation74_spill] sm:$0xff] %v8039_v4 }
 0x469   : > { %5885 = vmatpush1.bf16.msra.mxu0 %v7997_v26  ;;  %5123 = vmatprep.mubr.msk.f32.mxu0 %vm729_vm0, %v2264_v38  ;;  %v680_v38 = vld [vmem:[%s8869_s10 + $0x40] sm:$0xff] }
 0x46a   : > { %5886 = vmatprep.subr.bf16.mxu0 %v8993_v58  ;;  %v8029_v42 = vpack.c.bf16 %v681_v28, %v680_v38  ;;  %v8049_v38 = vpack.c.bf16 %v685_v53, %v684_v24  ;;  %v686_v28 = vld [vmem:[%s8869_s10 + $0x70] sm:$0xff]  ;;  %v688_v24 = vld [vmem:[%s8869_s10 + $0x80] sm:$0xff]  ;;  %v689_v53 = vld [vmem:[%s8869_s10 + $0x88] sm:$0xff] }
 0x46b   : > { %v8059_v44 = vpack.c.bf16 %v687_v62, %v686_v28  ;;  %v690_v28 = vld [vmem:[%s8869_s10 + $0x90] sm:$0xff]  ;;  %v691_v62 = vld [vmem:[%s8869_s10 + $0x98] sm:$0xff] }
 0x46c   : > { %9059 = vst [vmem:[#allocation73_spill] sm:$0xff] %v8029_v42  ;;  %9061 = vst [vmem:[#allocation75_spill] sm:$0xff] %v8049_v38 }
 0x46d   : > { %5888 = vmatpush1.bf16.msra.mxu0 %v8009_v52  ;;  %9062 = vst [vmem:[#allocation76_spill] sm:$0xff] %v8059_v44 }
 0x46e   : > { %5889 = vmatprep.subr.bf16.mxu0 %v8993_v58 }
 0x471   : > { %5891 = vmatpush1.bf16.msra.mxu0 %v8019_v6  ;;  %v8106_v6 = vld [vmem:[%s6758_s23 + $0x38] sm:$0xff] }
 0x472   : > { %5892 = vmatprep.subr.bf16.mxu0 %v8993_v58  ;;  %v3016_v26 = vrot.slane %v8106_v6, 4 }
 0x475   : > { %5894 = vmatpush1.bf16.msra.mxu0 %v8029_v42 }
 0x476   : > { %5895 = vmatprep.subr.bf16.mxu0 %v8993_v58 }
 0x479   : > { %5897 = vmatpush1.bf16.msra.mxu0 %v8039_v4  ;;  %v8069_v4 = vpack.c.bf16 %v689_v53, %v688_v24  ;;  %v8088_v24 = vld [vmem:[%s6758_s23 + $0x20] sm:$0xff]  ;;  %v8091_v53 = vld [vmem:[%s6758_s23 + $0x28] sm:$0xff] }
 0x47a   : > { %5898 = vmatprep.subr.bf16.mxu0 %v8993_v58 }
 0x47b   : > { %9063 = vst [vmem:[#allocation77_spill] sm:$0xff] %v8069_v4 }
 0x47d   : > { %5900 = vmatpush1.bf16.msra.mxu0 %v8049_v38  ;;  %v8079_v38 = vpack.c.bf16 %v691_v62, %v690_v28  ;;  %v3011_v28 = vrot.slane %v8088_v24, 4  ;;  %v3012_v62 = vrot.slane %v8091_v53, 4 }
 0x47e   : > { %5901 = vmatprep.subr.bf16.mxu0 %v8993_v58 }
 0x47f   : > { %9064 = vst [vmem:[#allocation78_spill] sm:$0xff] %v8079_v38 }
 0x481   : > { %5903 = vmatpush1.bf16.msra.mxu0 %v8059_v44 }
 0x482   : > { %5904 = vmatprep.subr.bf16.mxu0 %v8993_v58 }
 0x485   : > { %5906 = vmatpush1.bf16.msra.mxu0 %v8069_v4  ;;  %v8099_v4 = vld [vmem:[%s6758_s23 + $0x30] sm:$0xff]  ;;  %s6486_s23 = scalar_lea.vmem %s8819_s27, 32 }
 0x486   : > { %5907 = vmatprep.subr.bf16.mxu0 %v8993_v58  ;;  %p6487_p11 = scmp.ne.s32.totalorder %s8819_s27, %s6486_s23  ;;  %p6494_p1 = scmp.lt.s32.totalorder %s6492_s26, %s6486_s23 }
 0x488   : > { %p6488_p12 = pnand %p6487_p11, %p6693_p5  ;;  %p6495_p2 = por %p6494_p1, %p6493_p0 }
 0x489   : > { %5909 = vmatpush1.bf16.msra.mxu0 %v8079_v38  ;;  %v8096_v38 = vsel %vm1177_vm4, %v3011_v28, %v3012_v62 }
 0x48a   : > { %5910 = vmatprep.subr.bf16.mxu0 %v8993_v58  ;;  %p6489_p13 = pneg %p6488_p12 }
 0x48c   : > { %2413 = vmatmul.mubr.f32.vlgmr.msra.gmra.mrb[16].mxu0 %v2263_v7  ;;  %p6496_p3 = pnand %p6495_p2, %p6489_p13 }
 0x48d   : > { %5124 = vmatprep.mubr.msk.f32.mxu0 %vm729_vm0, %v2266_v17 }
 0x490   : > { %2418 = vmatmul.mubr.f32.gmra.mrb[18].mxu0 %v2265_v29  ;;  %v3014_v29 = vrot.slane %v8099_v4, 4 }
 0x491   : > { %5399 = vmatprep.mubr.msk.f32.mxu0 %vm6553_vm10, %v9014_v43 }
 0x492   : > { %v8103_v44 = vsel %vm1177_vm4, %v3012_v62, %v3014_v29  ;;  %v8112_v28 = vsel %vm1177_vm4, %v3014_v29, %v3016_v26  ;;  %v8124_v29 = vld [vmem:[%s8870_s11] sm:$0x1f] }
 0x537   : > { %v2339_v7 = vpop.f32.mrb[12].mxu0 }
 0x538   : > { %v2341_v17 = vpop.f32.mrb[13].mxu0 }
 0x53b   : > { %v2344_v42 = vpop.f32.mrb[14].mxu0 }
 0x53c   : > { %v2346_v52 = vpop.f32.mrb[15].mxu0 }
 0x55f   : > { %v2414_v47 = vpop.f32.mrb[16].mxu0 }
 0x560   : > { %v2423_v5 = vmax.f32 %v2339_v7, %v2414_v47  ;;  %v2416_v56 = vpop.f32.mrb[17].mxu0  ;;  %v2589_v47 = vrot.slane %v8099_v4, 1 }
 0x561   : > { %v2587_v56 = vrot.slane %v8091_v53, 1 }
 0x563   : > { %v2419_v17 = vpop.f32.mrb[18].mxu0 }
 0x564   : > { %v2424_v2 = vmax.f32 %v2344_v42, %v2419_v17  ;;  %v2421_v33 = vpop.f32.mrb[19].mxu0 }
 0x565   : > { %v8136_v33 = vld [vmem:[%s8871_s12] sm:$0x1f] }
 0x566   : > { %v5911_v52 = vpack.c.bf16 %v2424_v2, %v2423_v5  ;;  %v2586_v2 = vrot.slane %v8088_v24, 1 }
 0x568   : > { %5913 = vmatpush3.bf16.msk.msra.mxu0 %vm8115_vm12, %v5911_v52  ;;  %v2588_v5 = vsel %vm721_vm1, %v2586_v2, %v2587_v56 }
 0x569   : > { %5914 = vmatprep.subr.bf16.mxu0 %v8993_v58 }
 0x56b   : > { %5400 = vmatmul.mubr.msk.f32.vlgmr.msra.gmra.mrb[20].mxu0 %vm2425_vm13, %v8124_v29 }
 0x56c   : > { %5917 = vmatpush3.bf16.msk.msra.mxu0 %vm8115_vm12, %v5911_v52  ;;  %5406 = vmatprep.mubr.msk.f32.mxu0 %vm6553_vm10, %v9014_v43 }
 0x56d   : > { %5919 = vmatprep.subr.bf16.mxu0 %v6802_v31  ;;  %v2590_v31 = vsel %vm721_vm1, %v2587_v56, %v2589_v47 }
 0x56f   : > { %5407 = vmatmul.mubr.msk.f32.vlgmr.msra.gmra.mrb[22].mxu0 %vm2425_vm13, %v8136_v33 }
 0x570   : > { %5921 = vmatpush1.bf16.msra.mxu0 %v6816_v36  ;;  %2665 = vmatprep.mubr.f32.mxu0 %v9014_v43  ;;  %v2591_v36 = vrot.slane %v8106_v6, 1 }
 0x571   : > { %5923 = vmatprep.subr.bf16.mxu0 %v6828_v40 }
 0x572   : > { %v2592_v40 = vsel %vm721_vm1, %v2589_v47, %v2591_v36 }
 0x574   : > { %5925 = vmatpush1.bf16.msra.mxu0 %v6833_v41 }
 0x575   : > { %5927 = vmatprep.subr.bf16.mxu0 %v6713_v3  ;;  %v2787_v3 = vrot.slane %v8088_v24, 2 }
 0x577   : > { %5133 = vmatmul.mubr.msk.f32.vlgmr.msra.gmra.mrb[24].mxu0 %vm729_vm0, %v2588_v5 }
 0x578   : > { %2671 = vmatprep.mubr.f32.mxu0 %v9014_v43  ;;  %5929 = vmatpush1.bf16.msra.mxu0 %v6726_v8  ;;  %v2788_v8 = vrot.slane %v8091_v53, 2 }
 0x579   : > { %5931 = vmatprep.subr.bf16.mxu0 %v6728_v9 }
 0x57a   : > { %v2789_v9 = vsel %vm933_vm2, %v2787_v3, %v2788_v8 }
 0x57b   : > { %5134 = vmatmul.mubr.msk.f32.gmra.mrb[26].mxu0 %vm729_vm0, %v2590_v31 }
 0x57c   : > { %2677 = vmatprep.mubr.f32.mxu0 %v9014_v43  ;;  %5933 = vmatpush1.bf16.msra.mxu0 %v6744_v14  ;;  %v2790_v14 = vrot.slane %v8099_v4, 2 }
 0x57d   : > { %5935 = vmatprep.subr.bf16.mxu0 %v6747_v15 }
 0x57e   : > { %v2791_v15 = vsel %vm933_vm2, %v2788_v8, %v2790_v14 }
 0x57f   : > { %5135 = vmatmul.mubr.msk.f32.gmra.mrb[28].mxu0 %vm729_vm0, %v2592_v40 }
 0x580   : > { %2683 = vmatprep.mubr.f32.mxu0 %v9014_v43 }
 0x583   : > { %5136 = vmatmul.mubr.msk.f32.gmra.mrb[30].mxu0 %vm729_vm0, %v2591_v36 }
 0x584   : > { %2762 = vmatprep.mubr.f32.mxu0 %v9014_v43 }
 0x587   : > { %5137 = vmatmul.mubr.msk.f32.vlgmr.msra.gmra.mrb[24].mxu0 %vm729_vm0, %v8088_v24 }
 0x588   : > { %2768 = vmatprep.mubr.f32.mxu0 %v9014_v43  ;;  %5937 = vmatpush1.bf16.msra.mxu0 %v6770_v21  ;;  %v2792_v21 = vrot.slane %v8106_v6, 2 }
 0x589   : > { %5939 = vmatprep.subr.bf16.mxu0 %v6773_v22 }
 0x58a   : > { %v2793_v22 = vsel %vm933_vm2, %v2790_v14, %v2792_v21 }
 0x58b   : > { %5138 = vmatmul.mubr.msk.f32.gmra.mrb[26].mxu0 %vm729_vm0, %v8091_v53 }
 0x58c   : > { %2774 = vmatprep.mubr.f32.mxu0 %v9014_v43  ;;  %5941 = vmatpush1.bf16.msra.mxu0 %v6800_v30  ;;  %v2899_v30 = vrot.slane %v8088_v24, 3 }
 0x58d   : > { %5943 = vmatprep.subr.bf16.mxu0 %v6814_v35  ;;  %v2900_v35 = vrot.slane %v8091_v53, 3 }
 0x58f   : > { %5139 = vmatmul.mubr.msk.f32.gmra.mrb[28].mxu0 %vm729_vm0, %v8099_v4  ;;  %v2901_v41 = vsel %vm1055_vm3, %v2899_v30, %v2900_v35  ;;  %v9076_v30 = vld [vmem:[#allocation21_spill] sm:$0xff] }
 0x590   : > { %2780 = vmatprep.mubr.f32.mxu0 %v9014_v43 }
 0x593   : > { %5140 = vmatmul.mubr.msk.f32.gmra.mrb[30].mxu0 %vm729_vm0, %v8106_v6 }
 0x594   : > { %2866 = vmatprep.mubr.f32.mxu0 %v9014_v43 }
 0x597   : > { %5141 = vmatmul.mubr.msk.f32.vlgmr.msra.gmra.mrb[24].mxu0 %vm729_vm0, %v2789_v9 }
 0x598   : > { %2872 = vmatprep.mubr.f32.mxu0 %v9014_v43  ;;  %5945 = vmatpush1.bf16.msra.mxu0 %v6891_v0  ;;  %v2902_v0 = vrot.slane %v8099_v4, 3 }
 0x599   : > { %5947 = vmatprep.subr.bf16.mxu0 %v6894_v1 }
 0x59a   : > { %v2903_v1 = vsel %vm1055_vm3, %v2900_v35, %v2902_v0  ;;  %v9077_v35 = vld [vmem:[#allocation22_spill] sm:$0xff] }
 0x59b   : > { %5142 = vmatmul.mubr.msk.f32.gmra.mrb[26].mxu0 %vm729_vm0, %v2791_v15 }
 0x59c   : > { %2878 = vmatprep.mubr.f32.mxu0 %v9014_v43  ;;  %5949 = vmatpush1.bf16.msra.mxu0 %v6925_v18  ;;  %v2904_v18 = vrot.slane %v8106_v6, 3 }
 0x59d   : > { %5951 = vmatprep.subr.bf16.mxu0 %v6928_v19 }
 0x59e   : > { %v2905_v19 = vsel %vm1055_vm3, %v2902_v0, %v2904_v18  ;;  %v6480_v0 = vld [vmem:[%s8866_s7 + $0x150] sm:$0xf] }
 0x59f   : > { %5143 = vmatmul.mubr.msk.f32.gmra.mrb[28].mxu0 %vm729_vm0, %v2793_v22 }
 0x5a0   : > { %2884 = vmatprep.mubr.f32.mxu0 %v9014_v43 }
 0x5a3   : > { %5144 = vmatmul.mubr.msk.f32.gmra.mrb[30].mxu0 %vm729_vm0, %v2792_v21 }
 0x5a4   : > { %2978 = vmatprep.mubr.f32.mxu0 %v9014_v43 }
 0x5a7   : > { %5145 = vmatmul.mubr.msk.f32.vlgmr.msra.gmra.mrb[24].mxu0 %vm729_vm0, %v2901_v41  ;;  %v6479_v41 = vld [vmem:[%s8866_s7 + $0x158] sm:$0xf] }
 0x5a8   : > { %2984 = vmatprep.mubr.f32.mxu0 %v9014_v43  ;;  %5953 = vmatpush1.bf16.msra.mxu0 %v6988_v49  ;;  %v6477_v49 = vld [vmem:[%s8864_s5] sm:$0xff] }
 0x5a9   : > { %5955 = vmatprep.subr.bf16.mxu0 %v6990_v50 }
 0x5ab   : > { %5146 = vmatmul.mubr.msk.f32.gmra.mrb[26].mxu0 %vm729_vm0, %v2903_v1  ;;  %v9078_v1 = vld [vmem:[#allocation23_spill] sm:$0xff] }
 0x5ac   : > { %2990 = vmatprep.mubr.f32.mxu0 %v9014_v43  ;;  %5957 = vmatpush1.bf16.msra.mxu0 %v7013_v61 }
 0x5af   : > { %5147 = vmatmul.mubr.msk.f32.gmra.mrb[28].mxu0 %vm729_vm0, %v2905_v19 }
 0x5b0   : > { %2996 = vmatprep.mubr.f32.mxu0 %v9014_v43 }
 0x5b3   : > { %5148 = vmatmul.mubr.msk.f32.gmra.mrb[30].mxu0 %vm729_vm0, %v2904_v18 }
 0x5b4   : > { %3090 = vmatprep.mubr.f32.mxu0 %v9014_v43 }
 0x5b7   : > { %5149 = vmatmul.mubr.msk.f32.vlgmr.msra.gmra.mrb[24].mxu0 %vm729_vm0, %v8096_v38 }
 0x5b8   : > { %3096 = vmatprep.mubr.f32.mxu0 %v9014_v43 }
 0x5bb   : > { %5150 = vmatmul.mubr.msk.f32.gmra.mrb[26].mxu0 %vm729_vm0, %v8103_v44 }
 0x5bc   : > { %3102 = vmatprep.mubr.f32.mxu0 %v9014_v43 }
 0x5bf   : > { %5151 = vmatmul.mubr.msk.f32.gmra.mrb[28].mxu0 %vm729_vm0, %v8112_v28 }
 0x5c0   : > { %3108 = vmatprep.mubr.f32.mxu0 %v9014_v43 }
 0x5c3   : > { %5152 = vmatmul.mubr.msk.f32.gmra.mrb[30].mxu0 %vm729_vm0, %v3016_v26 }
 0x5c4   : > { %5417 = vmatprep.mubr.msk.f32.mxu0 %vm1504_vm6, %v6477_v49 }
 0x63e   : > { %v2499_v50 = vpop.f32.mrb[20].mxu0 }
 0x63f   : > { %v5401_v61 = vpop.f32.mrb[21].mxu0 }
 0x642   : > { %v2572_v42 = vpop.f32.mrb[22].mxu0 }
 0x643   : > { %v8234_v4 = vmax.f32 %v2499_v50, %v2572_v42  ;;  %v5408_v38 = vpop.f32.mrb[23].mxu0 }
 0x68a   : > { %v3092_v44 = vpop.f32.mrb[24].mxu0 }
 0x68b   : > { %v3123_v24 = vadd.f32 %v3092_v44, %v7090_v57  ;;  %v3094_v53 = vpop.f32.mrb[25].mxu0 }
 0x68c   : > { %v3124_v6 = vadd.f32 %v3094_v53, %v7094_v59 }
 0x68d   : > { %v3131_v28 = vmax.f32 %v3123_v24, 0.0 }
 0x68e   : > { %v3132_v7 = vmax.f32 %v3124_v6, 0.0  ;;  %v3098_v26 = vpop.f32.mrb[26].mxu0 }
 0x68f   : > { %v3125_v17 = vadd.f32 %v3098_v26, %v7090_v57  ;;  %v3100_v52 = vpop.f32.mrb[27].mxu0 }
 0x690   : > { %v3126_v2 = vadd.f32 %v3100_v52, %v7094_v59  ;;  %5153 = vmatprep.mubr.msk.f32.mxu1 %vm1317_vm5, %v3132_v7 }
 0x691   : > { %3216 = vmatmul.mubr.f32.vlgmr.msra.gmra.mrb[28].mxu1 %v3131_v28  ;;  %v3133_v47 = vmax.f32 %v3125_v17, 0.0 }
 0x692   : > { %v3134_v56 = vmax.f32 %v3126_v2, 0.0  ;;  %5990 = vmatpush1.bf16.msra.mxu1 %v7106_v51  ;;  %v3104_v5 = vpop.f32.mrb[28].mxu0 }
 0x693   : > { %v3127_v31 = vadd.f32 %v3104_v5, %v7090_v57  ;;  %v3106_v36 = vpop.f32.mrb[29].mxu0  ;;  %5991 = vmatprep.subr.bf16.mxu1 %v8993_v58 }
 0x694   : > { %v3128_v40 = vadd.f32 %v3106_v36, %v7094_v59  ;;  %5154 = vmatprep.mubr.msk.f32.mxu1 %vm1317_vm5, %v3134_v56 }
 0x695   : > { %3221 = vmatmul.mubr.f32.gmra.mrb[30].mxu1 %v3133_v47  ;;  %v3135_v9 = vmax.f32 %v3127_v31, 0.0 }
 0x696   : > { %v3136_v3 = vmax.f32 %v3128_v40, 0.0  ;;  %5993 = vmatpush1.bf16.msra.mxu1 %v7126_v63  ;;  %v3110_v8 = vpop.f32.mrb[30].mxu0  ;;  %v9068_v63 = vld [vmem:[#allocation12_spill] sm:$0xff]  ;;  %v9105_v40 = vld [vmem:[#allocation49_spill] sm:$0xff] }
 0x697   : > { %v3129_v14 = vadd.f32 %v3110_v8, %v7090_v57  ;;  %v3112_v51 = vpop.f32.mrb[31].mxu0  ;;  %5994 = vmatprep.subr.bf16.mxu1 %v8993_v58  ;;  %v9067_v57 = vld [vmem:[#allocation11_spill] sm:$0xff] }
 0x698   : > { %v3130_v15 = vadd.f32 %v3112_v51, %v7094_v59  ;;  %5155 = vmatprep.mubr.msk.f32.mxu1 %vm1317_vm5, %v3136_v3  ;;  %v6478_v59 = vld [vmem:[%s8984_s4 + $0xa0] sm:$0xff]  ;;  %v9081_v51 = vld [vmem:[#allocation25_spill] sm:$0xff]  ;;  %s4867_s4 = scalar_lea.sflag [#allocation3], %s596_s0 }
 0x699   : > { %3226 = vmatmul.mubr.f32.gmra.mrb[32].mxu1 %v3135_v9  ;;  %v3137_v22 = vmax.f32 %v3129_v14, 0.0  ;;  %v6482_v8 = vld [vmem:[%s8865_s6] sm:$0xff]  ;;  %v9080_v14 = vld [vmem:[#allocation24_spill] sm:$0xff] }
 0x69a   : > { %v3138_v21 = vmax.f32 %v3130_v15, 0.0  ;;  %5996 = vmatpush1.bf16.msra.mxu1 %v7149_v32  ;;  %v9069_v32 = vld [vmem:[#allocation13_spill] sm:$0xff]  ;;  %v9082_v15 = vld [vmem:[#allocation26_spill] sm:$0xff] }
 0x69b   : > { %5997 = vmatprep.subr.bf16.mxu1 %v8993_v58 }
 0x69c   : > { %5156 = vmatprep.mubr.msk.f32.mxu1 %vm1317_vm5, %v3138_v21 }
 0x69d   : > { %3231 = vmatmul.mubr.f32.gmra.mrb[34].mxu1 %v3137_v22 }
 0x69e   : > { %5999 = vmatpush1.bf16.msra.mxu1 %v7163_v60  ;;  %5157 = vmatprep.mubr.msk.f32.mxu1 %vm1317_vm5, %v3132_v7  ;;  %v9070_v60 = vld [vmem:[#allocation14_spill] sm:$0xff] }
 0x69f   : > { %6000 = vmatprep.subr.bf16.mxu1 %v8993_v58 }
 0x6a2   : > { %6002 = vmatpush1.bf16.msra.mxu1 %v7175_v39  ;;  %v9071_v39 = vld [vmem:[#allocation15_spill] sm:$0xff] }
 0x6a3   : > { %6003 = vmatprep.subr.bf16.mxu1 %v8993_v58 }
 0x6a6   : > { %6005 = vmatpush1.bf16.msra.mxu1 %v7185_v20  ;;  %v9072_v20 = vld [vmem:[#allocation17_spill] sm:$0xff] }
 0x6a7   : > { %6006 = vmatprep.subr.bf16.mxu1 %v8993_v58 }
 0x6aa   : > { %6008 = vmatpush1.bf16.msra.mxu1 %v7195_v46  ;;  %v9073_v46 = vld [vmem:[#allocation18_spill] sm:$0xff] }
 0x6ab   : > { %6009 = vmatprep.subr.bf16.mxu1 %v8993_v58 }
 0x6ae   : > { %6011 = vmatpush1.bf16.msra.mxu1 %v7205_v45  ;;  %v9074_v45 = vld [vmem:[#allocation19_spill] sm:$0xff] }
 0x6af   : > { %6012 = vmatprep.subr.bf16.mxu1 %v8993_v58 }
 0x6b2   : > { %6014 = vmatpush1.bf16.msra.mxu1 %v7215_v12  ;;  %v9075_v12 = vld [vmem:[#allocation20_spill] sm:$0xff] }
 0x6b3   : > { %6015 = vmatprep.subr.bf16.mxu1 %v8993_v58 }
 0x6b6   : > { %6017 = vmatpush1.bf16.msra.mxu1 %v9067_v57  ;;  %v9085_v57 = vld [vmem:[#allocation29_spill] sm:$0xff] }
 0x6b7   : > { %3276 = vmatprep.subr.mxu1 %v9014_v43 }
 0x6ba   : > { %3277 = vmatpush1.msra.mxu1 %v6478_v59  ;;  %v9086_v59 = vld [vmem:[#allocation30_spill] sm:$0xff] }
 0x6bb   : > { %3301 = vmatmul.mubr.f32.vlgmr.msra.gmra.mrb[36].mxu1 %v3131_v28  ;;  %6039 = vmatprep.subr.bf16.mxu1 %v9068_v63  ;;  %v9087_v63 = vld [vmem:[#allocation31_spill] sm:$0xff] }
 0x6bc   : > { %5158 = vmatprep.mubr.msk.f32.mxu1 %vm1317_vm5, %v3134_v56  ;;  %6041 = vmatpush1.bf16.msra.mxu1 %v9069_v32 }
 0x6bd   : > { %6043 = vmatprep.subr.bf16.mxu1 %v9070_v60 }
 0x6bf   : > { %3306 = vmatmul.mubr.f32.gmra.mrb[38].mxu1 %v3133_v47 }
 0x6c0   : > { %5159 = vmatprep.mubr.msk.f32.mxu1 %vm1317_vm5, %v3136_v3  ;;  %6045 = vmatpush1.bf16.msra.mxu1 %v9071_v39  ;;  %v6481_v3 = vld [vmem:[%s8864_s5 + $0x8] sm:$0x3f] }
 0x6c1   : > { %6047 = vmatprep.subr.bf16.mxu1 %v9072_v20 }
 0x6c3   : > { %3311 = vmatmul.mubr.f32.gmra.mrb[40].mxu1 %v3135_v9  ;;  %v6483_v9 = vld [vmem:[%s8865_s6 + $0x8] sm:$0x3f] }
 0x6c4   : > { %5160 = vmatprep.mubr.msk.f32.mxu1 %vm1317_vm5, %v3138_v21  ;;  %6049 = vmatpush1.bf16.msra.mxu1 %v9073_v46  ;;  %v9083_v21 = vld [vmem:[#allocation27_spill] sm:$0xff] }
 0x6c5   : > { %6051 = vmatprep.subr.bf16.mxu1 %v9074_v45 }
 0x6c7   : > { %3316 = vmatmul.mubr.f32.gmra.mrb[42].mxu1 %v3137_v22  ;;  %v9084_v22 = vld [vmem:[#allocation28_spill] sm:$0xff] }
 0x6c8   : > { %6053 = vmatpush1.bf16.msra.mxu1 %v9075_v12  ;;  %3553 = vmatprep.mubr.f32.mxu1 %v9014_v43 }
 0x6c9   : > { %6055 = vmatprep.subr.bf16.mxu1 %v9076_v30 }
 0x6cc   : > { %6057 = vmatpush1.bf16.msra.mxu1 %v9077_v35 }
 0x6cd   : > { %5167 = vmatprep.subr.msk.mxu1 %vm1177_vm4, %v6479_v41 }
 0x6d0   : > { %5168 = vmatpush1.msk.msra.mxu1 %vm1177_vm4, %v6480_v0 }
 0x6d1   : > { %6059 = vmatprep.subr.bf16.mxu1 %v9078_v1 }
 0x764   : > { %v3217_v18 = vpop.f32.mrb[28].mxu1 }
 0x765   : > { %v3219_v19 = vpop.f32.mrb[29].mxu1 }
 0x768   : > { %v3222_v49 = vpop.f32.mrb[30].mxu1 }
 0x769   : > { %v3224_v50 = vpop.f32.mrb[31].mxu1 }
 0x76c   : > { %v3227_v61 = vpop.f32.mrb[32].mxu1 }
 0x76d   : > { %v3229_v42 = vpop.f32.mrb[33].mxu1 }
 0x76e   : > { %v9089_v42 = vld [vmem:[#allocation33_spill] sm:$0xff] }
 0x770   : > { %v3232_v38 = vpop.f32.mrb[34].mxu1 }
 0x771   : > { %v3234_v44 = vpop.f32.mrb[35].mxu1 }
 0x772   : > { %v9091_v44 = vld [vmem:[#allocation35_spill] sm:$0xff] }
 0x78e   : > { %v3302_v24 = vpop.f32.mrb[36].mxu1 }
 0x78f   : > { %v3321_v53 = vmax.f32 %v3217_v18, %v3302_v24  ;;  %v3304_v6 = vpop.f32.mrb[37].mxu1  ;;  %v9092_v24 = vld [vmem:[#allocation36_spill] sm:$0xff] }
 0x790   : > { %v9094_v6 = vld [vmem:[#allocation38_spill] sm:$0xff] }
 0x792   : > { %v3307_v7 = vpop.f32.mrb[38].mxu1 }
 0x793   : > { %v3322_v26 = vmax.f32 %v3222_v49, %v3307_v7  ;;  %v3309_v28 = vpop.f32.mrb[39].mxu1  ;;  %v9095_v7 = vld [vmem:[#allocation39_spill] sm:$0xff] }
 0x794   : > { %v6484_v28 = vld [vmem:[%s8866_s7 + $0xa8] sm:$0xf] }
 0x795   : > { %v6018_v17 = vpack.c.bf16 %v3322_v26, %v3321_v53  ;;  %v9093_v53 = vld [vmem:[#allocation37_spill] sm:$0xff]  ;;  %v9096_v26 = vld [vmem:[#allocation40_spill] sm:$0xff] }
 0x796   : > { %v3312_v52 = vpop.f32.mrb[40].mxu1 }
 0x797   : > { %v3323_v2 = vmax.f32 %v3227_v61, %v3312_v52  ;;  %v3314_v56 = vpop.f32.mrb[41].mxu1  ;;  %6019 = vmatprep.subr.bf16.mxu0 %v6018_v17  ;;  %v9088_v61 = vld [vmem:[#allocation32_spill] sm:$0xff]  ;;  %v9097_v52 = vld [vmem:[#allocation41_spill] sm:$0xff] }
 0x798   : > { %6021 = vmatpush3.bf16.msra.mxu0 %v6018_v17  ;;  %v9099_v56 = vld [vmem:[#allocation43_spill] sm:$0xff] }
 0x79a   : > { %v3317_v5 = vpop.f32.mrb[42].mxu1 }
 0x79b   : > { %v3324_v47 = vmax.f32 %v3232_v38, %v3317_v5  ;;  %v3319_v31 = vpop.f32.mrb[43].mxu1  ;;  %v9090_v38 = vld [vmem:[#allocation34_spill] sm:$0xff]  ;;  %v9100_v5 = vld [vmem:[#allocation44_spill] sm:$0xff] }
 0x79c   : > { %v9102_v31 = vld [vmem:[#allocation46_spill] sm:$0xff] }
 0x79d   : > { %v6022_v36 = vpack.c.bf16 %v3324_v47, %v3323_v2  ;;  %v9098_v2 = vld [vmem:[#allocation42_spill] sm:$0xff]  ;;  %v9101_v47 = vld [vmem:[#allocation45_spill] sm:$0xff] }
 0x79f   : > { %6024 = vmatprep.subr.msk.bf16.mxu0 %vm7285_vm8, %v6022_v36 }
 0x7a0   : > { %6027 = vmatpush3.bf16.msk.msra.mxu0 %vm7285_vm8, %v6022_v36 }
 0x7a1   : > { %6029 = vmatprep.subr.bf16.mxu0 %v6018_v17 }
 0x7a3   : > { %5418 = vmatmul.mubr.msk.f32.vlgmr.msra.gmra.mrb[32].mxu0 %vm1504_vm6, %v6481_v3  ;;  %v9106_v3 = vld [vmem:[#allocation50_spill] sm:$0xff] }
 0x7a4   : > { %6031 = vmatpush3.bf16.msra.mxu0 %v6018_v17  ;;  %5428 = vmatprep.mubr.msk.f32.mxu0 %vm1504_vm6, %v6482_v8  ;;  %v6485_v17 = vld [vmem:[%s8866_s7 + $0xa0] sm:$0xf]  ;;  %v9107_v8 = vld [vmem:[#allocation51_spill] sm:$0xff] }
 0x7a5   : > { %6034 = vmatprep.subr.msk.bf16.mxu0 %vm7285_vm8, %v6022_v36 }
 0x7a8   : > { %6037 = vmatpush3.bf16.msk.msra.mxu0 %vm7285_vm8, %v6022_v36  ;;  %v9104_v36 = vld [vmem:[#allocation48_spill] sm:$0xff] }
 0x7a9   : > { %6138 = vmatprep.subr.bf16.mxu0 %v8993_v58 }
 0x7ab   : > { %5429 = vmatmul.mubr.msk.f32.vlgmr.msra.gmra.mrb[34].mxu0 %vm1504_vm6, %v6483_v9  ;;  %v9108_v9 = vld [vmem:[#allocation52_spill] sm:$0xff] }
 0x7ac   : > { %6140 = vmatpush1.bf16.msra.mxu0 %v9080_v14  ;;  %v9109_v14 = vld [vmem:[#allocation53_spill] sm:$0xff] }
 0x7ad   : > { %6141 = vmatprep.subr.bf16.mxu0 %v8993_v58 }
 0x7b0   : > { %6143 = vmatpush1.bf16.msra.mxu0 %v9081_v51  ;;  %v9110_v51 = vld [vmem:[#allocation54_spill] sm:$0xff] }
 0x7b1   : > { %6144 = vmatprep.subr.bf16.mxu0 %v8993_v58 }
 0x7b4   : > { %6146 = vmatpush1.bf16.msra.mxu0 %v9082_v15  ;;  %v9112_v15 = vld [vmem:[#allocation56_spill] sm:$0xff] }
 0x7b5   : > { %6147 = vmatprep.subr.bf16.mxu0 %v8993_v58 }
 0x7b8   : > { %6149 = vmatpush1.bf16.msra.mxu0 %v9083_v21  ;;  %v9113_v21 = vld [vmem:[#allocation57_spill] sm:$0xff] }
 0x7b9   : > { %6150 = vmatprep.subr.bf16.mxu0 %v8993_v58 }
 0x7bc   : > { %6152 = vmatpush1.bf16.msra.mxu0 %v9084_v22  ;;  %v9114_v22 = vld [vmem:[#allocation58_spill] sm:$0xff] }
 0x7bd   : > { %6153 = vmatprep.subr.bf16.mxu0 %v8993_v58 }
 0x7c0   : > { %6155 = vmatpush1.bf16.msra.mxu0 %v9085_v57  ;;  %v9115_v57 = vld [vmem:[#allocation59_spill] sm:$0xff] }
 0x7c1   : > { %6156 = vmatprep.subr.bf16.mxu0 %v8993_v58 }
 0x7c4   : > { %6158 = vmatpush1.bf16.msra.mxu0 %v9086_v59  ;;  %v9116_v59 = vld [vmem:[#allocation60_spill] sm:$0xff] }
 0x7c5   : > { %6159 = vmatprep.subr.bf16.mxu0 %v8993_v58 }
 0x7c8   : > { %6161 = vmatpush1.bf16.msra.mxu0 %v9087_v63  ;;  %v9117_v63 = vld [vmem:[#allocation61_spill] sm:$0xff] }
 0x7c9   : > { %6162 = vmatprep.subr.bf16.mxu0 %v8993_v58 }
 0x7cc   : > { %6164 = vmatpush1.bf16.msra.mxu0 %v7484_v55 }
 0x7cd   : > { %6165 = vmatprep.subr.bf16.mxu0 %v8993_v58 }
 0x7d0   : > { %6167 = vmatpush1.bf16.msra.mxu0 %v7959_v23 }
 0x7d1   : > { %6168 = vmatprep.subr.bf16.mxu0 %v8993_v58 }
 0x876   : > { %v5419_v32 = vpop.f32.mrb[32].mxu0 }
 0x877   : > { %v3394_v60 = vpop.f32.mrb[33].mxu0 }
 0x87e   : > { %v5430_v39 = vpop.f32.mrb[34].mxu0 }
 0x87f   : > { %v8336_v20 = vmax.f32 %v5419_v32, %v5430_v39  ;;  %v3469_v46 = vpop.f32.mrb[35].mxu0  ;;  %v9118_v32 = vld [vmem:[#allocation62_spill] sm:$0xff] }
 0x880   : > { %v3478_v45 = vmax.f32 %v3394_v60, %v3469_v46  ;;  %v9119_v60 = vld [vmem:[#allocation63_spill] sm:$0xff] }
 0x881   : > { %v3483_v12 = vrot.slane %v8336_v20, 1  ;;  %v3648_v30 = vrot.slane %v8336_v20, 2  ;;  %v3736_v35 = vrot.slane %v8336_v20, 3  ;;  %v3824_v55 = vrot.slane %v8336_v20, 4 }
 0x882   : > { %v3482_v41 = vrot.slane %v3478_v45, 1  ;;  %v3647_v0 = vrot.slane %v3478_v45, 2  ;;  %v3735_v23 = vrot.slane %v3478_v45, 3  ;;  %v3823_v1 = vrot.slane %v3478_v45, 4 }
 0x884   : > { %v3484_v18 = vsel %vm721_vm1, %v3482_v41, %v3483_v12  ;;  %v3649_v19 = vsel %vm933_vm2, %v3647_v0, %v3648_v30  ;;  %v3737_v49 = vsel %vm1055_vm3, %v3735_v23, %v3736_v35  ;;  %v8350_v50 = vsel %vm1177_vm4, %v3823_v1, %v3824_v55  ;;  %v9126_v23 = vld [vmem:[#allocation70_spill] sm:$0xff]  ;;  %v9127_v1 = vld [vmem:[#allocation71_spill] sm:$0xff] }
 0x885   : > { %5169 = vmatmul.mubr.msk.f32.vlgmr.msra.gmra.mrb[44].mxu1 %vm1722_vm9, %v3484_v18  ;;  %v9128_v18 = vld [vmem:[#allocation72_spill] sm:$0xff] }
 0x886   : > { %6061 = vmatpush1.bf16.msra.mxu1 %v9088_v61  ;;  %3559 = vmatprep.mubr.f32.mxu1 %v9014_v43  ;;  %v9132_v61 = vld [vmem:[#allocation76_spill] sm:$0xff] }
 0x887   : > { %6063 = vmatprep.subr.bf16.mxu1 %v9089_v42  ;;  %v9133_v42 = vld [vmem:[#allocation77_spill] sm:$0xff] }
 0x889   : > { %5170 = vmatmul.mubr.msk.f32.gmra.mrb[46].mxu1 %vm1722_vm9, %v3483_v12 }
 0x88a   : > { %6065 = vmatpush1.bf16.msra.mxu1 %v9090_v38  ;;  %3634 = vmatprep.mubr.f32.mxu1 %v9014_v43  ;;  %v9134_v38 = vld [vmem:[#allocation78_spill] sm:$0xff] }
 0x88b   : > { %6067 = vmatprep.subr.bf16.mxu1 %v9091_v44 }
 0x88e   : > { %6069 = vmatpush1.bf16.msra.mxu1 %v9092_v24 }
 0x88f   : > { %6071 = vmatprep.subr.bf16.mxu1 %v9093_v53 }
 0x892   : > { %6073 = vmatpush1.bf16.msra.mxu1 %v9094_v6 }
 0x893   : > { %6075 = vmatprep.subr.bf16.mxu1 %v9095_v7 }
 0x896   : > { %6077 = vmatpush1.bf16.msra.mxu1 %v9096_v26 }
 0x897   : > { %5171 = vmatprep.subr.msk.mxu1 %vm1177_vm4, %v6484_v28 }
 0x89a   : > { %5172 = vmatpush1.msk.msra.mxu1 %vm1177_vm4, %v6485_v17 }
 0x89b   : > { %5173 = vmatmul.mubr.msk.f32.vlgmr.msra.gmra.mrb[44].mxu1 %vm1722_vm9, %v3478_v45  ;;  %6079 = vmatprep.subr.bf16.mxu1 %v7609_v10  ;;  %v9103_v10 = vld [vmem:[#allocation47_spill] sm:$0xff] }
 0x89c   : > { %6081 = vmatpush1.bf16.msra.mxu1 %v9097_v52  ;;  %3640 = vmatprep.mubr.f32.mxu1 %v9014_v43 }
 0x89d   : > { %6083 = vmatprep.subr.bf16.mxu1 %v9098_v2 }
 0x89f   : > { %5174 = vmatmul.mubr.msk.f32.gmra.mrb[46].mxu1 %vm1722_vm9, %v8336_v20 }
 0x8a0   : > { %6085 = vmatpush1.bf16.msra.mxu1 %v9099_v56  ;;  %3718 = vmatprep.mubr.f32.mxu1 %v9014_v43 }
 0x8a1   : > { %6087 = vmatprep.subr.bf16.mxu1 %v9100_v5  ;;  %v4227_v5 = vld [vmem:[%s8872_s13] sm:$0xff] }
 0x8a4   : > { %6089 = vmatpush1.bf16.msra.mxu1 %v9101_v47  ;;  %v4228_v47 = vld [vmem:[%s8872_s13 + $0x8] sm:$0xff] }
 0x8a5   : > { %6091 = vmatprep.subr.bf16.mxu1 %v9102_v31  ;;  %v6207_v31 = vpack.c.bf16 %v4228_v47, %v4227_v5  ;;  %v5208_v5 = vld [vmem:[%s8872_s13 + $0xa0] sm:$0xff]  ;;  %v5209_v47 = vld [vmem:[%s8872_s13 + $0xa8] sm:$0xff] }
 0x8a8   : > { %6093 = vmatpush1.bf16.msra.mxu1 %v9103_v10  ;;  %v4229_v10 = vld [vmem:[%s8872_s13 + $0x10] sm:$0xff] }
 0x8a9   : > { %6095 = vmatprep.subr.bf16.mxu1 %v9104_v36  ;;  %v4230_v36 = vld [vmem:[%s8872_s13 + $0x18] sm:$0xff] }
 0x8aa   : > { %v6210_v62 = vpack.c.bf16 %v4230_v36, %v4229_v10  ;;  %v6237_v10 = vpack.c.bf16 %v5209_v47, %v5208_v5  ;;  %v5210_v36 = vld [vmem:[%s8872_s13 + $0xb0] sm:$0xff] }
 0x8ac   : > { %6097 = vmatpush1.bf16.msra.mxu1 %v9105_v40  ;;  %v4232_v40 = vld [vmem:[%s8872_s13 + $0x28] sm:$0xff] }
 0x8ad   : > { %5175 = vmatprep.subr.msk.mxu1 %vm1177_vm4, %v7690_v16  ;;  %v9111_v16 = vld [vmem:[#allocation55_spill] sm:$0xff] }
 0x8b0   : > { %5176 = vmatpush1.msk.msra.mxu1 %vm1177_vm4, %v9106_v3 }
 0x8b1   : > { %5177 = vmatmul.mubr.msk.f32.vlgmr.msra.gmra.mrb[44].mxu1 %vm1722_vm9, %v3649_v19  ;;  %6099 = vmatprep.subr.bf16.mxu1 %v9107_v8  ;;  %v9129_v19 = vld [vmem:[#allocation73_spill] sm:$0xff] }
 0x8b2   : > { %6101 = vmatpush1.bf16.msra.mxu1 %v9108_v9  ;;  %3724 = vmatprep.mubr.f32.mxu1 %v9014_v43  ;;  %v4234_v8 = vld [vmem:[%s8872_s13 + $0x38] sm:$0xff] }
 0x8b3   : > { %6103 = vmatprep.subr.bf16.mxu1 %v9109_v14  ;;  %v4235_v14 = vld [vmem:[%s8872_s13 + $0x40] sm:$0xff] }
 0x8b5   : > { %5178 = vmatmul.mubr.msk.f32.gmra.mrb[46].mxu1 %vm1722_vm9, %v3648_v30 }
 0x8b6   : > { %6105 = vmatpush1.bf16.msra.mxu1 %v9110_v51  ;;  %3806 = vmatprep.mubr.f32.mxu1 %v9014_v43  ;;  %v4236_v51 = vld [vmem:[%s8872_s13 + $0x48] sm:$0xff] }
 0x8b7   : > { %6107 = vmatprep.subr.bf16.mxu1 %v9111_v16  ;;  %v6219_v16 = vpack.c.bf16 %v4236_v51, %v4235_v14  ;;  %v5215_v14 = vld [vmem:[%s8872_s13 + $0xd8] sm:$0xff] }
 0x8ba   : > { %6109 = vmatpush1.bf16.msra.mxu1 %v9112_v15  ;;  %v4678_v15 = vld [vmem:[%s8874_s15] sm:$0xff] }
 0x8bb   : > { %6111 = vmatprep.subr.bf16.mxu1 %v9113_v21  ;;  %v4679_v21 = vld [vmem:[%s8874_s15 + $0x8] sm:$0xff] }
 0x8be   : > { %6113 = vmatpush1.bf16.msra.mxu1 %v9114_v22  ;;  %v4680_v22 = vld [vmem:[%s8874_s15 + $0x10] sm:$0xff] }
 0x8bf   : > { %6115 = vmatprep.subr.bf16.mxu1 %v9115_v57  ;;  %v6282_v57 = vpack.c.bf16 %v4679_v21, %v4678_v15  ;;  %v5217_v15 = vld [vmem:[%s8872_s13 + $0xe8] sm:$0xff] }
 0x8c2   : > { %6117 = vmatpush1.bf16.msra.mxu1 %v9116_v59  ;;  %v4681_v59 = vld [vmem:[%s8874_s15 + $0x18] sm:$0xff] }
 0x8c3   : > { %5179 = vmatprep.subr.msk.mxu1 %vm1177_vm4, %v7801_v34  ;;  %v9120_v34 = vld [vmem:[#allocation64_spill] sm:$0xff] }
 0x8c6   : > { %5180 = vmatpush1.msk.msra.mxu1 %vm1177_vm4, %v7827_v25  ;;  %v9122_v25 = vld [vmem:[#allocation66_spill] sm:$0xff] }
 0x8c7   : > { %5181 = vmatmul.mubr.msk.f32.vlgmr.msra.gmra.mrb[44].mxu1 %vm1722_vm9, %v3737_v49  ;;  %6119 = vmatprep.subr.bf16.mxu1 %v7829_v37  ;;  %v9121_v37 = vld [vmem:[#allocation65_spill] sm:$0xff]  ;;  %v9130_v49 = vld [vmem:[#allocation74_spill] sm:$0xff] }
 0x8c8   : > { %6121 = vmatpush1.bf16.msra.mxu1 %v9117_v63  ;;  %3812 = vmatprep.mubr.f32.mxu1 %v9014_v43  ;;  %v6285_v63 = vpack.c.bf16 %v4681_v59, %v4680_v22  ;;  %v5219_v22 = vld [vmem:[%s8872_s13 + $0xf0] sm:$0xff] }
 0x8c9   : > { %6123 = vmatprep.subr.bf16.mxu1 %v9118_v32  ;;  %v4682_v32 = vld [vmem:[%s8874_s15 + $0x20] sm:$0xff] }
 0x8cb   : > { %5182 = vmatmul.mubr.msk.f32.gmra.mrb[46].mxu1 %vm1722_vm9, %v3736_v35 }
 0x8cc   : > { %6125 = vmatpush1.bf16.msra.mxu1 %v9119_v60  ;;  %3894 = vmatprep.mubr.f32.mxu1 %v9014_v43  ;;  %v4683_v60 = vld [vmem:[%s8874_s15 + $0x28] sm:$0xff] }
 0x8cd   : > { %6127 = vmatprep.subr.bf16.mxu1 %v9120_v34  ;;  %v6288_v34 = vpack.c.bf16 %v4683_v60, %v4682_v32  ;;  %v5221_v60 = vld [vmem:[%s8872_s13 + $0x100] sm:$0xff] }
 0x8d0   : > { %6129 = vmatpush1.bf16.msra.mxu1 %v7875_v48  ;;  %v9123_v48 = vld [vmem:[#allocation67_spill] sm:$0xff] }
 0x8d1   : > { %6131 = vmatprep.subr.bf16.mxu1 %v7879_v54 }
 0x8d4   : > { %6133 = vmatpush1.bf16.msra.mxu1 %v7894_v11 }
 0x8d5   : > { %6135 = vmatprep.subr.bf16.mxu1 %v7897_v13  ;;  %v9124_v13 = vld [vmem:[#allocation68_spill] sm:$0xff] }
 0x8d8   : > { %6137 = vmatpush1.bf16.msra.mxu1 %v7906_v27 }
 0x8d9   : > { %5183 = vmatprep.subr.msk.mxu1 %vm1177_vm4, %v9121_v37  ;;  %v4684_v37 = vld [vmem:[%s8874_s15 + $0x30] sm:$0xff] }
 0x8dc   : > { %5184 = vmatpush1.msk.msra.mxu1 %vm1177_vm4, %v9122_v25  ;;  %v4685_v25 = vld [vmem:[%s8874_s15 + $0x38] sm:$0xff] }
 0x8dd   : > { %5185 = vmatmul.mubr.msk.f32.vlgmr.msra.gmra.mrb[44].mxu1 %vm1722_vm9, %v8350_v50  ;;  %6281 = vmatprep.subr.bf16.mxu1 %v8993_v58  ;;  %v9131_v50 = vld [vmem:[#allocation75_spill] sm:$0xff] }
 0x8de   : > { %3900 = vmatprep.mubr.f32.mxu1 %v9014_v43  ;;  %6283 = vmatpush3.bf16.msra.mxu1 %v6282_v57  ;;  %v5220_v57 = vld [vmem:[%s8872_s13 + $0xf8] sm:$0xff] }
 0x8df   : > { %6284 = vmatprep.subr.bf16.mxu1 %v8993_v58  ;;  %v6252_v32 = vpack.c.bf16 %v5220_v57, %v5219_v22  ;;  %v4785_v22 = vld [vmem:[%s8876_s17 + $0x68] sm:$0xff] }
 0x8e1   : > { %5186 = vmatmul.mubr.msk.f32.gmra.mrb[46].mxu1 %vm1722_vm9, %v3824_v55  ;;  %v9125_v55 = vld [vmem:[#allocation69_spill] sm:$0xff] }
 0x8e2   : > { %5592 = vmatprep.mubr.msk.f32.mxu1 %vm6553_vm10, %v9014_v43  ;;  %6286 = vmatpush3.bf16.msra.mxu1 %v6285_v63  ;;  %v4407_v63 = vrot.slane %v8234_v4, 2 }
 0x8e3   : > { %6287 = vmatprep.subr.bf16.mxu1 %v8993_v58 }
 0x8e6   : > { %6289 = vmatpush3.bf16.msra.mxu1 %v6288_v34  ;;  %v5222_v34 = vld [vmem:[%s8872_s13 + $0x108] sm:$0xff] }
 0x8e7   : > { %6290 = vmatprep.subr.bf16.mxu1 %v8993_v58 }
 0x9b0   : > { %v3896_v27 = vpop.f32.mrb[44].mxu1 }
 0x9b1   : > { %v3911_v54 = vadd.f32 %v3896_v27, %v9123_v48  ;;  %v3898_v11 = vpop.f32.mrb[45].mxu1  ;;  %v6291_v27 = vpack.c.bf16 %v4685_v25, %v4684_v37  ;;  %v6255_v25 = vpack.c.bf16 %v5222_v34, %v5221_v60  ;;  %v5241_v60 = vld [vmem:[%s8875_s16] ss:$0 sm:$0xff] }
 0x9b2   : > { %v3912_v39 = vadd.f32 %v3898_v11, %v9124_v13 }
 0x9b3   : > { %v3915_v12 = vmax.f32 %v3911_v54, 0.0  ;;  %v4687_v54 = vld [vmem:[%s8874_s15 + $0x48] sm:$0xff]  ;;  %6292 = vmatpush3.bf16.msra.mxu1 %v6291_v27  ;;  %v5223_v27 = vld [vmem:[%s8872_s13 + $0x110] sm:$0xff] }
 0x9b4   : > { %v3916_v46 = vmax.f32 %v3912_v39, 0.0  ;;  %v3902_v45 = vpop.f32.mrb[46].mxu1  ;;  %6293 = vmatprep.subr.bf16.mxu1 %v8993_v58  ;;  %v4689_v39 = vld [vmem:[%s8874_s15 + $0x58] sm:$0xff] }
 0x9b5   : > { %v3913_v30 = vadd.f32 %v3902_v45, %v9123_v48  ;;  %v3904_v35 = vpop.f32.mrb[47].mxu1  ;;  %v4686_v48 = vld [vmem:[%s8874_s15 + $0x40] sm:$0xff] }
 0x9b6   : > { %v3914_v41 = vadd.f32 %v3904_v35, %v9124_v13  ;;  %5187 = vmatprep.mubr.msk.f32.mxu0 %vm729_vm0, %v3916_v46  ;;  %v6294_v11 = vpack.c.bf16 %v4687_v54, %v4686_v48  ;;  %v4688_v13 = vld [vmem:[%s8874_s15 + $0x50] sm:$0xff]  ;;  %v4690_v45 = vld [vmem:[%s8874_s15 + $0x60] sm:$0xff]  ;;  %v5224_v48 = vld [vmem:[%s8872_s13 + $0x118] sm:$0xff] }
 0x9b7   : > { %3990 = vmatmul.mubr.f32.vlgmr.msra.gmra.mrb[36].mxu0 %v3915_v12  ;;  %v3917_v0 = vmax.f32 %v3913_v30, 0.0  ;;  %v6258_v54 = vpack.c.bf16 %v5224_v48, %v5223_v27 }
 0x9b8   : > { %v3918_v20 = vmax.f32 %v3914_v41, 0.0  ;;  %6170 = vmatpush1.bf16.msra.mxu0 %v9125_v55  ;;  %6295 = vmatpush3.bf16.msra.mxu1 %v6294_v11  ;;  %v5197_v55 = vld [vmem:[%s8872_s13 + $0x50] sm:$0xff]  ;;  %v5225_v11 = vld [vmem:[%s8872_s13 + $0x120] sm:$0xff] }
 0x9b9   : > { %6171 = vmatprep.subr.bf16.mxu0 %v8993_v58  ;;  %6296 = vmatprep.subr.bf16.mxu1 %v8993_v58 }
 0x9ba   : > { %5188 = vmatprep.mubr.msk.f32.mxu0 %vm729_vm0, %v3918_v20 }
 0x9bb   : > { %3995 = vmatmul.mubr.f32.gmra.mrb[38].mxu0 %v3917_v0 }
 0x9bc   : > { %6173 = vmatpush1.bf16.msra.mxu0 %v9126_v23  ;;  %5189 = vmatprep.mubr.msk.f32.mxu0 %vm729_vm0, %v3916_v46  ;;  %v6297_v46 = vpack.c.bf16 %v4689_v39, %v4688_v13  ;;  %v5226_v13 = vld [vmem:[%s8872_s13 + $0x128] sm:$0xff] }
 0x9bd   : > { %6174 = vmatprep.subr.bf16.mxu0 %v8993_v58  ;;  %v6261_v39 = vpack.c.bf16 %v5226_v13, %v5225_v11 }
 0x9be   : > { %6298 = vmatpush3.bf16.msra.mxu1 %v6297_v46  ;;  %v5227_v46 = vld [vmem:[%s8872_s13 + $0x130] sm:$0xff] }
 0x9bf   : > { %6299 = vmatprep.subr.bf16.mxu1 %v8993_v58 }
 0x9c0   : > { %6176 = vmatpush1.bf16.msra.mxu0 %v9127_v1 }
 0x9c1   : > { %6177 = vmatprep.subr.bf16.mxu0 %v8993_v58 }
 0x9c4   : > { %6179 = vmatpush1.bf16.msra.mxu0 %v9128_v18 }
 0x9c5   : > { %6180 = vmatprep.subr.bf16.mxu0 %v8993_v58 }
 0x9c8   : > { %6182 = vmatpush1.bf16.msra.mxu0 %v9129_v19 }
 0x9c9   : > { %6183 = vmatprep.subr.bf16.mxu0 %v8993_v58 }
 0x9cc   : > { %6185 = vmatpush1.bf16.msra.mxu0 %v9130_v49  ;;  %v5199_v49 = vld [vmem:[%s8872_s13 + $0x60] sm:$0xff] }
 0x9cd   : > { %6186 = vmatprep.subr.bf16.mxu0 %v8993_v58 }
 0x9d0   : > { %6188 = vmatpush1.bf16.msra.mxu0 %v9131_v50  ;;  %v5200_v50 = vld [vmem:[%s8872_s13 + $0x68] sm:$0xff] }
 0x9d1   : > { %6189 = vmatprep.subr.bf16.mxu0 %v8993_v58 }
 0x9d4   : > { %6191 = vmatpush1.bf16.msra.mxu0 %v9132_v61  ;;  %v4587_v61 = vrot.slane %v8234_v4, 4 }
 0x9d5   : > { %6192 = vmatprep.subr.bf16.mxu0 %v8993_v58 }
 0x9d8   : > { %6194 = vmatpush1.bf16.msra.mxu0 %v9133_v42 }
 0x9d9   : > { %6195 = vmatprep.subr.bf16.mxu0 %v8993_v58 }
 0x9dc   : > { %6197 = vmatpush1.bf16.msra.mxu0 %v9134_v38 }
 0x9dd   : > { %6198 = vmatprep.subr.bf16.mxu0 %v8993_v58 }
 0x9df   : > { %4065 = vmatmul.mubr.f32.vlgmr.msra.gmra.mrb[40].mxu0 %v3915_v12  ;;  %v4691_v12 = vld [vmem:[%s8874_s15 + $0x68] sm:$0xff] }
 0x9e0   : > { %5190 = vmatprep.mubr.msk.f32.mxu0 %vm729_vm0, %v3918_v20  ;;  %v6300_v30 = vpack.c.bf16 %v4691_v12, %v4690_v45  ;;  %v5228_v45 = vld [vmem:[%s8872_s13 + $0x138] sm:$0xff] }
 0x9e1   : > { %v6264_v12 = vpack.c.bf16 %v5228_v45, %v5227_v46 }
 0x9e2   : > { %6301 = vmatpush3.bf16.msra.mxu1 %v6300_v30  ;;  %v5230_v30 = vld [vmem:[%s8872_s13 + $0x140] sm:$0xff] }
 0x9e3   : > { %4070 = vmatmul.mubr.f32.gmra.mrb[42].mxu0 %v3917_v0  ;;  %6302 = vmatprep.subr.bf16.mxu1 %v8993_v58  ;;  %v5198_v0 = vld [vmem:[%s8872_s13 + $0x58] sm:$0xff] }
 0x9e4   : > { %5435 = vmatprep.mubr.msk.f32.mxu0 %vm6553_vm10, %v9014_v43  ;;  %v6222_v19 = vpack.c.bf16 %v5198_v0, %v5197_v55  ;;  %v5232_v0 = vld [vmem:[%s8872_s13 + $0x150] sm:$0xff] }
 0xa8a   : > { %v3991_v44 = vpop.f32.mrb[36].mxu0 }
 0xa8b   : > { %v3993_v24 = vpop.f32.mrb[37].mxu0 }
 0xa8c   : > { %v6225_v24 = vpack.c.bf16 %v5200_v50, %v5199_v49  ;;  %v5236_v50 = vld [vmem:[%s8872_s13 + $0x170] sm:$0xff] }
 0xa8e   : > { %v3996_v53 = vpop.f32.mrb[38].mxu0 }
 0xa8f   : > { %v3998_v6 = vpop.f32.mrb[39].mxu0 }
 0xa90   : > { %v5202_v6 = vld [vmem:[%s8872_s13 + $0x78] sm:$0xff] }
 0xab2   : > { %v4066_v7 = vpop.f32.mrb[40].mxu0 }
 0xab3   : > { %v4075_v26 = vmax.f32 %v3991_v44, %v4066_v7  ;;  %v4068_v28 = vpop.f32.mrb[41].mxu0 }
 0xab4   : > { %v5204_v28 = vld [vmem:[%s8872_s13 + $0x88] sm:$0xff] }
 0xab6   : > { %v4071_v17 = vpop.f32.mrb[42].mxu0 }
 0xab7   : > { %v4076_v52 = vmax.f32 %v3996_v53, %v4071_v17  ;;  %v4073_v2 = vpop.f32.mrb[43].mxu0  ;;  %v5201_v53 = vld [vmem:[%s8872_s13 + $0x70] sm:$0xff] }
 0xab8   : > { %v6228_v7 = vpack.c.bf16 %v5202_v6, %v5201_v53  ;;  %v5206_v2 = vld [vmem:[%s8872_s13 + $0x98] sm:$0xff]  ;;  %v4692_v6 = vld [vmem:[%s8874_s15 + $0x70] sm:$0xff] }
 0xab9   : > { %v6199_v56 = vpack.c.bf16 %v4076_v52, %v4075_v26  ;;  %v5203_v26 = vld [vmem:[%s8872_s13 + $0x80] sm:$0xff]  ;;  %v5205_v52 = vld [vmem:[%s8872_s13 + $0x90] sm:$0xff] }
 0xaba   : > { %v6231_v17 = vpack.c.bf16 %v5204_v28, %v5203_v26  ;;  %v5196_v28 = vld [vmem:[%s8873_s14] ss:$0 sm:$0xff] }
 0xabb   : > { %6201 = vmatpush3.bf16.msk.msra.mxu0 %vm8115_vm12, %v6199_v56 }
 0xabc   : > { %6202 = vmatprep.subr.bf16.mxu0 %v8993_v58 }
 0xabe   : > { %5436 = vmatmul.mubr.msk.f32.vlgmr.msra.gmra.mrb[44].mxu0 %vm2425_vm13, %v8124_v29  ;;  %v4231_v29 = vld [vmem:[%s8872_s13 + $0x20] sm:$0xff] }
 0xabf   : > { %6205 = vmatpush3.bf16.msk.msra.mxu0 %vm8115_vm12, %v6199_v56  ;;  %5442 = vmatprep.mubr.msk.f32.mxu0 %vm6553_vm10, %v9014_v43  ;;  %v6213_v3 = vpack.c.bf16 %v4232_v40, %v4231_v29  ;;  %v6234_v56 = vpack.c.bf16 %v5206_v2, %v5205_v52 }
 0xac0   : > { %6206 = vmatprep.subr.bf16.mxu0 %v8993_v58 }
 0xac2   : > { %5443 = vmatmul.mubr.msk.f32.vlgmr.msra.gmra.mrb[46].mxu0 %vm2425_vm13, %v8136_v33  ;;  %v4233_v33 = vld [vmem:[%s8872_s13 + $0x30] sm:$0xff] }
 0xac3   : > { %6208 = vmatpush3.bf16.msra.mxu0 %v6207_v31  ;;  %5465 = vmatprep.mubr.msk.f32.mxu0 %vm6553_vm10, %v9014_v43  ;;  %v6216_v9 = vpack.c.bf16 %v4234_v8, %v4233_v33  ;;  %v4319_v31 = vrot.slane %v8234_v4, 1  ;;  %v5213_v33 = vld [vmem:[%s8872_s13 + $0xc8] sm:$0xff] }
 0xac4   : > { %6209 = vmatprep.subr.bf16.mxu0 %v8993_v58 }
 0xac7   : > { %6211 = vmatpush3.bf16.msra.mxu0 %v6210_v62  ;;  %v5211_v62 = vld [vmem:[%s8872_s13 + $0xb8] sm:$0xff] }
 0xac8   : > { %6212 = vmatprep.subr.bf16.mxu0 %v8993_v58  ;;  %v6240_v40 = vpack.c.bf16 %v5211_v62, %v5210_v36  ;;  %v4776_v62 = vld [vmem:[%s8876_s17 + $0x20] sm:$0xff] }
 0xacb   : > { %6214 = vmatpush3.bf16.msra.mxu0 %v6213_v3  ;;  %v5212_v3 = vld [vmem:[%s8872_s13 + $0xc0] sm:$0xff] }
 0xacc   : > { %6215 = vmatprep.subr.bf16.mxu0 %v8993_v58  ;;  %v6243_v8 = vpack.c.bf16 %v5213_v33, %v5212_v3  ;;  %v4778_v3 = vld [vmem:[%s8876_s17 + $0x30] sm:$0xff] }
 0xacf   : > { %6217 = vmatpush3.bf16.msra.mxu0 %v6216_v9  ;;  %v5214_v9 = vld [vmem:[%s8872_s13 + $0xd0] sm:$0xff] }
 0xad0   : > { %6218 = vmatprep.subr.bf16.mxu0 %v8993_v58  ;;  %v6246_v51 = vpack.c.bf16 %v5215_v14, %v5214_v9  ;;  %v4781_v9 = vld [vmem:[%s8876_s17 + $0x48] sm:$0xff] }
 0xad3   : > { %6220 = vmatpush3.bf16.msra.mxu0 %v6219_v16  ;;  %v5216_v16 = vld [vmem:[%s8872_s13 + $0xe0] sm:$0xff] }
 0xad4   : > { %6221 = vmatprep.subr.bf16.mxu0 %v8993_v58  ;;  %v6249_v21 = vpack.c.bf16 %v5217_v15, %v5216_v16  ;;  %v4783_v16 = vld [vmem:[%s8876_s17 + $0x58] sm:$0xff] }
 0xb91   : > { %v4146_v35 = vpop.f32.mrb[44].mxu0 }
 0xb92   : > { %v5437_v41 = vpop.f32.mrb[45].mxu0 }
 0xb95   : > { %v4216_v20 = vpop.f32.mrb[46].mxu0 }
 0xb96   : > { %v8573_v23 = vmax.f32 %v4146_v35, %v4216_v20  ;;  %v5444_v1 = vpop.f32.mrb[47].mxu0  ;;  %v5231_v35 = vld [vmem:[%s8872_s13 + $0x148] sm:$0xff]  ;;  %v4497_v20 = vrot.slane %v8234_v4, 3 }
 0xb97   : > { %v6267_v55 = vpack.c.bf16 %v5231_v35, %v5230_v30  ;;  %v5233_v1 = vld [vmem:[%s8872_s13 + $0x158] sm:$0xff] }
 0xb98   : > { %v4223_v18 = vrot.slane %v8573_v23, 7  ;;  %v4589_v42 = vrot.slane %v8573_v23, 3  ;;  %v4321_v29 = vsel %vm4225_vm15, %v4319_v31, %v8573_v23  ;;  %v4409_v59 = vrot.slane %v8573_v23, 1  ;;  %v4774_v31 = vld [vmem:[%s8876_s17 + $0x10] sm:$0xff] }
 0xb99   : > { %v4499_v41 = vrot.slane %v8573_v23, 2  ;;  %v6270_v23 = vpack.c.bf16 %v5233_v1, %v5232_v0 }
 0xb9a   : > { %v4226_v38 = vsel %vm4225_vm15, %v8234_v4, %v4223_v18  ;;  %v8588_v44 = vsel %vm4225_vm15, %v4587_v61, %v4589_v42  ;;  %v4411_v37 = vsel %vm4225_vm15, %v4407_v63, %v4409_v59  ;;  %v5234_v4 = vld [vmem:[%s8872_s13 + $0x160] sm:$0xff]  ;;  %v5237_v61 = vld [vmem:[%s8872_s13 + $0x178] sm:$0xff]  ;;  %v4786_v59 = vld [vmem:[%s8876_s17 + $0x70] sm:$0xff] }
 0xb9b   : > { %5466 = vmatmul.mubr.msk.f32.vlgmr.msra.gmra.mrb[48].mxu0 %vm4237_vm14, %v4226_v38  ;;  %v4501_v18 = vsel %vm4225_vm15, %v4497_v20, %v4499_v41  ;;  %v6276_v42 = vpack.c.bf16 %v5237_v61, %v5236_v50  ;;  %v5238_v38 = vld [vmem:[%s8872_s13 + $0x180] sm:$0xff]  ;;  %v4787_v63 = vld [vmem:[%s8876_s17 + $0x78] sm:$0xff] }
 0xb9c   : > { %6223 = vmatpush3.bf16.msra.mxu0 %v6222_v19  ;;  %5488 = vmatprep.mubr.msk.f32.mxu0 %vm6553_vm10, %v9014_v43  ;;  %v5235_v19 = vld [vmem:[%s8872_s13 + $0x168] sm:$0xff] }
 0xb9d   : > { %6224 = vmatprep.subr.bf16.mxu0 %v8993_v58  ;;  %v6273_v49 = vpack.c.bf16 %v5235_v19, %v5234_v4 }
 0xba0   : > { %6226 = vmatpush3.bf16.msra.mxu0 %v6225_v24  ;;  %v5239_v24 = vld [vmem:[%s8872_s13 + $0x188] sm:$0xff] }
 0xba1   : > { %6227 = vmatprep.subr.bf16.mxu0 %v8993_v58  ;;  %v6279_v53 = vpack.c.bf16 %v5239_v24, %v5238_v38 }
 0xba4   : > { %6229 = vmatpush3.bf16.msra.mxu0 %v6228_v7  ;;  %v4693_v7 = vld [vmem:[%s8874_s15 + $0x78] sm:$0xff] }
 0xba5   : > { %6230 = vmatprep.subr.bf16.mxu0 %v8993_v58  ;;  %v6303_v26 = vpack.c.bf16 %v4693_v7, %v4692_v6 }
 0xba7   : > { %6304 = vmatpush3.bf16.msra.mxu1 %v6303_v26 }
 0xba8   : > { %6232 = vmatpush3.bf16.msra.mxu0 %v6231_v17  ;;  %6305 = vmatprep.subr.bf16.mxu1 %v8993_v58  ;;  %v4773_v17 = vld [vmem:[%s8876_s17 + $0x8] sm:$0xff] }
 0xba9   : > { %6233 = vmatprep.subr.bf16.mxu0 %v8993_v58 }
 0xbac   : > { %6235 = vmatpush3.bf16.msra.mxu0 %v6234_v56 }
 0xbad   : > { %6236 = vmatprep.subr.bf16.mxu0 %v8993_v58 }
 0xbaf   : > { %5489 = vmatmul.mubr.msk.f32.vlgmr.msra.gmra.mrb[48].mxu0 %vm4237_vm14, %v4321_v29  ;;  %v4777_v29 = vld [vmem:[%s8876_s17 + $0x28] sm:$0xff] }
 0xbb0   : > { %6238 = vmatpush3.bf16.msra.mxu0 %v6237_v10  ;;  %5511 = vmatprep.mubr.msk.f32.mxu0 %vm6553_vm10, %v9014_v43  ;;  %v4775_v10 = vld [vmem:[%s8876_s17 + $0x18] sm:$0xff] }
 0xbb1   : > { %6239 = vmatprep.subr.bf16.mxu0 %v8993_v58  ;;  %v6309_v36 = vpack.c.bf16 %v4775_v10, %v4774_v31 }
 0xbb4   : > { %6241 = vmatpush3.bf16.msra.mxu0 %v6240_v40  ;;  %v6312_v40 = vpack.c.bf16 %v4777_v29, %v4776_v62 }
 0xbb5   : > { %6242 = vmatprep.subr.bf16.mxu0 %v8993_v58 }
 0xbb8   : > { %6244 = vmatpush3.bf16.msra.mxu0 %v6243_v8  ;;  %v4780_v8 = vld [vmem:[%s8876_s17 + $0x40] sm:$0xff] }
 0xbb9   : > { %6245 = vmatprep.subr.bf16.mxu0 %v8993_v58  ;;  %v6318_v14 = vpack.c.bf16 %v4781_v9, %v4780_v8 }
 0xbbc   : > { %6247 = vmatpush3.bf16.msra.mxu0 %v6246_v51  ;;  %v4782_v51 = vld [vmem:[%s8876_s17 + $0x50] sm:$0xff] }
 0xbbd   : > { %6248 = vmatprep.subr.bf16.mxu0 %v8993_v58  ;;  %v6321_v15 = vpack.c.bf16 %v4783_v16, %v4782_v51 }
 0xbc0   : > { %6250 = vmatpush3.bf16.msra.mxu0 %v6249_v21  ;;  %v4784_v21 = vld [vmem:[%s8876_s17 + $0x60] sm:$0xff] }
 0xbc1   : > { %6251 = vmatprep.subr.bf16.mxu0 %v8993_v58  ;;  %v6324_v57 = vpack.c.bf16 %v4785_v22, %v4784_v21 }
 0xbc3   : > { %5512 = vmatmul.mubr.msk.f32.vlgmr.msra.gmra.mrb[48].mxu0 %vm4237_vm14, %v4411_v37 }
 0xbc4   : > { %6253 = vmatpush3.bf16.msra.mxu0 %v6252_v32  ;;  %5534 = vmatprep.mubr.msk.f32.mxu0 %vm6553_vm10, %v9014_v43  ;;  %v6327_v32 = vpack.c.bf16 %v4787_v63, %v4786_v59 }
 0xbc5   : > { %6254 = vmatprep.subr.bf16.mxu0 %v8993_v58 }
 0xbc8   : > { %6256 = vmatpush3.bf16.msra.mxu0 %v6255_v25 }
 0xbc9   : > { %6257 = vmatprep.subr.bf16.mxu0 %v8993_v58 }
 0xbcc   : > { %6259 = vmatpush3.bf16.msra.mxu0 %v6258_v54 }
 0xbcd   : > { %6260 = vmatprep.subr.bf16.mxu0 %v8993_v58 }
 0xbd0   : > { %6262 = vmatpush3.bf16.msra.mxu0 %v6261_v39 }
 0xbd1   : > { %6263 = vmatprep.subr.bf16.mxu0 %v8993_v58 }
 0xbd4   : > { %6265 = vmatpush3.bf16.msra.mxu0 %v6264_v12 }
 0xbd5   : > { %6266 = vmatprep.subr.bf16.mxu0 %v8993_v58 }
 0xbd7   : > { %5535 = vmatmul.mubr.msk.f32.vlgmr.msra.gmra.mrb[48].mxu0 %vm4237_vm14, %v4501_v18 }
 0xbd8   : > { %6268 = vmatpush3.bf16.msra.mxu0 %v6267_v55  ;;  %5557 = vmatprep.mubr.msk.f32.mxu0 %vm6553_vm10, %v9014_v43 }
 0xbd9   : > { %6269 = vmatprep.subr.bf16.mxu0 %v8993_v58 }
 0xbdc   : > { %6271 = vmatpush3.bf16.msra.mxu0 %v6270_v23 }
 0xbdd   : > { %6272 = vmatprep.subr.bf16.mxu0 %v8993_v58 }
 0xbe0   : > { %6274 = vmatpush3.bf16.msra.mxu0 %v6273_v49 }
 0xbe1   : > { %6275 = vmatprep.subr.bf16.mxu0 %v8993_v58 }
 0xbe4   : > { %6277 = vmatpush3.bf16.msra.mxu0 %v6276_v42 }
 0xbe5   : > { %6278 = vmatprep.subr.bf16.mxu0 %v8993_v58 }
 0xbe8   : > { %6280 = vmatpush3.bf16.msra.mxu0 %v6279_v53 }
 0xbeb   : > { %5558 = vmatmul.mubr.msk.f32.vlgmr.msra.gmra.mrb[48].mxu0 %vm4237_vm14, %v8588_v44  ;;  %v4772_v44 = vld [vmem:[%s8876_s17] sm:$0xff] }
 0xbec   : > { %v6306_v5 = vpack.c.bf16 %v4773_v17, %v4772_v44 }
 0xcbe   : > { %v4672_v52 = vpop.f32.mrb[48].mxu0 }
 0xcbf   : > { %v6337_v2 = vadd.f32 %v5196_v28, %v4672_v52  ;;  %v5559_v56 = vpop.f32.mrb[49].mxu0 }
 0xcc1   : > { %v4677_v47 = vmax.f32 %v6337_v2, 0.0 }
 0xcc3   : > { %5593 = vmatmul.mubr.f32.vlgmr.msra.gmra.mrb[48].mxu1 %v4677_v47 }
 0xcc4   : > { %6307 = vmatpush3.bf16.msra.mxu1 %v6306_v5  ;;  %5627 = vmatprep.mubr.msk.f32.mxu1 %vm6553_vm10, %v9014_v43  ;;  %v4779_v43 = vld [vmem:[%s8876_s17 + $0x38] sm:$0xff] }
 0xcc5   : > { %6308 = vmatprep.subr.bf16.mxu1 %v8993_v58  ;;  %v6315_v33 = vpack.c.bf16 %v4779_v43, %v4778_v3 }
 0xcc8   : > { %6310 = vmatpush3.bf16.msra.mxu1 %v6309_v36 }
 0xcc9   : > { %6311 = vmatprep.subr.bf16.mxu1 %v8993_v58 }
 0xccc   : > { %6313 = vmatpush3.bf16.msra.mxu1 %v6312_v40 }
 0xccd   : > { %6314 = vmatprep.subr.bf16.mxu1 %v8993_v58 }
 0xcd0   : > { %6316 = vmatpush3.bf16.msra.mxu1 %v6315_v33 }
 0xcd1   : > { %6317 = vmatprep.subr.bf16.mxu1 %v8993_v58 }
 0xcd4   : > { %6319 = vmatpush3.bf16.msra.mxu1 %v6318_v14 }
 0xcd5   : > { %6320 = vmatprep.subr.bf16.mxu1 %v8993_v58 }
 0xcd8   : > { %6322 = vmatpush3.bf16.msra.mxu1 %v6321_v15 }
 0xcd9   : > { %6323 = vmatprep.subr.bf16.mxu1 %v8993_v58 }
 0xcdc   : > { %6325 = vmatpush3.bf16.msra.mxu1 %v6324_v57 }
 0xcdd   : > { %6326 = vmatprep.subr.bf16.mxu1 %v8993_v58  ;;  %v5242_v58 = vld [vmem:[%s9135_s22] ss:$0 sm:$0xff] }
 0xce0   : > { %6328 = vmatpush3.bf16.msra.mxu1 %v6327_v32 }
 0xd96   : > { %v4767_v34 = vpop.f32.mrb[48].mxu1 }
 0xd97   : > { %v4768_v37 = vadd.f32 %v5241_v60, %v4767_v34  ;;  %v5594_v25 = vpop.f32.mrb[49].mxu1 }
 0xd99   : > { %v4771_v27 = vmax.f32 %v4768_v37, 0.0 }
 0xd9b   : > { %5628 = vmatmul.mubr.f32.vlgmr.msra.gmra.mrb[50].mxu1 %v4771_v27 }
 0xe6e   : > { %v4861_v48 = vpop.f32.mrb[50].mxu1 }
 0xe6f   : > { %v4862_v54 = vadd.f32 %v5242_v58, %v4861_v48  ;;  %v5629_v11 = vpop.f32.mrb[51].mxu1 }
 0xe71   : > { %4865 = vst [vmem:[%s598_s20] sm:$0x3] %v4862_v54 }
 0xe72   : > { %6499 = shalt.err (!%p6496_p3)
}
 0xe73   : > { %s6500_s0 = scalar_lea.hbm %s8817_s25, 32  ;;  %s6504_s20 = scalar_lea.hbm %s9136_s18, 64 }
 0xe74   : > { %p6501_p4 = scmp.ne.s32.totalorder %s8817_s25, %s6500_s0  ;;  %p6505_p9 = scmp.lt.u32.totalorder %s8817_s25, %s9136_s18 }
 0xe75   : > { %p6506_p10 = scmp.lt.u32.totalorder %s6504_s20, %s6500_s0  ;;  %p6508_p12 = scmp.lt.u32.totalorder %s6500_s0, %s8817_s25 }
 0xe76   : > { %p6502_p7 = pnand %p6501_p4, %p6693_p5 }
 0xe77   : > { %p6507_p11 = por %p6506_p10, %p6505_p9 }
 0xe78   : > { %p6503_p8 = pneg %p6502_p7 }
 0xe79   : > { %p6509_p13 = por %p6508_p12, %p6507_p11 }
 0xe7b   : > { %p6510_p0 = pnand %p6509_p13, %p6503_p8 }
 0xe7d   : > { %6513 = shalt.err (!%p6510_p0)
}
 0xe7e   : > { %6434 = dma.vmem_to_hbm [thread:$0]  (%p6693_p5), %s8819_s27, 32, %s8817_s25, %s4867_s4  }
 0xe7f PF: > { %s9137_s23 = sld [smem:[#allocation7_spill]]  ;;  %s9138_s1 = sld [smem:[#allocation5_spill]] }
 0xe85   : > { %p6440_p1 = scmp.ge.s32.totalorder %s9137_s23, 2  ;;  %s4892_s26 = sand.u32 1, %s9138_s1  }
 0xe86   : > { %s4893_s22 = scalar_lea.sflag [#allocation3], %s4892_s26 }
 0xe87   : > { %p6437_p2 = pnand %p6440_p1, %p6697_p6 }
 0xe89   : > { %6531 = dma.done.wait (!%p6437_p2), %s4893_s22, 32  }
 0xe8a   : > { %6533 = vsyncadd (!%p6437_p2), %s4893_s22, 4294967264  ;;  %s9140_s21 = sld [smem:[#allocation8_spill]]  ;;  %s9141_s24 = sld [smem:[#allocation6_spill]] }
 0xe8b   : > { %s9142_s20 = sld [smem:[#allocation9_spill]]  ;;  %s9143_s0 = smov %s6540_s30 }
 0xe90   : > { %p29_p3 = scmp.ge.s32.totalorder %s9140_s21, 4   ;;  %s9144_s30 = smov %s9141_s24 }
 0xe92   :  { %31 = sbr.rel (!%p29_p3) target bundleno = 11 (0xb), region = 144 }
 0xe99   :  { %4898 = vsyncpa [#allocation3], 1 }
 0xe9a   :  { %4900 = vsyncpa [#allocation3 + $0x1], 1 }

</bundles_post_ra>
